<compile_context>
chip_gen: v7x
topology: tpu7x:2x2x1
jax: 0.10.0
libtpu: 0.0.40
codegen_flags: <defaults>
</compile_context>

<pallas_src>
import jax
import jax.numpy as jnp
from jax.experimental import pallas as pl
from jax.experimental.pallas import tpu as pltpu


def block_kernel(x_ref, w12_ref, b12_ref, w3_ref, b3_ref, w4_ref, b4_ref,
                 o_ref):
    # x_ref : (Bt, H, W, CP) f32   activations, channels zero-padded to CP lanes
    # w12   : (CP, 2*CP)     bf16  conv1 | conv2 weights fused along N
    # b12   : (1, 2*CP)      f32
    # w3    : (3, CP, 3*CP)  bf16  kn2row layout: w3[dy][:, dx*CP:(dx+1)*CP] = W3[dy,dx]
    # b3,b4 : (1, CP) f32 ;  w4 : (CP, CP) bf16
    Bt, H, W, CP = x_ref.shape
    M = Bt * H * W

    xb = x_ref[...].reshape(M, CP).astype(jnp.bfloat16)

    # ---- fused conv1 | conv2 (1x1): one MXU push, N = 2*CP ----
    y12 = jnp.dot(xb, w12_ref[...], preferred_element_type=jnp.float32)
    y12 = y12 + b12_ref[...]
    x1 = y12[:, :CP]                                        # conv1 -> residual
    x0 = jnp.maximum(y12[:, CP:], 0.0).astype(jnp.bfloat16)  # relu(conv2)

    # ---- conv3 (3x3, padding=1) via kn2row (matmul first, shift after) ----
    # Boundary masks; they also kill any cross-image wraparound when Bt > 1,
    # since every position whose roll source crosses an image boundary is
    # exactly a position where the spatial zero-padding applies.
    ii = jax.lax.broadcasted_iota(jnp.int32, (Bt, H, W, CP), 1).reshape(M, CP)
    jj = jax.lax.broadcasted_iota(jnp.int32, (Bt, H, W, CP), 2).reshape(M, CP)
    row_ok = (ii >= 1, None, ii <= H - 2)   # dy = 0 reads i-1, dy = 2 reads i+1
    col_ok = (jj >= 1, None, jj <= W - 2)   # dx = 0 reads j-1, dx = 2 reads j+1

    acc = jnp.zeros((M, CP), jnp.float32)
    for dy in range(3):
        # Per-dy matmul (N = 3*CP) keeps the live intermediate bounded at
        # M * 3*CP f32 instead of M * 9*CP, and streams x0 straight off vregs.
        y3 = jnp.dot(x0, w3_ref[dy], preferred_element_type=jnp.float32)
        for dx in range(3):
            tap = y3[:, dx * CP:(dx + 1) * CP]        # aligned 128-lane slab
            shift = ((1 - dy) * W + (1 - dx)) % M     # fold dy+dx into one roll
            if shift:
                tap = pltpu.roll(tap, shift, 0)       # XLU slot (free filler)
            rm, cm = row_ok[dy], col_ok[dx]
            mask = rm if cm is None else (cm if rm is None
                                          else jnp.logical_and(rm, cm))
            if mask is not None:
                tap = jnp.where(mask, tap, 0.0)
            acc = acc + tap
    x3 = jnp.maximum(acc + b3_ref[...], 0.0).astype(jnp.bfloat16)

    # ---- conv4 (1x1) + relu ----
    x4 = jnp.dot(x3, w4_ref[...], preferred_element_type=jnp.float32)
    x4 = jnp.maximum(x4 + b4_ref[...], 0.0)

    # ---- residual add + final relu (lane-dense 128-channel output slab) ----
    o_ref[...] = jnp.maximum(x4 + x1, 0.0).reshape(Bt, H, W, CP)


def prepare_params(params, channels, *, matmul_dtype=jnp.bfloat16):
    """One-time weight prep: pad to CP lanes, fuse conv1|conv2, kn2row-reshape
    conv3, cast matmul operands to bf16.  Returns (prepared_params, CP)."""
    w1, b1, w2, b2, w3, b3, w4, b4 = params
    C = channels
    CP = max(128, ((C + 127) // 128) * 128)
    pc = CP - C
    pad_mat = lambda w: jnp.pad(w, ((0, pc), (0, pc)))
    pad_bias = lambda b: jnp.pad(b, ((0, 0), (0, pc))).astype(jnp.float32)

    w12 = jnp.concatenate([pad_mat(w1), pad_mat(w2)], axis=1).astype(matmul_dtype)
    b12 = jnp.concatenate([pad_bias(b1), pad_bias(b2)], axis=1)
    # kn2row layout: w3kn[dy][:, dx*CP:(dx+1)*CP] = W3[dy, dx] (cin x cout, padded)
    w3p = jnp.pad(w3, ((0, 0), (0, 0), (0, pc), (0, pc)))           # (3,3,CP,CP)
    w3kn = jnp.transpose(w3p, (0, 2, 1, 3)).reshape(3, CP, 3 * CP).astype(matmul_dtype)
    return (w12, b12, w3kn, pad_bias(b3),
            pad_mat(w4).astype(matmul_dtype), pad_bias(b4)), CP


def pad_channels(x_nhwc, CP):
    C = x_nhwc.shape[-1]
    return jnp.pad(x_nhwc, ((0, 0), (0, 0), (0, 0), (0, CP - C)))


def block_forward_padded(xp, prep, *, bt=None):
    """xp: (B, H, W, CP) f32, channel-padded NHWC.  Returns (B, H, W, CP)."""
    B, H, W, CP = xp.shape
    w12, b12, w3kn, b3p, w4p, b4p = prep

    if bt is None:
        # Amortize the ~0.35us per-grid-step overhead when B is big, but keep
        # >= 2 steps so both v7x TensorCores get work.
        bt = 1
        for cand in (8, 4, 2):
            if B % cand == 0 and B // cand >= 2:
                bt = cand
                break
    assert B % bt == 0
    # TODO(synk): for B == 1 add a second "parallel" grid axis over H row-tiles
    # (needs a 1-row halo in the input BlockSpec) so both v7x cores stay busy.
    # TODO(synk): pixel-pack 4 px/lane-group ((B,H,W,32)->(B,H,W/4,128)) with
    # block-diagonal 1x1 weights to cut padded-lane HBM/MXU waste 4x.

    macs = B * H * W * CP * CP * 12          # conv1+conv2 (2) + conv3 (9) + conv4 (1)
    bytes_acc = 2 * xp.size * 4 + sum(int(a.size) * a.dtype.itemsize
                                      for a in (w12, b12, w3kn, b3p, w4p, b4p))

    def full_spec(arr):
        nd = arr.ndim
        return pl.BlockSpec(arr.shape, lambda b, _nd=nd: (0,) * _nd)

    return pl.pallas_call(
        block_kernel,
        out_shape=jax.ShapeDtypeStruct((B, H, W, CP), jnp.float32),
        grid=(B // bt,),
        in_specs=[
            pl.BlockSpec((bt, H, W, CP), lambda b: (b, 0, 0, 0)),
            full_spec(w12), full_spec(b12),
            full_spec(w3kn), full_spec(b3p),
            full_spec(w4p), full_spec(b4p),
        ],
        out_specs=pl.BlockSpec((bt, H, W, CP), lambda b: (b, 0, 0, 0)),
        compiler_params=pltpu.CompilerParams(
            dimension_semantics=("parallel",),
            vmem_limit_bytes=48 * 1024 * 1024),
        cost_estimate=pl.CostEstimate(flops=2 * macs, transcendentals=0,
                                      bytes_accessed=int(bytes_acc)),
    )(xp, w12, b12, w3kn, b3p, w4p, b4p)


def block_forward(x_nhwc, params):
    """Convenience wrapper (unpadded NHWC in/out).  In a real network, pad once
    at entry and keep the 128-lane layout across layers via block_forward_padded."""
    B, H, W, C = x_nhwc.shape
    prep, CP = prepare_params(params, C)
    return block_forward_padded(pad_channels(x_nhwc, CP), prep)[..., :C]


def ref_forward(x_nhwc, params):
    """Pure-JAX f32 reference (NHWC) matching the PyTorch forward."""
    w1, b1, w2, b2, w3, b3, w4, b4 = params

    def conv1x1(x, w, b):
        return jnp.einsum('bhwc,cd->bhwd', x, w) + b.reshape(1, 1, 1, -1)

    def conv3x3(x, w, b):
        y = jax.lax.conv_general_dilated(
            x, w, window_strides=(1, 1), padding='SAME',
            dimension_numbers=('NHWC', 'HWIO', 'NHWC'))
        return y + b.reshape(1, 1, 1, -1)

    x1 = conv1x1(x_nhwc, w1, b1)
    x0 = jax.nn.relu(conv1x1(x_nhwc, w2, b2))
    x0 = jax.nn.relu(conv3x3(x0, w3, b3))
    x0 = jax.nn.relu(conv1x1(x0, w4, b4))
    return jax.nn.relu(x0 + x1)


def init_params(key, channels):
    ks = jax.random.split(key, 8)
    scale1 = 1.0 / jnp.sqrt(channels)          # 1x1 convs: fan_in = C
    scale3 = 1.0 / jnp.sqrt(9.0 * channels)    # 3x3 conv: fan_in = 9*C
    w1 = jax.random.normal(ks[0], (channels, channels), jnp.float32) * scale1
    b1 = jax.random.normal(ks[1], (1, channels), jnp.float32) * scale1
    w2 = jax.random.normal(ks[2], (channels, channels), jnp.float32) * scale1
    b2 = jax.random.normal(ks[3], (1, channels), jnp.float32) * scale1
    w3 = jax.random.normal(ks[4], (3, 3, channels, channels), jnp.float32) * scale3
    b3 = jax.random.normal(ks[5], (1, channels), jnp.float32) * scale3
    w4 = jax.random.normal(ks[6], (channels, channels), jnp.float32) * scale1
    b4 = jax.random.normal(ks[7], (1, channels), jnp.float32) * scale1
    return (w1, b1, w2, b2, w3, b3, w4, b4)


if __name__ == "__main__":
    B, C, H, W = 2, 32, 16, 16
    key = jax.random.PRNGKey(0)
    k_x, k_p = jax.random.split(key)

    # PyTorch-style NCHW input, converted to NHWC for the kernel.
    x_nchw = jax.random.normal(k_x, (B, C, H, W), jnp.float32)
    x_nhwc = jnp.transpose(x_nchw, (0, 2, 3, 1))
    params = init_params(k_p, C)

    # Weight prep + channel pad happen once ("network entry"); the kernel keeps
    # the lane-dense 128-channel layout end to end, slice once at exit.
    prep, CP = prepare_params(params, C)
    xp = pad_channels(x_nhwc, CP)

    out_p = jax.block_until_ready(block_forward_padded(xp, prep))
    out = out_p[..., :C]

    ref = jax.block_until_ready(ref_forward(x_nhwc, params))
    assert out.shape == (B, H, W, C)
    max_err = float(jnp.max(jnp.abs(out - ref)))
    # bf16 MXU operands (f32 accumulation) -> relaxed tolerance vs the f32 ref.
    assert jnp.allclose(out, ref, atol=5e-2, rtol=5e-2), max_err

    print("KERNEL_OK")
</pallas_src>

<mosaic_0001>
module attributes {stable_mosaic.version = 11 : i64} {
  func.func @block_kernel(%arg0: i32, %arg1: memref<1x16x16x128xf32, #tpu.memory_space<vmem>>, %arg2: memref<128x256xbf16, #tpu.memory_space<vmem>>, %arg3: memref<1x256xf32, #tpu.memory_space<vmem>>, %arg4: memref<3x128x384xbf16, #tpu.memory_space<vmem>>, %arg5: memref<1x128xf32, #tpu.memory_space<vmem>>, %arg6: memref<128x128xbf16, #tpu.memory_space<vmem>>, %arg7: memref<1x128xf32, #tpu.memory_space<vmem>>, %arg8: memref<1x16x16x128xf32, #tpu.memory_space<vmem>>) attributes {dimension_semantics = [#tpu.dimension_semantics<parallel>], iteration_bounds = array<i64: 2>, scalar_prefetch = 0 : i64, scratch_operands = 0 : i64, tpu.core_type = #tpu.core_type<tc>, window_params = [{transform_indices = @transform_0, window_bounds = array<i64: 1, 16, 16, 128>}, {pipeline_mode = #tpu.pipeline_mode<synchronous>, transform_indices = @transform_1, window_bounds = array<i64: 128, 256>}, {pipeline_mode = #tpu.pipeline_mode<synchronous>, transform_indices = @transform_2, window_bounds = array<i64: 1, 256>}, {pipeline_mode = #tpu.pipeline_mode<synchronous>, transform_indices = @transform_3, window_bounds = array<i64: 3, 128, 384>}, {pipeline_mode = #tpu.pipeline_mode<synchronous>, transform_indices = @transform_4, window_bounds = array<i64: 1, 128>}, {pipeline_mode = #tpu.pipeline_mode<synchronous>, transform_indices = @transform_5, window_bounds = array<i64: 128, 128>}, {pipeline_mode = #tpu.pipeline_mode<synchronous>, transform_indices = @transform_6, window_bounds = array<i64: 1, 128>}, {transform_indices = @transform_7, window_bounds = array<i64: 1, 16, 16, 128>}]} {
    %c0 = arith.constant 0 : index
    %c0_0 = arith.constant 0 : index
    %c0_1 = arith.constant 0 : index
    %c0_2 = arith.constant 0 : index
    %0 = vector.load %arg1[%c0, %c0_0, %c0_1, %c0_2] : memref<1x16x16x128xf32, #tpu.memory_space<vmem>>, vector<1x16x16x128xf32>
    %1 = vector.shape_cast %0 : vector<1x16x16x128xf32> to vector<256x128xf32>
    %2 = arith.truncf %1 : vector<256x128xf32> to vector<256x128xbf16>
    %c0_3 = arith.constant 0 : index
    %c0_4 = arith.constant 0 : index
    %3 = vector.load %arg2[%c0_3, %c0_4] : memref<128x256xbf16, #tpu.memory_space<vmem>>, vector<128x256xbf16>
    %cst = arith.constant dense<0.000000e+00> : vector<256x256xf32>
    %4 = tpu.matmul %2, %3, %cst {dimension_numbers = #tpu.dot_dimension_numbers<[1], [0], [0], [1], [0, 0, 1, 1], [], []>} : vector<256x128xbf16>, vector<128x256xbf16>, vector<256x256xf32> -> vector<256x256xf32>
    %c0_5 = arith.constant 0 : index
    %c0_6 = arith.constant 0 : index
    %5 = vector.load %arg3[%c0_5, %c0_6] : memref<1x256xf32, #tpu.memory_space<vmem>>, vector<1x256xf32>
    %6 = vector.broadcast %5 : vector<1x256xf32> to vector<256x256xf32>
    %7 = arith.addf %4, %6 : vector<256x256xf32>
    %8 = vector.extract_strided_slice %7 {offsets = [0, 0], sizes = [256, 128], strides = [1, 1]} : vector<256x256xf32> to vector<256x128xf32>
    %9 = vector.extract_strided_slice %7 {offsets = [0, 128], sizes = [256, 128], strides = [1, 1]} : vector<256x256xf32> to vector<256x128xf32>
    %cst_7 = arith.constant 0.000000e+00 : f32
    %10 = vector.broadcast %cst_7 : f32 to vector<256x128xf32>
    %11 = arith.maximumf %9, %10 : vector<256x128xf32>
    %12 = arith.truncf %11 : vector<256x128xf32> to vector<256x128xbf16>
    %13 = tpu.iota {dimensions = array<i32: 1>} : vector<1x16x16x128xi32>
    %14 = vector.shape_cast %13 : vector<1x16x16x128xi32> to vector<256x128xi32>
    %15 = tpu.iota {dimensions = array<i32: 2>} : vector<1x16x16x128xi32>
    %16 = vector.shape_cast %15 : vector<1x16x16x128xi32> to vector<256x128xi32>
    %c1_i32 = arith.constant 1 : i32
    %17 = vector.broadcast %c1_i32 : i32 to vector<256x128xi32>
    %18 = arith.cmpi sge, %14, %17 : vector<256x128xi32>
    %c14_i32 = arith.constant 14 : i32
    %19 = vector.broadcast %c14_i32 : i32 to vector<256x128xi32>
    %20 = arith.cmpi sle, %14, %19 : vector<256x128xi32>
    %c1_i32_8 = arith.constant 1 : i32
    %21 = vector.broadcast %c1_i32_8 : i32 to vector<256x128xi32>
    %22 = arith.cmpi sge, %16, %21 : vector<256x128xi32>
    %c14_i32_9 = arith.constant 14 : i32
    %23 = vector.broadcast %c14_i32_9 : i32 to vector<256x128xi32>
    %24 = arith.cmpi sle, %16, %23 : vector<256x128xi32>
    %cst_10 = arith.constant 0.000000e+00 : f32
    %25 = vector.broadcast %cst_10 : f32 to vector<256x128xf32>
    %c0_11 = arith.constant 0 : index
    %c0_12 = arith.constant 0 : index
    %c0_13 = arith.constant 0 : index
    %26 = vector.load %arg4[%c0_11, %c0_12, %c0_13] : memref<3x128x384xbf16, #tpu.memory_space<vmem>>, vector<1x128x384xbf16>
    %27 = vector.shape_cast %26 : vector<1x128x384xbf16> to vector<128x384xbf16>
    %cst_14 = arith.constant dense<0.000000e+00> : vector<256x384xf32>
    %28 = tpu.matmul %12, %27, %cst_14 {dimension_numbers = #tpu.dot_dimension_numbers<[1], [0], [0], [1], [0, 0, 1, 1], [], []>} : vector<256x128xbf16>, vector<128x384xbf16>, vector<256x384xf32> -> vector<256x384xf32>
    %29 = vector.extract_strided_slice %28 {offsets = [0, 0], sizes = [256, 128], strides = [1, 1]} : vector<256x384xf32> to vector<256x128xf32>
    %c17_i32 = arith.constant 17 : i32
    %30 = tpu.dynamic_rotate %29 by %c17_i32 dim 0 : vector<256x128xf32>, i32 -> vector<256x128xf32>
    %31 = arith.andi %18, %22 : vector<256x128xi1>
    %cst_15 = arith.constant 0.000000e+00 : f32
    %32 = vector.broadcast %cst_15 : f32 to vector<256x128xf32>
    %33 = arith.select %31, %30, %32 : vector<256x128xi1>, vector<256x128xf32>
    %34 = arith.addf %25, %33 : vector<256x128xf32>
    %35 = vector.extract_strided_slice %28 {offsets = [0, 128], sizes = [256, 128], strides = [1, 1]} : vector<256x384xf32> to vector<256x128xf32>
    %c16_i32 = arith.constant 16 : i32
    %36 = tpu.dynamic_rotate %35 by %c16_i32 dim 0 : vector<256x128xf32>, i32 -> vector<256x128xf32>
    %cst_16 = arith.constant 0.000000e+00 : f32
    %37 = vector.broadcast %cst_16 : f32 to vector<256x128xf32>
    %38 = arith.select %18, %36, %37 : vector<256x128xi1>, vector<256x128xf32>
    %39 = arith.addf %34, %38 : vector<256x128xf32>
    %40 = vector.extract_strided_slice %28 {offsets = [0, 256], sizes = [256, 128], strides = [1, 1]} : vector<256x384xf32> to vector<256x128xf32>
    %c15_i32 = arith.constant 15 : i32
    %41 = tpu.dynamic_rotate %40 by %c15_i32 dim 0 : vector<256x128xf32>, i32 -> vector<256x128xf32>
    %42 = arith.andi %18, %24 : vector<256x128xi1>
    %cst_17 = arith.constant 0.000000e+00 : f32
    %43 = vector.broadcast %cst_17 : f32 to vector<256x128xf32>
    %44 = arith.select %42, %41, %43 : vector<256x128xi1>, vector<256x128xf32>
    %45 = arith.addf %39, %44 : vector<256x128xf32>
    %c1 = arith.constant 1 : index
    %c0_18 = arith.constant 0 : index
    %c0_19 = arith.constant 0 : index
    %46 = vector.load %arg4[%c1, %c0_18, %c0_19] : memref<3x128x384xbf16, #tpu.memory_space<vmem>>, vector<1x128x384xbf16>
    %47 = vector.shape_cast %46 : vector<1x128x384xbf16> to vector<128x384xbf16>
    %cst_20 = arith.constant dense<0.000000e+00> : vector<256x384xf32>
    %48 = tpu.matmul %12, %47, %cst_20 {dimension_numbers = #tpu.dot_dimension_numbers<[1], [0], [0], [1], [0, 0, 1, 1], [], []>} : vector<256x128xbf16>, vector<128x384xbf16>, vector<256x384xf32> -> vector<256x384xf32>
    %49 = vector.extract_strided_slice %48 {offsets = [0, 0], sizes = [256, 128], strides = [1, 1]} : vector<256x384xf32> to vector<256x128xf32>
    %c1_i32_21 = arith.constant 1 : i32
    %50 = tpu.dynamic_rotate %49 by %c1_i32_21 dim 0 : vector<256x128xf32>, i32 -> vector<256x128xf32>
    %cst_22 = arith.constant 0.000000e+00 : f32
    %51 = vector.broadcast %cst_22 : f32 to vector<256x128xf32>
    %52 = arith.select %22, %50, %51 : vector<256x128xi1>, vector<256x128xf32>
    %53 = arith.addf %45, %52 : vector<256x128xf32>
    %54 = vector.extract_strided_slice %48 {offsets = [0, 128], sizes = [256, 128], strides = [1, 1]} : vector<256x384xf32> to vector<256x128xf32>
    %55 = arith.addf %53, %54 : vector<256x128xf32>
    %56 = vector.extract_strided_slice %48 {offsets = [0, 256], sizes = [256, 128], strides = [1, 1]} : vector<256x384xf32> to vector<256x128xf32>
    %c255_i32 = arith.constant 255 : i32
    %57 = tpu.dynamic_rotate %56 by %c255_i32 dim 0 : vector<256x128xf32>, i32 -> vector<256x128xf32>
    %cst_23 = arith.constant 0.000000e+00 : f32
    %58 = vector.broadcast %cst_23 : f32 to vector<256x128xf32>
    %59 = arith.select %24, %57, %58 : vector<256x128xi1>, vector<256x128xf32>
    %60 = arith.addf %55, %59 : vector<256x128xf32>
    %c2 = arith.constant 2 : index
    %c0_24 = arith.constant 0 : index
    %c0_25 = arith.constant 0 : index
    %61 = vector.load %arg4[%c2, %c0_24, %c0_25] : memref<3x128x384xbf16, #tpu.memory_space<vmem>>, vector<1x128x384xbf16>
    %62 = vector.shape_cast %61 : vector<1x128x384xbf16> to vector<128x384xbf16>
    %cst_26 = arith.constant dense<0.000000e+00> : vector<256x384xf32>
    %63 = tpu.matmul %12, %62, %cst_26 {dimension_numbers = #tpu.dot_dimension_numbers<[1], [0], [0], [1], [0, 0, 1, 1], [], []>} : vector<256x128xbf16>, vector<128x384xbf16>, vector<256x384xf32> -> vector<256x384xf32>
    %64 = vector.extract_strided_slice %63 {offsets = [0, 0], sizes = [256, 128], strides = [1, 1]} : vector<256x384xf32> to vector<256x128xf32>
    %c241_i32 = arith.constant 241 : i32
    %65 = tpu.dynamic_rotate %64 by %c241_i32 dim 0 : vector<256x128xf32>, i32 -> vector<256x128xf32>
    %66 = arith.andi %20, %22 : vector<256x128xi1>
    %cst_27 = arith.constant 0.000000e+00 : f32
    %67 = vector.broadcast %cst_27 : f32 to vector<256x128xf32>
    %68 = arith.select %66, %65, %67 : vector<256x128xi1>, vector<256x128xf32>
    %69 = arith.addf %60, %68 : vector<256x128xf32>
    %70 = vector.extract_strided_slice %63 {offsets = [0, 128], sizes = [256, 128], strides = [1, 1]} : vector<256x384xf32> to vector<256x128xf32>
    %c240_i32 = arith.constant 240 : i32
    %71 = tpu.dynamic_rotate %70 by %c240_i32 dim 0 : vector<256x128xf32>, i32 -> vector<256x128xf32>
    %cst_28 = arith.constant 0.000000e+00 : f32
    %72 = vector.broadcast %cst_28 : f32 to vector<256x128xf32>
    %73 = arith.select %20, %71, %72 : vector<256x128xi1>, vector<256x128xf32>
    %74 = arith.addf %69, %73 : vector<256x128xf32>
    %75 = vector.extract_strided_slice %63 {offsets = [0, 256], sizes = [256, 128], strides = [1, 1]} : vector<256x384xf32> to vector<256x128xf32>
    %c239_i32 = arith.constant 239 : i32
    %76 = tpu.dynamic_rotate %75 by %c239_i32 dim 0 : vector<256x128xf32>, i32 -> vector<256x128xf32>
    %77 = arith.andi %20, %24 : vector<256x128xi1>
    %cst_29 = arith.constant 0.000000e+00 : f32
    %78 = vector.broadcast %cst_29 : f32 to vector<256x128xf32>
    %79 = arith.select %77, %76, %78 : vector<256x128xi1>, vector<256x128xf32>
    %80 = arith.addf %74, %79 : vector<256x128xf32>
    %c0_30 = arith.constant 0 : index
    %c0_31 = arith.constant 0 : index
    %81 = vector.load %arg5[%c0_30, %c0_31] : memref<1x128xf32, #tpu.memory_space<vmem>>, vector<1x128xf32>
    %82 = vector.broadcast %81 : vector<1x128xf32> to vector<256x128xf32>
    %83 = arith.addf %80, %82 : vector<256x128xf32>
    %cst_32 = arith.constant 0.000000e+00 : f32
    %84 = vector.broadcast %cst_32 : f32 to vector<256x128xf32>
    %85 = arith.maximumf %83, %84 : vector<256x128xf32>
    %86 = arith.truncf %85 : vector<256x128xf32> to vector<256x128xbf16>
    %c0_33 = arith.constant 0 : index
    %c0_34 = arith.constant 0 : index
    %87 = vector.load %arg6[%c0_33, %c0_34] : memref<128x128xbf16, #tpu.memory_space<vmem>>, vector<128x128xbf16>
    %cst_35 = arith.constant dense<0.000000e+00> : vector<256x128xf32>
    %88 = tpu.matmul %86, %87, %cst_35 {dimension_numbers = #tpu.dot_dimension_numbers<[1], [0], [0], [1], [0, 0, 1, 1], [], []>} : vector<256x128xbf16>, vector<128x128xbf16>, vector<256x128xf32> -> vector<256x128xf32>
    %c0_36 = arith.constant 0 : index
    %c0_37 = arith.constant 0 : index
    %89 = vector.load %arg7[%c0_36, %c0_37] : memref<1x128xf32, #tpu.memory_space<vmem>>, vector<1x128xf32>
    %90 = vector.broadcast %89 : vector<1x128xf32> to vector<256x128xf32>
    %91 = arith.addf %88, %90 : vector<256x128xf32>
    %cst_38 = arith.constant 0.000000e+00 : f32
    %92 = vector.broadcast %cst_38 : f32 to vector<256x128xf32>
    %93 = arith.maximumf %91, %92 : vector<256x128xf32>
    %94 = arith.addf %93, %8 : vector<256x128xf32>
    %cst_39 = arith.constant 0.000000e+00 : f32
    %95 = vector.broadcast %cst_39 : f32 to vector<256x128xf32>
    %96 = arith.maximumf %94, %95 : vector<256x128xf32>
    %97 = vector.shape_cast %96 : vector<256x128xf32> to vector<1x16x16x128xf32>
    %c0_40 = arith.constant 0 : index
    %c0_41 = arith.constant 0 : index
    %c0_42 = arith.constant 0 : index
    %c0_43 = arith.constant 0 : index
    %98 = vector.load %arg8[%c0_40, %c0_41, %c0_42, %c0_43] : memref<1x16x16x128xf32, #tpu.memory_space<vmem>>, vector<1x16x16x128xf32>
    tpu.vector_store %arg8[%c0_40, %c0_41, %c0_42, %c0_43], %97 {strides = array<i32>} : memref<1x16x16x128xf32, #tpu.memory_space<vmem>>, vector<1x16x16x128xf32>,
    return
  }
  func.func @transform_0(%arg0: i32) -> (i32, i32, i32, i32) {
    %c0_i32 = arith.constant 0 : i32
    %c0_i32_0 = arith.constant 0 : i32
    %c0_i32_1 = arith.constant 0 : i32
    %c0_i32_2 = arith.constant 0 : i32
    return %arg0, %c0_i32, %c0_i32_0, %c0_i32_1 : i32, i32, i32, i32
  }
  func.func @transform_1(%arg0: i32) -> (i32, i32) {
    %c0_i32 = arith.constant 0 : i32
    %c0_i32_0 = arith.constant 0 : i32
    %c0_i32_1 = arith.constant 0 : i32
    return %c0_i32, %c0_i32_0 : i32, i32
  }
  func.func @transform_2(%arg0: i32) -> (i32, i32) {
    %c0_i32 = arith.constant 0 : i32
    %c0_i32_0 = arith.constant 0 : i32
    %c0_i32_1 = arith.constant 0 : i32
    return %c0_i32, %c0_i32_0 : i32, i32
  }
  func.func @transform_3(%arg0: i32) -> (i32, i32, i32) {
    %c0_i32 = arith.constant 0 : i32
    %c0_i32_0 = arith.constant 0 : i32
    %c0_i32_1 = arith.constant 0 : i32
    %c0_i32_2 = arith.constant 0 : i32
    return %c0_i32, %c0_i32_0, %c0_i32_1 : i32, i32, i32
  }
  func.func @transform_4(%arg0: i32) -> (i32, i32) {
    %c0_i32 = arith.constant 0 : i32
    %c0_i32_0 = arith.constant 0 : i32
    %c0_i32_1 = arith.constant 0 : i32
    return %c0_i32, %c0_i32_0 : i32, i32
  }
  func.func @transform_5(%arg0: i32) -> (i32, i32) {
    %c0_i32 = arith.constant 0 : i32
    %c0_i32_0 = arith.constant 0 : i32
    %c0_i32_1 = arith.constant 0 : i32
    return %c0_i32, %c0_i32_0 : i32, i32
  }
  func.func @transform_6(%arg0: i32) -> (i32, i32) {
    %c0_i32 = arith.constant 0 : i32
    %c0_i32_0 = arith.constant 0 : i32
    %c0_i32_1 = arith.constant 0 : i32
    return %c0_i32, %c0_i32_0 : i32, i32
  }
  func.func @transform_7(%arg0: i32) -> (i32, i32, i32, i32) {
    %c0_i32 = arith.constant 0 : i32
    %c0_i32_0 = arith.constant 0 : i32
    %c0_i32_1 = arith.constant 0 : i32
    %c0_i32_2 = arith.constant 0 : i32
    return %arg0, %c0_i32, %c0_i32_0, %c0_i32_1 : i32, i32, i32, i32
  }
}

</mosaic_0001>

<bundles_post_ra>
// kernel: tpu_custom_call.1
= control target key start
LH: loop header
LB: loop body
LE: loop exit
PB: predicated region body
PF: predicated region fallthrough
CT: control target
= control target key end

     0   :  { %s6270_s0 = inlined_call_operand.hbm [shape: f32[2,16,16,128], index: 0, kind: input, shape index: {}]   ;;  %s6271_s1 = inlined_call_operand.hbm [shape: bf16[128,256], index: 1, kind: input, shape index: {}]   ;;  %s6272_s2 = inlined_call_operand.vmem [shape: f32[1,256], index: 2, kind: input, shape index: {}]   ;;  %s6273_s3 = inlined_call_operand.hbm [shape: bf16[3,128,384], index: 3, kind: input, shape index: {}]   ;;  %s6274_s4 = inlined_call_operand.vmem [shape: f32[1,128], index: 4, kind: input, shape index: {}]   ;;  %s6275_s5 = inlined_call_operand.hbm [shape: bf16[128,128], index: 5, kind: input, shape index: {}]   ;;  %s6276_s6 = inlined_call_operand.vmem [shape: f32[1,128], index: 6, kind: input, shape index: {}]   ;;  %s6277_s7 = inlined_call_operand.hbm [shape: f32[2,16,16,128], index: 7, kind: output, shape index: {}]  }
   0x1   :  { %6291 = sst [smem:[#allocation56_spill]] %s6271_s1 }
   0x2   :  { %12 = vsyncpa [#allocation3], 0 }
   0x3   :  { %14 = vsyncpa [#allocation3 + $0x1], 0 }
   0x4   :  { %15 = vsyncpa [#allocation6], 0 }
   0x5   :  { %16 = vsyncpa [#allocation9], 0 }
   0x6   :  { %17 = vsyncpa [#allocation4], 0 }
   0x7   :  { %19 = vsyncpa [#allocation4 + $0x1], 0  ;;  %s4551_s24 = smov 0   ;;  %s4553_s25 = smov 0  }
   0x8   :  { %s4555_s26 = smov 0   ;;  %s4557_s27 = smov 0  }
   0x9 LB: > { %s4572_s28 = sadd.s32 4294967295, %s4495_s27   ;;  %s3685_s29 = sadd.s32 4294967294, %s4495_s27   ;;  %s4495_s27 = sphi %s4557_s27, %s6400_s27   ;;  %s4491_s26 = sphi %s4555_s26, %s6399_s26   ;;  %s4487_s25 = sphi %s4553_s25, %s6398_s25   ;;  %s4483_s24 = sphi %s4551_s24, %s6397_s24  }
   0xa   : > { %p45_p0 = scmp.ne.s32.totalorder %s4487_s25, %s4483_s24  ;;  %p6278_p1 = scmp.eq.s32.totalorder %s4572_s28, 0 }
   0xb   : > { %p201_p3 = scmp.eq.s32.totalorder %s3685_s29, 1  ;;  %p3686_p5 = scmp.ge.s32.totalorder %s4495_s27, 1 }
   0xc   : > { %p4581_p4 = por %p6278_p1, %p45_p0  ;;  %p208_p7 = scmp.lt.s32.totalorder %s4495_s27, 3 }
   0xd   : > { %p4586_p6 = por %p201_p3, %p45_p0  ;;  %s4497_s10 = smov [#allocation5]  }
   0xe   : > { %s6292_s30 = scalar_select %p4581_p4, 1, 0 }
   0xf   : > { %s6293_s8 = scalar_select %p4586_p6, 1, 0 }
  0x10   : > { %p4591_p8 = pnand %p3686_p5, %p208_p7  ;;  %s220_s11 = sshll.u32 %s4497_s10, 4  ;;  %s4595_s11 = int_to_ptr.vmem [resolvable:$true] %s220_s11 }
  0x11   : > { %s4498_s13 = smov [#allocation7]   ;;  %s6296_s1 = sld [smem:[#allocation56_spill]] }
  0x12   : > { %s6294_s9 = scalar_select %p4591_p8, 1, 0 }
  0x13   : > { %p4109_p9 = pneg %p4591_p8  ;;  %s236_s14 = sshll.u32 %s4498_s13, 4  ;;  %s4606_s14 = int_to_ptr.vmem [resolvable:$true] %s236_s14 }
  0x15   : > { %p4602_p11 = pnand %p4109_p9, %p6278_p1 }
  0x17   : > { %s4307_s17 = scalar_lea.hbm %s6296_s1, 2048  ;;  %p4616_p13 = pneg %p4602_p11 }
  0x18   : > { %p4308_p12 = scmp.ne.s32.totalorder %s6296_s1, %s4307_s17  ;;  %p4314_p5 = scmp.lt.u32.totalorder %s4307_s17, %s6296_s1 }
  0x1a   : > { %p4310_p0 = pnand %p4616_p13, %p4308_p12 }
  0x1c   : > { %p4311_p3 = pneg %p4310_p0 }
  0x1e   : > { %p4316_p7 = pnand %p4314_p5, %p4311_p3 }
  0x20   : > { %4319 = shalt.err (!%p4316_p7)
}
  0x21   : > { %s4320_s23 = scalar_lea.vmem %s4595_s11, 2048  ;;  %p4328_p2 = scmp.lt.s32.totalorder %s4595_s11, %s4595_s11 }
  0x22   : > { %p4321_p9 = scmp.ne.s32.totalorder %s4595_s11, %s4320_s23  ;;  %p4329_p6 = scmp.lt.s32.totalorder %s4320_s23, %s4320_s23 }
  0x24   : > { %p4323_p10 = pnand %p4321_p9, %p4616_p13  ;;  %p4330_p12 = por %p4329_p6, %p4328_p2 }
  0x26   : > { %p4324_p1 = pneg %p4323_p10 }
  0x28   : > { %p4331_p0 = pnand %p4330_p12, %p4324_p1 }
  0x2a   : > { %4334 = shalt.err (!%p4331_p0)
}
  0x2b   : > { %s6279_s29 = smov 128   ;;  %s6280_s10 = smov 8  }
  0x2c   : > { %4112 = dma.hbm_to_vmem [thread:$0]  (!%p4602_p11), %s6296_s1, 2048, %s4595_s11, [#allocation6], %s6279_s29, %s6279_s29, %s6280_s10  }
  0x2d   : > { %s4335_s18 = scalar_lea.hbm %s6273_s3, 9216 }
  0x2e   : > { %p4336_p1 = scmp.ne.s32.totalorder %s6273_s3, %s4335_s18  ;;  %p4342_p10 = scmp.lt.u32.totalorder %s4335_s18, %s6273_s3 }
  0x30   : > { %p4338_p2 = pnand %p4336_p1, %p4616_p13 }
  0x32   : > { %p4339_p6 = pneg %p4338_p2 }
  0x34   : > { %p4344_p3 = pnand %p4342_p10, %p4339_p6 }
  0x36   : > { %4347 = shalt.err (!%p4344_p3)
}
  0x37   : > { %s4348_s11 = scalar_lea.vmem %s4606_s14, 9216  ;;  %p4356_p12 = scmp.lt.s32.totalorder %s4606_s14, %s4606_s14 }
  0x38   : > { %p4349_p5 = scmp.ne.s32.totalorder %s4606_s14, %s4348_s11  ;;  %p4357_p0 = scmp.lt.s32.totalorder %s4348_s11, %s4348_s11 }
  0x3a   : > { %p4351_p7 = pnand %p4349_p5, %p4616_p13  ;;  %p4358_p1 = por %p4357_p0, %p4356_p12 }
  0x3c   : > { %p4352_p9 = pneg %p4351_p7 }
  0x3e   : > { %p4359_p2 = pnand %p4358_p1, %p4352_p9 }
  0x40   : > { %4362 = shalt.err (!%p4359_p2)
}
  0x41   : > { %s4501_s13 = smov 192   ;;  %s4502_s15 = smov 12  }
  0x42   : > { %4115 = dma.hbm_to_vmem [thread:$0]  (!%p4602_p11), %s6273_s3, 9216, %s4606_s14, [#allocation6], %s4501_s13, %s4501_s13, %s4502_s15  }
  0x43   : > { %s4503_s18 = smov [#allocation8]   ;;  %s4363_s23 = scalar_lea.hbm %s6275_s5, 1024 }
  0x44   : > { %s252_s19 = sshll.u32 %s4503_s18, 4  ;;  %p4364_p6 = scmp.ne.s32.totalorder %s6275_s5, %s4363_s23  ;;  %s253_s19 = int_to_ptr.vmem [resolvable:$true] %s252_s19 }
  0x45   : > { %p4370_p5 = scmp.lt.u32.totalorder %s4363_s23, %s6275_s5 }
  0x46   : > { %p4366_p10 = pnand %p4364_p6, %p4616_p13 }
  0x48   : > { %p4367_p3 = pneg %p4366_p10 }
  0x4a   : > { %p4372_p7 = pnand %p4370_p5, %p4367_p3 }
  0x4c   : > { %4375 = shalt.err (!%p4372_p7)
}
  0x4d   : > { %s4376_s14 = scalar_lea.vmem %s253_s19, 1024  ;;  %p4384_p1 = scmp.lt.s32.totalorder %s253_s19, %s253_s19 }
  0x4e   : > { %p4377_p9 = scmp.ne.s32.totalorder %s253_s19, %s4376_s14  ;;  %p4385_p2 = scmp.lt.s32.totalorder %s4376_s14, %s4376_s14 }
  0x50   : > { %p4379_p12 = pnand %p4377_p9, %p4616_p13  ;;  %p4386_p4 = por %p4385_p2, %p4384_p1 }
  0x52   : > { %p4380_p0 = pneg %p4379_p12 }
  0x54   : > { %p4387_p8 = pnand %p4386_p4, %p4380_p0 }
  0x56   : > { %4390 = shalt.err (!%p4387_p8)
}
  0x57   : > { %s4504_s29 = smov 64   ;;  %s4505_s1 = smov 4  }
  0x58   : > { %4118 = dma.hbm_to_vmem [thread:$0]  (!%p4602_p11), %s6275_s5, 1024, %s253_s19, [#allocation9], %s4504_s29, %s4504_s29, %s4505_s1  }
  0x59   : > { %s4682_s13 = sadd.s32 1, %s4495_s27   ;;  %s32_s16 = sadd.s32 1, %s4491_s26 }
  0x5a   : > { %s29_s15 = ssub.s32 %s4495_s27, %s4682_s13  ;;  %p39_p8 = scmp.ne.s32.totalorder %s4491_s26, %s4487_s25 }
  0x5b   : > { %p30_p4 = scmp.eq.s32.totalorder %s29_s15, 0  ;;  %p40_p13 = scmp.eq.s32.totalorder %s4495_s27, 0 }
  0x5c   : > { %p4130_p6 = scmp.lt.s32.totalorder %s4495_s27, 2  ;;  %p6298_p3 = scmp.eq.s32.totalorder %s4572_s28, 1 }
  0x5d   : > { %s4692_s17 = scalar_select %p30_p4, %s4491_s26, %s32_s16  }
  0x5e   : > { %p41_p10 = por %p40_p13, %p39_p8  ;;  %p4696_p5 = por %p6298_p3, %p39_p8 }
  0x5f   : > { %s269_s12 = sand.u32 1, %s4491_s26   ;;  %s3803_s21 = sshll.u32 %s4495_s27, 12 }
  0x60   : > { %s3691_s19 = sshll.u32 %s269_s12, 8  ;;  %s4705_s11 = scalar_lea.hbm %s6270_s0, %s3803_s21 }
  0x61   : > { %s273_s14 = scalar_lea.vmem [#allocation2], %s3691_s19  ;;  %p4707_p11 = pnand %p4130_p6, %p41_p10 }
  0x62   : > { %s280_s29 = sshll.u32 %s273_s14, 4  ;;  %s4713_s20 = scalar_lea.sflag [#allocation3], %s269_s12  ;;  %s4711_s29 = int_to_ptr.vmem [resolvable:$true] %s280_s29 }
  0x63   : > { %s4391_s10 = scalar_lea.hbm %s4705_s11, 4096  ;;  %p4393_p9 = pneg %p4707_p11 }
  0x64   : > { %p4392_p7 = scmp.ne.s32.totalorder %s4705_s11, %s4391_s10  ;;  %s4396_s21 = scalar_lea.hbm %s6270_s0, 8192 }
  0x65   : > { %p4397_p1 = scmp.lt.u32.totalorder %s4705_s11, %s6270_s0  ;;  %p4398_p2 = scmp.lt.u32.totalorder %s4396_s21, %s4391_s10 }
  0x66   : > { %p4394_p12 = pnand %p4393_p9, %p4392_p7  ;;  %p4400_p8 = scmp.lt.u32.totalorder %s4391_s10, %s4705_s11 }
  0x67   : > { %p4399_p4 = por %p4398_p2, %p4397_p1 }
  0x68   : > { %p4395_p0 = pneg %p4394_p12 }
  0x69   : > { %p4401_p13 = por %p4400_p8, %p4399_p4 }
  0x6b   : > { %p4402_p6 = pnand %p4401_p13, %p4395_p0 }
  0x6d   : > { %4405 = shalt.err (!%p4402_p6)
}
  0x6e   : > { %s4406_s12 = scalar_lea.vmem %s4711_s29, 4096  ;;  %s4506_s23 = smov [#allocation2]  }
  0x6f   : > { %p4407_p10 = scmp.ne.s32.totalorder %s4711_s29, %s4406_s12  ;;  %s4411_s14 = sshll.u32 %s4506_s23, 4  ;;  %s4412_s14 = int_to_ptr.vmem [resolvable:$false] %s4411_s14 }
  0x70   : > { %s4413_s15 = scalar_lea.vmem %s4412_s14, 8192  ;;  %p4414_p12 = scmp.lt.s32.totalorder %s4711_s29, %s4412_s14 }
  0x71   : > { %p4409_p3 = pnand %p4407_p10, %p4393_p9  ;;  %p4415_p1 = scmp.lt.s32.totalorder %s4413_s15, %s4406_s12 }
  0x73   : > { %p4410_p7 = pneg %p4409_p3  ;;  %p4416_p2 = por %p4415_p1, %p4414_p12 }
  0x75   : > { %p4417_p4 = pnand %p4416_p2, %p4410_p7 }
  0x77   : > { %4420 = shalt.err (!%p4417_p4)
}
  0x78   : > { %s6301_s10 = smov 8   ;;  %s6302_s16 = smov 128  }
  0x79   : > { %4122 = dma.hbm_to_vmem [thread:$0]  (!%p4707_p11), %s4705_s11, 4096, %s4711_s29, %s4713_s20, %s6302_s16, %s6302_s16, %s6301_s10  }
  0x7a   : > { %p6303_p9 = scmp.ne.s32.totalorder %s6294_s9, 0 }
  0x7c   : > { %292 = sbr.rel (%p6303_p9) target bundleno = 1189 (0x4a5), region = 48 }
  0x83   : > { %s4747_s21 = sand.u32 1, %s4487_s25   ;;  %p6304_p0 = scmp.ne.s32.totalorder %s6292_s30, 0 }
  0x84   : > { %s3695_s19 = sshll.u32 %s4747_s21, 8  ;;  %s295_s22 = scalar_lea.sflag [#allocation3], %s4747_s21 }
  0x85   : > { %s4753_s1 = scalar_lea.vmem [#allocation2], %s3695_s19 }
  0x86   : > { %4466 = dma.done.wait (%p6304_p0), %s295_s22, 4096  }
  0x87   : > { %4468 = vsyncadd (%p6304_p0), %s295_s22, 4294963200  ;;  %p6305_p11 = scmp.eq.s32.totalorder %s4572_s28, 0 }
  0x89   : > { %4470 = dma.done.wait (%p6305_p11), [#allocation6], 11264   ;;  %p6306_p8 = pmov %p6305_p11 }
  0x8b   : > { %4472 = vsyncadd (%p6306_p8), [#allocation6], 4294956032  ;;  %p6307_p13 = pmov %p6306_p8 }
  0x8c   : > { %p6308_p6 = pmov %p6306_p8 }
  0x8d   : > { %4474 = dma.done.wait (%p6307_p13), [#allocation9], 1024  }
  0x8e   : > { %4476 = vsyncadd (%p6308_p6), [#allocation9], 4294966272  ;;  %v6284_v0 = vmov 0   ;;  %v4179_v1 = vld [vmem:[#allocation5 + $0x4] ss:$8 sps:$4 sm:$0xff]   ;;  %v344_v27 = vld [vmem:[%s4753_s1 + $0x10] sm:$0xff] }
  0x8f   : > { %530 = vmatprep.mubr.bf16.mxu0 %v6284_v0  ;;  %938 = vmatprep.mubr.bf16.mxu1 %v6284_v0  ;;  %v4181_v2 = vld [vmem:[#allocation5] ss:$8 sps:$4 sm:$0xff]   ;;  %v4182_v3 = vld [vmem:[#allocation5 + $0x14] ss:$8 sps:$4 sm:$0xff]   ;;  %v4184_v4 = vld [vmem:[#allocation5 + $0x10] ss:$8 sps:$4 sm:$0xff]  }
  0x90   : > { %498 = vmatprep.subr.bf16.mxu0 %v4179_v1  ;;  %v4185_v5 = vld [vmem:[#allocation5 + $0x24] ss:$8 sps:$4 sm:$0xff]   ;;  %v4187_v6 = vld [vmem:[#allocation5 + $0x20] ss:$8 sps:$4 sm:$0xff]   ;;  %v4188_v7 = vld [vmem:[#allocation5 + $0x34] ss:$8 sps:$4 sm:$0xff]  }
  0x91   : > { %499 = vmatpush1.bf16.msra.mxu0 %v4181_v2  ;;  %v4190_v8 = vld [vmem:[#allocation5 + $0x30] ss:$8 sps:$4 sm:$0xff]   ;;  %v4191_v9 = vld [vmem:[#allocation5 + $0x44] ss:$8 sps:$4 sm:$0xff]   ;;  %v4193_v10 = vld [vmem:[#allocation5 + $0x40] ss:$8 sps:$4 sm:$0xff]  }
  0x92   : > { %500 = vmatprep.subr.bf16.mxu0 %v4182_v3  ;;  %v4194_v11 = vld [vmem:[#allocation5 + $0x54] ss:$8 sps:$4 sm:$0xff]   ;;  %v4196_v12 = vld [vmem:[#allocation5 + $0x50] ss:$8 sps:$4 sm:$0xff]   ;;  %v4197_v13 = vld [vmem:[#allocation5 + $0x64] ss:$8 sps:$4 sm:$0xff]  }
  0x93   : > { %v4199_v14 = vld [vmem:[#allocation5 + $0x60] ss:$8 sps:$4 sm:$0xff]   ;;  %v4200_v15 = vld [vmem:[#allocation5 + $0x74] ss:$8 sps:$4 sm:$0xff]   ;;  %v4202_v16 = vld [vmem:[#allocation5 + $0x70] ss:$8 sps:$4 sm:$0xff]  }
  0x94   : > { %v342_v17 = vld [vmem:[%s4753_s1] sm:$0xff]  ;;  %v343_v19 = vld [vmem:[%s4753_s1 + $0x8] sm:$0xff]  ;;  %v345_v28 = vld [vmem:[%s4753_s1 + $0x18] sm:$0xff]  ;;  %s6103_s23 = scalar_lea.vmem [#allocation10], %s3695_s19  ;;  %s3804_s14 = sshll.u32 %s4572_s28, 12 }
  0x95   : > { %501 = vmatpush1.bf16.msra.mxu0 %v4184_v4  ;;  %v4205_v18 = vld [vmem:[#allocation7 + $0x4] ss:$12 sps:$4 sm:$0xff]   ;;  %v4207_v20 = vld [vmem:[#allocation7] ss:$12 sps:$4 sm:$0xff]   ;;  %v4208_v21 = vld [vmem:[#allocation7 + $0x1c] ss:$12 sps:$4 sm:$0xff]   ;;  %v374_v24 = vpack.c.bf16 %v343_v19, %v342_v17  ;;  %v375_v34 = vpack.c.bf16 %v345_v28, %v344_v27  ;;  %v408_v28 = vlaneseq  ;;  %s6221_s19 = scalar_lea.hbm %s6277_s7, %s3804_s14 }
  0x96   : > { %502 = vmatprep.subr.bf16.mxu0 %v4185_v5  ;;  %v4203_v22 = vld [vmem:[#allocation7 + $0x8] ss:$12 sps:$4 sm:$0xff]   ;;  %906 = vmatprep.subr.bf16.mxu1 %v4205_v18  ;;  %v4210_v23 = vld [vmem:[#allocation7 + $0x18] ss:$12 sps:$4 sm:$0xff]   ;;  %v4204_v26 = vld [vmem:[#allocation7 + $0x20] ss:$12 sps:$4 sm:$0xff]  }
  0x97   : > { %907 = vmatpush1.bf16.msra.mxu1 %v4207_v20  ;;  %v4212_v25 = vld [vmem:[#allocation7 + $0x34] ss:$12 sps:$4 sm:$0xff]   ;;  %v4214_v29 = vld [vmem:[#allocation7 + $0x30] ss:$12 sps:$4 sm:$0xff]   ;;  %v4215_v30 = vld [vmem:[#allocation7 + $0x4c] ss:$12 sps:$4 sm:$0xff]  }
  0x98   : > { %908 = vmatprep.subr.bf16.mxu1 %v4208_v21  ;;  %v4211_v31 = vld [vmem:[#allocation7 + $0x38] ss:$12 sps:$4 sm:$0xff]   ;;  %v4217_v32 = vld [vmem:[#allocation7 + $0x48] ss:$12 sps:$4 sm:$0xff]   ;;  %v4224_v35 = vld [vmem:[#allocation7 + $0x50] ss:$12 sps:$4 sm:$0xff]  }
  0x99   : > { %503 = vmatpush1.bf16.msra.mxu0 %v4187_v6  ;;  %v4218_v33 = vld [vmem:[#allocation7 + $0x64] ss:$12 sps:$4 sm:$0xff]   ;;  %v4220_v36 = vld [vmem:[#allocation7 + $0x60] ss:$12 sps:$4 sm:$0xff]   ;;  %v4221_v37 = vld [vmem:[#allocation7 + $0x7c] ss:$12 sps:$4 sm:$0xff]  }
  0x9a   : > { %504 = vmatprep.subr.bf16.mxu0 %v4188_v7  ;;  %v346_v38 = vld [vmem:[%s4753_s1 + $0x20] sm:$0xff]  ;;  %v347_v39 = vld [vmem:[%s4753_s1 + $0x28] sm:$0xff]  ;;  %v348_v42 = vld [vmem:[%s4753_s1 + $0x30] sm:$0xff]  ;;  %s3583_s15 = sshll.u32 %s6103_s23, 4  ;;  %s3570_s28 = scalar_lea.sflag [#allocation4], %s4747_s21  ;;  %s6223_s15 = int_to_ptr.vmem [resolvable:$true] %s3583_s15 }
  0x9b   : > { %909 = vmatpush1.bf16.msra.mxu1 %v4210_v23  ;;  %v4223_v40 = vld [vmem:[#allocation7 + $0x78] ss:$12 sps:$4 sm:$0xff]   ;;  %v376_v41 = vpack.c.bf16 %v347_v39, %v346_v38  ;;  %v351_v46 = vld [vmem:[%s4753_s1 + $0x48] sm:$0xff]  ;;  %v352_v48 = vld [vmem:[%s4753_s1 + $0x50] sm:$0xff]  ;;  %s4421_s22 = scalar_lea.vmem %s6223_s15, 4096 }
  0x9c   : > { %910 = vmatprep.subr.bf16.mxu1 %v4212_v25  ;;  %v349_v43 = vld [vmem:[%s4753_s1 + $0x38] sm:$0xff]  ;;  %v350_v45 = vld [vmem:[%s4753_s1 + $0x40] sm:$0xff]  ;;  %v355_v52 = vld [vmem:[%s4753_s1 + $0x68] sm:$0xff]  ;;  %p4422_p10 = scmp.ne.s32.totalorder %s6223_s15, %s4421_s22 }
  0x9d   : > { %505 = vmatpush1.bf16.msra.mxu0 %v4190_v8  ;;  %v377_v44 = vpack.c.bf16 %v349_v43, %v348_v42  ;;  %v378_v47 = vpack.c.bf16 %v351_v46, %v350_v45  ;;  %v353_v49 = vld [vmem:[%s4753_s1 + $0x58] sm:$0xff]  ;;  %v354_v51 = vld [vmem:[%s4753_s1 + $0x60] sm:$0xff]  ;;  %v356_v54 = vld [vmem:[%s4753_s1 + $0x70] sm:$0xff] }
  0x9e   : > { %506 = vmatprep.subr.bf16.mxu0 %v4191_v9  ;;  %v379_v50 = vpack.c.bf16 %v353_v49, %v352_v48  ;;  %v380_v53 = vpack.c.bf16 %v355_v52, %v354_v51  ;;  %v357_v55 = vld [vmem:[%s4753_s1 + $0x78] sm:$0xff]  ;;  %v358_v57 = vld [vmem:[%s4753_s1 + $0x80] sm:$0xff]  ;;  %v359_v58 = vld [vmem:[%s4753_s1 + $0x88] sm:$0xff]  ;;  %p4423_p3 = pnand %p4422_p10, %p4696_p5 }
  0x9f   : > { %911 = vmatpush1.bf16.msra.mxu1 %v4214_v29  ;;  %v381_v56 = vpack.c.bf16 %v357_v55, %v356_v54  ;;  %v382_v59 = vpack.c.bf16 %v359_v58, %v358_v57  ;;  %v360_v60 = vld [vmem:[%s4753_s1 + $0x90] sm:$0xff]  ;;  %v361_v61 = vld [vmem:[%s4753_s1 + $0x98] sm:$0xff]  ;;  %v362_v63 = vld [vmem:[%s4753_s1 + $0xa0] sm:$0xff]  ;;  %v4816_v29 = vshrl.u32 %v408_v28, 7 }
  0xa0   : > { %912 = vmatprep.subr.bf16.mxu1 %v4215_v30  ;;  %v383_v62 = vpack.c.bf16 %v361_v61, %v360_v60  ;;  %v363_v1 = vld [vmem:[%s4753_s1 + $0xa8] sm:$0xff]  ;;  %v364_v3 = vld [vmem:[%s4753_s1 + $0xb0] sm:$0xff]  ;;  %v365_v4 = vld [vmem:[%s4753_s1 + $0xb8] sm:$0xff]  ;;  %p4424_p7 = pneg %p4423_p3 }
  0xa1   : > { %507 = vmatpush1.bf16.msra.mxu0 %v4193_v10  ;;  %v384_v2 = vpack.c.bf16 %v363_v1, %v362_v63  ;;  %v4225_v5 = vld [vmem:[#allocation7 + $0x94] ss:$12 sps:$4 sm:$0xff]   ;;  %v385_v7 = vpack.c.bf16 %v365_v4, %v364_v3  ;;  %v4227_v8 = vld [vmem:[#allocation7 + $0x90] ss:$12 sps:$4 sm:$0xff]   ;;  %v4229_v9 = vld [vmem:[#allocation7 + $0xac] ss:$12 sps:$4 sm:$0xff]  }
  0xa2   : > { %508 = vmatprep.subr.bf16.mxu0 %v4194_v11  ;;  %v4228_v6 = vld [vmem:[#allocation7 + $0x68] ss:$12 sps:$4 sm:$0xff]   ;;  %v4232_v10 = vld [vmem:[#allocation7 + $0x80] ss:$12 sps:$4 sm:$0xff]   ;;  %v4237_v17 = vld [vmem:[#allocation7 + $0xb0] ss:$12 sps:$4 sm:$0xff]  }
  0xa3   : > { %913 = vmatpush1.bf16.msra.mxu1 %v4217_v32  ;;  %v4231_v11 = vld [vmem:[#allocation7 + $0xa8] ss:$12 sps:$4 sm:$0xff]   ;;  %v369_v19 = vld [vmem:[%s4753_s1 + $0xd8] sm:$0xff]  ;;  %v370_v21 = vld [vmem:[%s4753_s1 + $0xe0] sm:$0xff]  ;;  %v414_v30 = vsub.s32 1, %v4816_v29  ;;  %vm1287_vm0 = vcmp.lt.s32.totalorder %v4816_v29, 1 }
  0xa4   : > { %914 = vmatprep.subr.bf16.mxu1 %v4218_v33  ;;  %v368_v18 = vld [vmem:[%s4753_s1 + $0xd0] sm:$0xff]  ;;  %v373_v25 = vld [vmem:[%s4753_s1 + $0xf8] sm:$0xff]  ;;  %vm742_vm1 = vcmp.ge.s32.totalorder %v4816_v29, 1  ;;  %vm1439_vm2 = vcmp.lt.s32.totalorder %v4816_v29, 7 }
  0xa5   : > { %509 = vmatpush1.bf16.msra.mxu0 %v4196_v12  ;;  %v366_v12 = vld [vmem:[%s4753_s1 + $0xc0] sm:$0xff]  ;;  %v387_v20 = vpack.c.bf16 %v369_v19, %v368_v18  ;;  %v4250_v27 = vld [vmem:[#allocation7 + $0xc8] ss:$12 sps:$4 sm:$0xff]   ;;  %v4241_v54 = vld [vmem:[#allocation7 + $0xf0] ss:$12 sps:$4 sm:$0xff]  }
  0xa6   : > { %510 = vmatprep.subr.bf16.mxu0 %v4197_v13  ;;  %v367_v13 = vld [vmem:[%s4753_s1 + $0xc8] sm:$0xff]  ;;  %v4238_v49 = vld [vmem:[#allocation7 + $0xd8] ss:$12 sps:$4 sm:$0xff]   ;;  %v4243_v51 = vld [vmem:[#allocation7 + $0xf4] ss:$12 sps:$4 sm:$0xff]  }
  0xa7   : > { %915 = vmatpush1.bf16.msra.mxu1 %v4220_v36  ;;  %v4246_v57 = vld [vmem:[#allocation7 + $0x10c] ss:$12 sps:$4 sm:$0xff]   ;;  %v4244_v63 = vld [vmem:[#allocation7 + $0x108] ss:$12 sps:$4 sm:$0xff]  }
  0xa8   : > { %916 = vmatprep.subr.bf16.mxu1 %v4221_v37  ;;  %v4255_v3 = vld [vmem:[#allocation7 + $0xf8] ss:$12 sps:$4 sm:$0xff]   ;;  %v4260_v18 = vld [vmem:[#allocation7 + $0x128] ss:$12 sps:$4 sm:$0xff]  }
  0xa9   : > { %511 = vmatpush1.bf16.msra.mxu0 %v4199_v14  ;;  %v4236_v14 = vld [vmem:[#allocation7 + $0x98] ss:$12 sps:$4 sm:$0xff]  }
  0xaa   : > { %512 = vmatprep.subr.bf16.mxu0 %v4200_v15  ;;  %v386_v15 = vpack.c.bf16 %v367_v13, %v366_v12 }
  0xab   : > { %917 = vmatpush1.bf16.msra.mxu1 %v4223_v40 }
  0xac   : > { %918 = vmatprep.subr.bf16.mxu1 %v4225_v5 }
  0xad   : > { %513 = vmatpush1.bf16.msra.mxu0 %v4202_v16  ;;  %v4235_v16 = vld [vmem:[#allocation7 + $0xc4] ss:$12 sps:$4 sm:$0xff]  }
  0xae   : > { %3901 = vmatprep.subr.bf16.mxu0 %v4203_v22 }
  0xaf   : > { %919 = vmatpush1.bf16.msra.mxu1 %v4227_v8 }
  0xb0   : > { %531 = vmatmul.mubr.bf16.vlgmr.msra.gmra.mrb[0].mxu0 %v374_v24  ;;  %920 = vmatprep.subr.bf16.mxu1 %v4229_v9  ;;  %v372_v24 = vld [vmem:[%s4753_s1 + $0xf0] sm:$0xff]  ;;  %v4254_v9 = vld [vmem:[#allocation7 + $0x13c] ss:$12 sps:$4 sm:$0xff]  }
  0xb1   : > { %540 = vmatprep.mubr.bf16.mxu0 %v6284_v0  ;;  %3902 = vmatpush3.bf16.msra.mxu0 %v4203_v22  ;;  %v371_v22 = vld [vmem:[%s4753_s1 + $0xe8] sm:$0xff]  ;;  %s4508_s1 = smov [#allocation10]  }
  0xb2   : > { %3903 = vmatprep.subr.bf16.mxu0 %v4204_v26  ;;  %v388_v23 = vpack.c.bf16 %v371_v22, %v370_v21  ;;  %v4257_v21 = vld [vmem:[#allocation7 + $0x150] ss:$12 sps:$4 sm:$0xff]   ;;  %s4425_s30 = sshll.u32 %s4508_s1, 4  ;;  %s4426_s30 = int_to_ptr.vmem [resolvable:$false] %s4425_s30 }
  0xb3   : > { %921 = vmatpush1.bf16.msra.mxu1 %v4231_v11  ;;  %v4256_v11 = vld [vmem:[#allocation7 + $0x110] ss:$12 sps:$4 sm:$0xff]   ;;  %s4427_s9 = scalar_lea.vmem %s4426_s30, 8192  ;;  %p4428_p12 = scmp.lt.s32.totalorder %s6223_s15, %s4426_s30 }
  0xb4   : > { %1691 = vmatprep.subr.bf16.mxu1 %v4235_v16  ;;  %p4429_p1 = scmp.lt.s32.totalorder %s4427_s9, %s4421_s22 }
  0xb5   : > { %3904 = vmatpush3.bf16.msra.mxu0 %v4204_v26  ;;  %v389_v26 = vpack.c.bf16 %v373_v25, %v372_v24  ;;  %v4264_v24 = vld [vmem:[#allocation7 + $0x16c] ss:$12 sps:$4 sm:$0xff]  }
  0xb6   : > { %3905 = vmatprep.subr.bf16.mxu0 %v4211_v31  ;;  %p4430_p2 = por %p4429_p1, %p4428_p12 }
  0xb8   : > { %541 = vmatmul.mubr.bf16.gmra.mrb[4].mxu0 %v375_v34  ;;  %p4431_p4 = pnand %p4430_p2, %p4424_p7 }
  0xb9   : > { %550 = vmatprep.mubr.bf16.mxu0 %v6284_v0  ;;  %3906 = vmatpush3.bf16.msra.mxu0 %v4211_v31  ;;  %v4822_v31 = vld [vmem:[%s6272_s2] sm:$0x3] }
  0xba   : > { %3907 = vmatprep.subr.bf16.mxu0 %v4224_v35  ;;  %v4825_v32 = vrot.slane %v4822_v31, %v414_v30 }
  0xbd   : > { %3908 = vmatpush3.bf16.msra.mxu0 %v4224_v35 }
  0xbe   : > { %3909 = vmatprep.subr.bf16.mxu0 %v4228_v6 }
  0xc0   : > { %551 = vmatmul.mubr.bf16.gmra.mrb[8].mxu0 %v376_v41  ;;  %v4233_v41 = vld [vmem:[#allocation7 + $0xc0] ss:$12 sps:$4 sm:$0xff]  }
  0xc1   : > { %560 = vmatprep.mubr.bf16.mxu0 %v6284_v0  ;;  %3910 = vmatpush3.bf16.msra.mxu0 %v4228_v6  ;;  %v4247_v6 = vld [vmem:[#allocation7 + $0x120] ss:$12 sps:$4 sm:$0xff]  }
  0xc2   : > { %3911 = vmatprep.subr.bf16.mxu0 %v4232_v10 }
  0xc5   : > { %3912 = vmatpush3.bf16.msra.mxu0 %v4232_v10 }
  0xc6   : > { %3913 = vmatprep.subr.bf16.mxu0 %v4236_v14 }
  0xc8   : > { %561 = vmatmul.mubr.bf16.gmra.mrb[12].mxu0 %v377_v44  ;;  %v4240_v44 = vld [vmem:[#allocation7 + $0xdc] ss:$12 sps:$4 sm:$0xff]  }
  0xc9   : > { %570 = vmatprep.mubr.bf16.mxu0 %v6284_v0  ;;  %3914 = vmatpush3.bf16.msra.mxu0 %v4236_v14 }
  0xca   : > { %3915 = vmatprep.subr.bf16.mxu0 %v4237_v17 }
  0xcd   : > { %3916 = vmatpush3.bf16.msra.mxu0 %v4237_v17  ;;  %v4259_v17 = vld [vmem:[#allocation7 + $0x154] ss:$12 sps:$4 sm:$0xff]  }
  0xce   : > { %3949 = vmatprep.subr.bf16.mxu0 %v4250_v27 }
  0xd0   : > { %571 = vmatmul.mubr.bf16.gmra.mrb[16].mxu0 %v378_v47 }
  0xd1   : > { %580 = vmatprep.mubr.bf16.mxu0 %v6284_v0 }
  0xd8   : > { %581 = vmatmul.mubr.bf16.gmra.mrb[20].mxu0 %v379_v50 }
  0xd9   : > { %590 = vmatprep.mubr.bf16.mxu0 %v6284_v0 }
  0xe0   : > { %591 = vmatmul.mubr.bf16.gmra.mrb[24].mxu0 %v380_v53 }
  0xe1   : > { %600 = vmatprep.mubr.bf16.mxu0 %v6284_v0 }
  0xe8   : > { %601 = vmatmul.mubr.bf16.gmra.mrb[28].mxu0 %v381_v56 }
  0xe9   : > { %610 = vmatprep.mubr.bf16.mxu0 %v6284_v0 }
  0xf0   : > { %611 = vmatmul.mubr.bf16.gmra.mrb[32].mxu0 %v382_v59  ;;  %v4251_v59 = vld [vmem:[#allocation7 + $0xe0] ss:$12 sps:$4 sm:$0xff]  }
  0xf1   : > { %620 = vmatprep.mubr.bf16.mxu0 %v6284_v0 }
  0xf8   : > { %621 = vmatmul.mubr.bf16.gmra.mrb[36].mxu0 %v383_v62 }
  0xf9   : > { %630 = vmatprep.mubr.bf16.mxu0 %v6284_v0 }
 0x100   : > { %631 = vmatmul.mubr.bf16.gmra.mrb[40].mxu0 %v384_v2  ;;  %v4249_v2 = vld [vmem:[#allocation7 + $0x124] ss:$12 sps:$4 sm:$0xff]  }
 0x101   : > { %640 = vmatprep.mubr.bf16.mxu0 %v6284_v0 }
 0x108   : > { %641 = vmatmul.mubr.bf16.gmra.mrb[44].mxu0 %v385_v7 }
 0x109   : > { %650 = vmatprep.mubr.bf16.mxu0 %v6284_v0 }
 0x110   : > { %651 = vmatmul.mubr.bf16.gmra.mrb[48].mxu0 %v386_v15  ;;  %v4252_v15 = vld [vmem:[#allocation7 + $0x138] ss:$12 sps:$4 sm:$0xff]  }
 0x111   : > { %660 = vmatprep.mubr.bf16.mxu0 %v6284_v0 }
 0x118   : > { %661 = vmatmul.mubr.bf16.gmra.mrb[52].mxu0 %v387_v20 }
 0x119   : > { %670 = vmatprep.mubr.bf16.mxu0 %v6284_v0 }
 0x120   : > { %671 = vmatmul.mubr.bf16.gmra.mrb[56].mxu0 %v388_v23 }
 0x121   : > { %680 = vmatprep.mubr.bf16.mxu0 %v6284_v0 }
 0x128   : > { %681 = vmatmul.mubr.bf16.gmra.mrb[60].mxu0 %v389_v26  ;;  %v4261_v26 = vld [vmem:[#allocation7 + $0x140] ss:$12 sps:$4 sm:$0xff]  }
 0x183   : > { %v4827_v33 = vpop.f32.mrb[0].mxu0 }
 0x184   : > { %6309 = vst [vmem:[#allocation15_spill] sm:$0xff] %v4827_v33  ;;  %v534_v34 = vpop.f32.mrb[1].mxu0 }
 0x185   : > { %v535_v35 = vadd.f32 %v534_v34, %v4825_v32  ;;  %v4830_v36 = vpop.f32.mrb[2].mxu0  ;;  %v4262_v34 = vld [vmem:[#allocation7 + $0x168] ss:$12 sps:$4 sm:$0xff]  }
 0x186   : > { %6310 = vst [vmem:[#allocation16_spill] sm:$0xff] %v4830_v36  ;;  %v538_v37 = vpop.f32.mrb[3].mxu0 }
 0x187   : > { %v539_v38 = vadd.f32 %v538_v37, %v4825_v32  ;;  %v691_v39 = vmax.f32 %v535_v35, 0.0  ;;  %v4877_v37 = vld [vmem:[#allocation7 + $0x188] ss:$12 sps:$4 sm:$0xff]  }
 0x189   : > { %v692_v40 = vmax.f32 %v539_v38, 0.0  ;;  %v4265_v38 = vld [vmem:[#allocation7 + $0x158] ss:$12 sps:$4 sm:$0xff]  }
 0x18b   : > { %v4833_v42 = vpack.c.bf16 %v692_v40, %v691_v39  ;;  %v4835_v43 = vpop.f32.mrb[4].mxu0 }
 0x18c   : > { %6311 = vst [vmem:[#allocation17_spill] sm:$0xff] %v4835_v43  ;;  %v544_v45 = vpop.f32.mrb[5].mxu0 }
 0x18d   : > { %v545_v46 = vadd.f32 %v544_v45, %v4825_v32  ;;  %v4838_v47 = vpop.f32.mrb[6].mxu0  ;;  %939 = vmatmul.mubr.bf16.vlgmr.msra.gmra.mrb[0].mxu1 %v4833_v42  ;;  %3917 = vmatprep.mubr.bf16.mxu0 %v4833_v42 }
 0x18e   : > { %6312 = vst [vmem:[#allocation18_spill] sm:$0xff] %v4838_v47  ;;  %1692 = vmatpush1.bf16.msra.mxu1 %v4233_v41  ;;  %v548_v48 = vpop.f32.mrb[7].mxu0  ;;  %948 = vmatprep.mubr.bf16.mxu1 %v6284_v0 }
 0x18f   : > { %v549_v50 = vadd.f32 %v548_v48, %v4825_v32  ;;  %1693 = vmatprep.subr.bf16.mxu1 %v4240_v44  ;;  %v693_v52 = vmax.f32 %v545_v46, 0.0  ;;  %v4266_v46 = vld [vmem:[#allocation7 + $0x170] ss:$12 sps:$4 sm:$0xff]  }
 0x191   : > { %v694_v53 = vmax.f32 %v549_v50, 0.0 }
 0x192   : > { %1694 = vmatpush1.bf16.msra.mxu1 %v4238_v49 }
 0x193   : > { %v4844_v55 = vpack.c.bf16 %v694_v53, %v693_v52  ;;  %v4846_v56 = vpop.f32.mrb[8].mxu0  ;;  %1695 = vmatprep.subr.bf16.mxu1 %v4243_v51  ;;  %v4270_v52 = vld [vmem:[#allocation7 + $0x184] ss:$12 sps:$4 sm:$0xff]  }
 0x194   : > { %6313 = vst [vmem:[#allocation19_spill] sm:$0xff] %v4846_v56  ;;  %v554_v58 = vpop.f32.mrb[9].mxu0 }
 0x195   : > { %v555_v60 = vadd.f32 %v554_v58, %v4825_v32  ;;  %v4849_v61 = vpop.f32.mrb[10].mxu0  ;;  %949 = vmatmul.mubr.bf16.gmra.mrb[4].mxu1 %v4844_v55  ;;  %3918 = vmatmul.mubr.bf16.vlgmr.msra.gmra.mrb[64].mxu0 %v4844_v55 }
 0x196   : > { %6314 = vst [vmem:[#allocation20_spill] sm:$0xff] %v4849_v61  ;;  %v558_v62 = vpop.f32.mrb[11].mxu0  ;;  %958 = vmatprep.mubr.bf16.mxu1 %v6284_v0  ;;  %1696 = vmatpush1.bf16.msra.mxu1 %v4241_v54 }
 0x197   : > { %v559_v1 = vadd.f32 %v558_v62, %v4825_v32  ;;  %1697 = vmatprep.subr.bf16.mxu1 %v4246_v57  ;;  %3950 = vmatpush3.bf16.msra.mxu0 %v4250_v27  ;;  %v695_v4 = vmax.f32 %v555_v60, 0.0 }
 0x198   : > { %3951 = vmatprep.subr.bf16.mxu0 %v4251_v59 }
 0x199   : > { %v696_v5 = vmax.f32 %v559_v1, 0.0 }
 0x19a   : > { %1698 = vmatpush1.bf16.msra.mxu1 %v4244_v63 }
 0x19b   : > { %v4855_v7 = vpack.c.bf16 %v696_v5, %v695_v4  ;;  %v4857_v8 = vpop.f32.mrb[12].mxu0  ;;  %1699 = vmatprep.subr.bf16.mxu1 %v4249_v2  ;;  %3952 = vmatpush3.bf16.msra.mxu0 %v4251_v59 }
 0x19c   : > { %6315 = vst [vmem:[#allocation21_spill] sm:$0xff] %v4857_v8  ;;  %v564_v10 = vpop.f32.mrb[13].mxu0  ;;  %3953 = vmatprep.subr.bf16.mxu0 %v4255_v3 }
 0x19d   : > { %v565_v12 = vadd.f32 %v564_v10, %v4825_v32  ;;  %v4860_v13 = vpop.f32.mrb[14].mxu0  ;;  %959 = vmatmul.mubr.bf16.gmra.mrb[8].mxu1 %v4855_v7  ;;  %3921 = vmatprep.mubr.bf16.mxu0 %v4855_v7 }
 0x19e   : > { %6316 = vst [vmem:[#allocation22_spill] sm:$0xff] %v4860_v13  ;;  %v568_v14 = vpop.f32.mrb[15].mxu0  ;;  %968 = vmatprep.mubr.bf16.mxu1 %v6284_v0  ;;  %1700 = vmatpush1.bf16.msra.mxu1 %v4247_v6 }
 0x19f   : > { %v569_v16 = vadd.f32 %v568_v14, %v4825_v32  ;;  %1701 = vmatprep.subr.bf16.mxu1 %v4254_v9  ;;  %3954 = vmatpush3.bf16.msra.mxu0 %v4255_v3  ;;  %v697_v19 = vmax.f32 %v565_v12, 0.0 }
 0x1a0   : > { %3955 = vmatprep.subr.bf16.mxu0 %v4256_v11 }
 0x1a1   : > { %v698_v20 = vmax.f32 %v569_v16, 0.0 }
 0x1a2   : > { %1702 = vmatpush1.bf16.msra.mxu1 %v4252_v15 }
 0x1a3   : > { %v4866_v22 = vpack.c.bf16 %v698_v20, %v697_v19  ;;  %v4868_v23 = vpop.f32.mrb[16].mxu0  ;;  %3956 = vmatpush3.bf16.msra.mxu0 %v4256_v11  ;;  %1703 = vmatprep.subr.bf16.mxu1 %v4259_v17 }
 0x1a4   : > { %6317 = vst [vmem:[#allocation23_spill] sm:$0xff] %v4868_v23  ;;  %v574_v25 = vpop.f32.mrb[17].mxu0  ;;  %3957 = vmatprep.subr.bf16.mxu0 %v4260_v18 }
 0x1a5   : > { %v575_v27 = vadd.f32 %v574_v25, %v4825_v32  ;;  %v4871_v28 = vpop.f32.mrb[18].mxu0  ;;  %969 = vmatmul.mubr.bf16.gmra.mrb[12].mxu1 %v4866_v22  ;;  %3922 = vmatmul.mubr.bf16.gmra.mrb[68].mxu0 %v4866_v22 }
 0x1a6   : > { %6318 = vst [vmem:[#allocation24_spill] sm:$0xff] %v4871_v28  ;;  %v578_v30 = vpop.f32.mrb[19].mxu0  ;;  %978 = vmatprep.mubr.bf16.mxu1 %v6284_v0  ;;  %1704 = vmatpush1.bf16.msra.mxu1 %v4257_v21 }
 0x1a7   : > { %v579_v35 = vadd.f32 %v578_v30, %v4825_v32  ;;  %3958 = vmatpush3.bf16.msra.mxu0 %v4260_v18  ;;  %1705 = vmatprep.subr.bf16.mxu1 %v4264_v24  ;;  %v699_v39 = vmax.f32 %v575_v27, 0.0 }
 0x1a8   : > { %3959 = vmatprep.subr.bf16.mxu0 %v4261_v26 }
 0x1a9   : > { %v700_v40 = vmax.f32 %v579_v35, 0.0 }
 0x1aa   : > { %1706 = vmatpush1.bf16.msra.mxu1 %v4262_v34 }
 0x1ab   : > { %v4879_v41 = vpack.c.bf16 %v700_v40, %v699_v39  ;;  %v4881_v44 = vpop.f32.mrb[20].mxu0  ;;  %3960 = vmatpush3.bf16.msra.mxu0 %v4261_v26  ;;  %3997 = vmatprep.subr.bf16.mxu1 %v4877_v37 }
 0x1ac   : > { %6319 = vst [vmem:[#allocation25_spill] sm:$0xff] %v4881_v44  ;;  %v584_v45 = vpop.f32.mrb[21].mxu0  ;;  %3961 = vmatprep.subr.bf16.mxu0 %v4265_v38 }
 0x1ad   : > { %v585_v48 = vadd.f32 %v584_v45, %v4825_v32  ;;  %v4885_v49 = vpop.f32.mrb[22].mxu0  ;;  %979 = vmatmul.mubr.bf16.gmra.mrb[16].mxu1 %v4879_v41  ;;  %3925 = vmatprep.mubr.bf16.mxu0 %v4879_v41 }
 0x1ae   : > { %6320 = vst [vmem:[#allocation26_spill] sm:$0xff] %v4885_v49  ;;  %v588_v50 = vpop.f32.mrb[23].mxu0  ;;  %988 = vmatprep.mubr.bf16.mxu1 %v6284_v0 }
 0x1af   : > { %v589_v51 = vadd.f32 %v588_v50, %v4825_v32  ;;  %3962 = vmatpush3.bf16.msra.mxu0 %v4265_v38  ;;  %v701_v53 = vmax.f32 %v585_v48, 0.0 }
 0x1b0   : > { %3963 = vmatprep.subr.bf16.mxu0 %v4266_v46 }
 0x1b1   : > { %v702_v54 = vmax.f32 %v589_v51, 0.0 }
 0x1b3   : > { %v4891_v57 = vpack.c.bf16 %v702_v54, %v701_v53  ;;  %v4893_v58 = vpop.f32.mrb[24].mxu0  ;;  %3964 = vmatpush3.bf16.msra.mxu0 %v4266_v46 }
 0x1b4   : > { %6321 = vst [vmem:[#allocation27_spill] sm:$0xff] %v4893_v58  ;;  %v594_v59 = vpop.f32.mrb[25].mxu0  ;;  %2494 = vmatprep.subr.bf16.mxu0 %v4270_v52 }
 0x1b5   : > { %v595_v60 = vadd.f32 %v594_v59, %v4825_v32  ;;  %v4896_v62 = vpop.f32.mrb[26].mxu0  ;;  %989 = vmatmul.mubr.bf16.gmra.mrb[20].mxu1 %v4891_v57  ;;  %3926 = vmatmul.mubr.bf16.gmra.mrb[72].mxu0 %v4891_v57 }
 0x1b6   : > { %6322 = vst [vmem:[#allocation28_spill] sm:$0xff] %v4896_v62  ;;  %v598_v63 = vpop.f32.mrb[27].mxu0  ;;  %998 = vmatprep.mubr.bf16.mxu1 %v6284_v0 }
 0x1b7   : > { %v599_v1 = vadd.f32 %v598_v63, %v4825_v32  ;;  %v703_v2 = vmax.f32 %v595_v60, 0.0 }
 0x1b9   : > { %v704_v3 = vmax.f32 %v599_v1, 0.0 }
 0x1bb   : > { %v4902_v4 = vpack.c.bf16 %v704_v3, %v703_v2  ;;  %v4904_v5 = vpop.f32.mrb[28].mxu0 }
 0x1bc   : > { %6323 = vst [vmem:[#allocation29_spill] sm:$0xff] %v4904_v5  ;;  %v604_v6 = vpop.f32.mrb[29].mxu0 }
 0x1bd   : > { %v605_v9 = vadd.f32 %v604_v6, %v4825_v32  ;;  %v4907_v10 = vpop.f32.mrb[30].mxu0  ;;  %999 = vmatmul.mubr.bf16.gmra.mrb[24].mxu1 %v4902_v4  ;;  %3929 = vmatprep.mubr.bf16.mxu0 %v4902_v4 }
 0x1be   : > { %6324 = vst [vmem:[#allocation30_spill] sm:$0xff] %v4907_v10  ;;  %v608_v11 = vpop.f32.mrb[31].mxu0  ;;  %1008 = vmatprep.mubr.bf16.mxu1 %v6284_v0 }
 0x1bf   : > { %v609_v12 = vadd.f32 %v608_v11, %v4825_v32  ;;  %v705_v14 = vmax.f32 %v605_v9, 0.0 }
 0x1c1   : > { %v706_v15 = vmax.f32 %v609_v12, 0.0 }
 0x1c3   : > { %v4913_v16 = vpack.c.bf16 %v706_v15, %v705_v14  ;;  %v4915_v17 = vpop.f32.mrb[32].mxu0 }
 0x1c4   : > { %6325 = vst [vmem:[#allocation31_spill] sm:$0xff] %v4915_v17  ;;  %v614_v18 = vpop.f32.mrb[33].mxu0 }
 0x1c5   : > { %v615_v19 = vadd.f32 %v614_v18, %v4825_v32  ;;  %v4918_v20 = vpop.f32.mrb[34].mxu0  ;;  %1009 = vmatmul.mubr.bf16.gmra.mrb[28].mxu1 %v4913_v16  ;;  %3930 = vmatmul.mubr.bf16.gmra.mrb[76].mxu0 %v4913_v16 }
 0x1c6   : > { %6326 = vst [vmem:[#allocation32_spill] sm:$0xff] %v4918_v20  ;;  %v618_v21 = vpop.f32.mrb[35].mxu0  ;;  %1018 = vmatprep.mubr.bf16.mxu1 %v6284_v0 }
 0x1c7   : > { %v619_v24 = vadd.f32 %v618_v21, %v4825_v32  ;;  %v707_v25 = vmax.f32 %v615_v19, 0.0 }
 0x1c9   : > { %v708_v26 = vmax.f32 %v619_v24, 0.0 }
 0x1cb   : > { %v4924_v27 = vpack.c.bf16 %v708_v26, %v707_v25  ;;  %v4926_v30 = vpop.f32.mrb[36].mxu0 }
 0x1cc   : > { %6327 = vst [vmem:[#allocation33_spill] sm:$0xff] %v4926_v30  ;;  %v624_v34 = vpop.f32.mrb[37].mxu0 }
 0x1cd   : > { %v625_v35 = vadd.f32 %v624_v34, %v4825_v32  ;;  %v4929_v38 = vpop.f32.mrb[38].mxu0  ;;  %1019 = vmatmul.mubr.bf16.gmra.mrb[32].mxu1 %v4924_v27  ;;  %3933 = vmatprep.mubr.bf16.mxu0 %v4924_v27 }
 0x1ce   : > { %6328 = vst [vmem:[#allocation34_spill] sm:$0xff] %v4929_v38  ;;  %v628_v39 = vpop.f32.mrb[39].mxu0  ;;  %1028 = vmatprep.mubr.bf16.mxu1 %v6284_v0 }
 0x1cf   : > { %v629_v40 = vadd.f32 %v628_v39, %v4825_v32  ;;  %v709_v45 = vmax.f32 %v625_v35, 0.0 }
 0x1d1   : > { %v710_v46 = vmax.f32 %v629_v40, 0.0 }
 0x1d3   : > { %v4935_v48 = vpack.c.bf16 %v710_v46, %v709_v45  ;;  %v4937_v50 = vpop.f32.mrb[40].mxu0 }
 0x1d4   : > { %6329 = vst [vmem:[#allocation35_spill] sm:$0xff] %v4937_v50  ;;  %v634_v51 = vpop.f32.mrb[41].mxu0 }
 0x1d5   : > { %v635_v52 = vadd.f32 %v634_v51, %v4825_v32  ;;  %v4940_v53 = vpop.f32.mrb[42].mxu0  ;;  %1029 = vmatmul.mubr.bf16.gmra.mrb[36].mxu1 %v4935_v48  ;;  %3934 = vmatmul.mubr.bf16.gmra.mrb[80].mxu0 %v4935_v48 }
 0x1d6   : > { %6330 = vst [vmem:[#allocation36_spill] sm:$0xff] %v4940_v53  ;;  %v638_v54 = vpop.f32.mrb[43].mxu0  ;;  %1038 = vmatprep.mubr.bf16.mxu1 %v6284_v0 }
 0x1d7   : > { %v639_v59 = vadd.f32 %v638_v54, %v4825_v32  ;;  %v711_v60 = vmax.f32 %v635_v52, 0.0 }
 0x1d9   : > { %v712_v63 = vmax.f32 %v639_v59, 0.0 }
 0x1db   : > { %v4946_v1 = vpack.c.bf16 %v712_v63, %v711_v60  ;;  %v4948_v2 = vpop.f32.mrb[44].mxu0  ;;  %v410_v60 = vsub.s32 0, %v4816_v29 }
 0x1dc   : > { %6331 = vst [vmem:[#allocation37_spill] sm:$0xff] %v4948_v2  ;;  %v644_v3 = vpop.f32.mrb[45].mxu0 }
 0x1dd   : > { %v645_v6 = vadd.f32 %v644_v3, %v4825_v32  ;;  %v4951_v9 = vpop.f32.mrb[46].mxu0  ;;  %1039 = vmatmul.mubr.bf16.gmra.mrb[40].mxu1 %v4946_v1  ;;  %3937 = vmatprep.mubr.bf16.mxu0 %v4946_v1 }
 0x1de   : > { %6332 = vst [vmem:[#allocation38_spill] sm:$0xff] %v4951_v9  ;;  %v648_v11 = vpop.f32.mrb[47].mxu0  ;;  %1048 = vmatprep.mubr.bf16.mxu1 %v6284_v0 }
 0x1df   : > { %v649_v12 = vadd.f32 %v648_v11, %v4825_v32  ;;  %v713_v14 = vmax.f32 %v645_v6, 0.0 }
 0x1e1   : > { %v714_v15 = vmax.f32 %v649_v12, 0.0  ;;  %v4985_v12 = vrot.slane %v4822_v31, %v410_v60 }
 0x1e3   : > { %v4957_v18 = vpack.c.bf16 %v714_v15, %v713_v14  ;;  %v4959_v19 = vpop.f32.mrb[48].mxu0  ;;  %6338 = vst [vmem:[#allocation44_spill] sm:$0xff] %v4985_v12 }
 0x1e4   : > { %6333 = vst [vmem:[#allocation39_spill] sm:$0xff] %v4959_v19  ;;  %v654_v21 = vpop.f32.mrb[49].mxu0 }
 0x1e5   : > { %v655_v24 = vadd.f32 %v654_v21, %v4825_v32  ;;  %v4962_v25 = vpop.f32.mrb[50].mxu0  ;;  %1049 = vmatmul.mubr.bf16.gmra.mrb[44].mxu1 %v4957_v18  ;;  %3938 = vmatmul.mubr.bf16.gmra.mrb[84].mxu0 %v4957_v18 }
 0x1e6   : > { %6334 = vst [vmem:[#allocation40_spill] sm:$0xff] %v4962_v25  ;;  %v658_v26 = vpop.f32.mrb[51].mxu0  ;;  %1058 = vmatprep.mubr.bf16.mxu1 %v6284_v0 }
 0x1e7   : > { %v659_v34 = vadd.f32 %v658_v26, %v4825_v32  ;;  %v715_v35 = vmax.f32 %v655_v24, 0.0 }
 0x1e9   : > { %v716_v39 = vmax.f32 %v659_v34, 0.0 }
 0x1eb   : > { %v4968_v40 = vpack.c.bf16 %v716_v39, %v715_v35  ;;  %v4970_v45 = vpop.f32.mrb[52].mxu0 }
 0x1ec   : > { %6335 = vst [vmem:[#allocation41_spill] sm:$0xff] %v4970_v45  ;;  %v664_v46 = vpop.f32.mrb[53].mxu0 }
 0x1ed   : > { %v665_v51 = vadd.f32 %v664_v46, %v4825_v32  ;;  %v4973_v52 = vpop.f32.mrb[54].mxu0  ;;  %1059 = vmatmul.mubr.bf16.gmra.mrb[48].mxu1 %v4968_v40  ;;  %3941 = vmatprep.mubr.bf16.mxu0 %v4968_v40 }
 0x1ee   : > { %6336 = vst [vmem:[#allocation42_spill] sm:$0xff] %v4973_v52  ;;  %v668_v54 = vpop.f32.mrb[55].mxu0  ;;  %1068 = vmatprep.mubr.bf16.mxu1 %v6284_v0 }
 0x1ef   : > { %v669_v59 = vadd.f32 %v668_v54, %v4825_v32  ;;  %v717_v63 = vmax.f32 %v665_v51, 0.0 }
 0x1f1   : > { %v718_v3 = vmax.f32 %v669_v59, 0.0 }
 0x1f3   : > { %v4980_v6 = vpack.c.bf16 %v718_v3, %v717_v63  ;;  %v4982_v11 = vpop.f32.mrb[56].mxu0 }
 0x1f4   : > { %6337 = vst [vmem:[#allocation43_spill] sm:$0xff] %v4982_v11  ;;  %v674_v14 = vpop.f32.mrb[57].mxu0 }
 0x1f5   : > { %v675_v15 = vadd.f32 %v674_v14, %v4825_v32  ;;  %v676_v21 = vpop.f32.mrb[58].mxu0  ;;  %1069 = vmatmul.mubr.bf16.gmra.mrb[52].mxu1 %v4980_v6  ;;  %3942 = vmatmul.mubr.bf16.gmra.mrb[88].mxu0 %v4980_v6 }
 0x1f6   : > { %v4991_v24 = vadd.f32 %v676_v21, %v4985_v12  ;;  %v678_v26 = vpop.f32.mrb[59].mxu0  ;;  %1078 = vmatprep.mubr.bf16.mxu1 %v6284_v0 }
 0x1f7   : > { %v679_v34 = vadd.f32 %v678_v26, %v4825_v32  ;;  %v719_v35 = vmax.f32 %v675_v15, 0.0  ;;  %v4268_v26 = vld [vmem:[#allocation7 + $0x180] ss:$12 sps:$4 sm:$0xff]  }
 0x1f8   : > { %6339 = vst [vmem:[#allocation45_spill] sm:$0xff] %v4991_v24 }
 0x1f9   : > { %v720_v39 = vmax.f32 %v679_v34, 0.0  ;;  %v4273_v34 = vld [vmem:[#allocation7 + $0x19c] ss:$12 sps:$4 sm:$0xff]  }
 0x1fb   : > { %v4995_v31 = vpack.c.bf16 %v720_v39, %v719_v35  ;;  %v4997_v46 = vpop.f32.mrb[60].mxu0  ;;  %v4274_v35 = vld [vmem:[#allocation7 + $0x1a0] ss:$12 sps:$4 sm:$0xff]   ;;  %v4281_v39 = vld [vmem:[#allocation7 + $0x1b8] ss:$12 sps:$4 sm:$0xff]  }
 0x1fc   : > { %6340 = vst [vmem:[#allocation46_spill] sm:$0xff] %v4997_v46  ;;  %v684_v51 = vpop.f32.mrb[61].mxu0 }
 0x1fd   : > { %v685_v54 = vadd.f32 %v684_v51, %v4825_v32  ;;  %v686_v59 = vpop.f32.mrb[62].mxu0  ;;  %1079 = vmatmul.mubr.bf16.gmra.mrb[56].mxu1 %v4995_v31  ;;  %3945 = vmatprep.mubr.bf16.mxu0 %v4995_v31  ;;  %v4277_v51 = vld [vmem:[#allocation7 + $0x1b4] ss:$12 sps:$4 sm:$0xff]  }
 0x1fe   : > { %v5003_v60 = vadd.f32 %v686_v59, %v4985_v12  ;;  %v688_v63 = vpop.f32.mrb[63].mxu0  ;;  %1088 = vmatprep.mubr.bf16.mxu1 %v6284_v0  ;;  %v4280_v59 = vld [vmem:[#allocation7 + $0x1cc] ss:$12 sps:$4 sm:$0xff]  }
 0x1ff   : > { %v689_v3 = vadd.f32 %v688_v63, %v4825_v32  ;;  %v721_v14 = vmax.f32 %v685_v54, 0.0  ;;  %v4271_v32 = vld [vmem:[#allocation7 + $0x198] ss:$12 sps:$4 sm:$0xff]   ;;  %v4275_v54 = vld [vmem:[#allocation7 + $0x1b0] ss:$12 sps:$4 sm:$0xff]  }
 0x200   : > { %6341 = vst [vmem:[#allocation47_spill] sm:$0xff] %v5003_v60  ;;  %v4288_v63 = vld [vmem:[#allocation7 + $0x1d0] ss:$12 sps:$4 sm:$0xff]  }
 0x201   : > { %v722_v15 = vmax.f32 %v689_v3, 0.0  ;;  %v4284_v3 = vld [vmem:[#allocation7 + $0x1e4] ss:$12 sps:$4 sm:$0xff]  }
 0x203   : > { %v5007_v21 = vpack.c.bf16 %v722_v15, %v721_v14  ;;  %v4295_v14 = vld [vmem:[#allocation7 + $0x1e8] ss:$12 sps:$4 sm:$0xff]   ;;  %v4282_v15 = vld [vmem:[#allocation7 + $0x1e0] ss:$12 sps:$4 sm:$0xff]  }
 0x205   : > { %1089 = vmatmul.mubr.bf16.gmra.mrb[60].mxu1 %v5007_v21  ;;  %3946 = vmatmul.mubr.bf16.gmra.mrb[92].mxu0 %v5007_v21 }
 0x206   : > { %3965 = vmatprep.mubr.bf16.mxu0 %v4833_v42  ;;  %1723 = vmatprep.mubr.bf16.mxu1 %v6284_v0 }
 0x20d   : > { %1724 = vmatmul.mubr.bf16.vlgmr.msra.gmra.mrb[64].mxu1 %v4833_v42  ;;  %3966 = vmatmul.mubr.bf16.vlgmr.msra.gmra.mrb[96].mxu0 %v4844_v55 }
 0x20e   : > { %3998 = vmatpush3.bf16.msra.mxu1 %v4877_v37  ;;  %3969 = vmatprep.mubr.bf16.mxu0 %v4855_v7  ;;  %v4278_v37 = vld [vmem:[#allocation7 + $0x1c8] ss:$12 sps:$4 sm:$0xff]  }
 0x20f   : > { %2495 = vmatpush1.bf16.msra.mxu0 %v4268_v26  ;;  %1733 = vmatprep.mubr.bf16.mxu1 %v6284_v0  ;;  %v4287_v26 = vld [vmem:[#allocation7 + $0x1fc] ss:$12 sps:$4 sm:$0xff]  }
 0x210   : > { %2496 = vmatprep.subr.bf16.mxu0 %v4273_v34  ;;  %3999 = vmatprep.subr.bf16.mxu1 %v4274_v35  ;;  %v4296_v34 = vld [vmem:[#allocation7 + $0x200] ss:$12 sps:$4 sm:$0xff]  }
 0x212   : > { %4000 = vmatpush3.bf16.msra.mxu1 %v4274_v35  ;;  %v4285_v35 = vld [vmem:[#allocation7 + $0x1f8] ss:$12 sps:$4 sm:$0xff]  }
 0x213   : > { %2497 = vmatpush1.bf16.msra.mxu0 %v4271_v32  ;;  %4001 = vmatprep.subr.bf16.mxu1 %v4281_v39  ;;  %v4291_v32 = vld [vmem:[#allocation7 + $0x214] ss:$12 sps:$4 sm:$0xff]  }
 0x214   : > { %2498 = vmatprep.subr.bf16.mxu0 %v4277_v51  ;;  %v4289_v51 = vld [vmem:[#allocation7 + $0x210] ss:$12 sps:$4 sm:$0xff]  }
 0x215   : > { %1734 = vmatmul.mubr.bf16.gmra.mrb[68].mxu1 %v4844_v55  ;;  %3970 = vmatmul.mubr.bf16.gmra.mrb[100].mxu0 %v4866_v22 }
 0x216   : > { %3973 = vmatprep.mubr.bf16.mxu0 %v4879_v41  ;;  %1743 = vmatprep.mubr.bf16.mxu1 %v6284_v0 }
 0x217   : > { %2499 = vmatpush1.bf16.msra.mxu0 %v4275_v54  ;;  %4002 = vmatpush3.bf16.msra.mxu1 %v4281_v39  ;;  %v4297_v39 = vld [vmem:[#allocation7 + $0x218] ss:$12 sps:$4 sm:$0xff]  }
 0x218   : > { %2500 = vmatprep.subr.bf16.mxu0 %v4280_v59  ;;  %4003 = vmatprep.subr.bf16.mxu1 %v4288_v63  ;;  %v4294_v54 = vld [vmem:[#allocation7 + $0x22c] ss:$12 sps:$4 sm:$0xff]   ;;  %v4298_v59 = vld [vmem:[#allocation7 + $0x230] ss:$12 sps:$4 sm:$0xff]  }
 0x21b   : > { %2501 = vmatpush1.bf16.msra.mxu0 %v4278_v37  ;;  %4004 = vmatpush3.bf16.msra.mxu1 %v4288_v63  ;;  %v4292_v63 = vld [vmem:[#allocation7 + $0x228] ss:$12 sps:$4 sm:$0xff]  }
 0x21c   : > { %2502 = vmatprep.subr.bf16.mxu0 %v4284_v3  ;;  %4005 = vmatprep.subr.bf16.mxu1 %v4295_v14 }
 0x21d   : > { %1744 = vmatmul.mubr.bf16.gmra.mrb[72].mxu1 %v4855_v7  ;;  %3974 = vmatmul.mubr.bf16.gmra.mrb[104].mxu0 %v4891_v57 }
 0x21e   : > { %3977 = vmatprep.mubr.bf16.mxu0 %v4902_v4  ;;  %1753 = vmatprep.mubr.bf16.mxu1 %v6284_v0 }
 0x21f   : > { %2503 = vmatpush1.bf16.msra.mxu0 %v4282_v15  ;;  %4006 = vmatpush3.bf16.msra.mxu1 %v4295_v14 }
 0x220   : > { %2504 = vmatprep.subr.bf16.mxu0 %v4287_v26  ;;  %4007 = vmatprep.subr.bf16.mxu1 %v4296_v34 }
 0x223   : > { %2505 = vmatpush1.bf16.msra.mxu0 %v4285_v35  ;;  %4008 = vmatpush3.bf16.msra.mxu1 %v4296_v34 }
 0x224   : > { %2506 = vmatprep.subr.bf16.mxu0 %v4291_v32  ;;  %4009 = vmatprep.subr.bf16.mxu1 %v4297_v39 }
 0x225   : > { %1754 = vmatmul.mubr.bf16.gmra.mrb[76].mxu1 %v4866_v22  ;;  %3978 = vmatmul.mubr.bf16.gmra.mrb[108].mxu0 %v4913_v16 }
 0x226   : > { %3981 = vmatprep.mubr.bf16.mxu0 %v4924_v27  ;;  %1763 = vmatprep.mubr.bf16.mxu1 %v6284_v0 }
 0x227   : > { %2507 = vmatpush1.bf16.msra.mxu0 %v4289_v51  ;;  %4010 = vmatpush3.bf16.msra.mxu1 %v4297_v39 }
 0x228   : > { %2508 = vmatprep.subr.bf16.mxu0 %v4294_v54  ;;  %4011 = vmatprep.subr.bf16.mxu1 %v4298_v59  ;;  %v5073_v54 = vadd.s32 8, %v4816_v29 }
 0x22a   : > { %vm745_vm3 = vcmp.le.s32.totalorder %v5073_v54, 14 }
 0x22b   : > { %2509 = vmatpush1.bf16.msra.mxu0 %v4292_v63  ;;  %4012 = vmatpush3.bf16.msra.mxu1 %v4298_v59 }
 0x22d   : > { %1764 = vmatmul.mubr.bf16.gmra.mrb[80].mxu1 %v4879_v41  ;;  %3982 = vmatmul.mubr.bf16.gmra.mrb[112].mxu0 %v4935_v48 }
 0x22e   : > { %3985 = vmatprep.mubr.bf16.mxu0 %v4946_v1  ;;  %1773 = vmatprep.mubr.bf16.mxu1 %v6284_v0 }
 0x235   : > { %1774 = vmatmul.mubr.bf16.gmra.mrb[84].mxu1 %v4891_v57  ;;  %3986 = vmatmul.mubr.bf16.gmra.mrb[116].mxu0 %v4957_v18 }
 0x236   : > { %3989 = vmatprep.mubr.bf16.mxu0 %v4968_v40  ;;  %1783 = vmatprep.mubr.bf16.mxu1 %v6284_v0 }
 0x23d   : > { %1784 = vmatmul.mubr.bf16.gmra.mrb[88].mxu1 %v4902_v4  ;;  %3990 = vmatmul.mubr.bf16.gmra.mrb[120].mxu0 %v4980_v6 }
 0x23e   : > { %3993 = vmatprep.mubr.bf16.mxu0 %v4995_v31  ;;  %1793 = vmatprep.mubr.bf16.mxu1 %v6284_v0 }
 0x245   : > { %1794 = vmatmul.mubr.bf16.gmra.mrb[92].mxu1 %v4913_v16  ;;  %3994 = vmatmul.mubr.bf16.gmra.mrb[124].mxu0 %v5007_v21 }
 0x246   : > { %1803 = vmatprep.mubr.bf16.mxu1 %v6284_v0  ;;  %2526 = vmatprep.mubr.bf16.mxu0 %v6284_v0 }
 0x24d   : > { %1804 = vmatmul.mubr.bf16.gmra.mrb[96].mxu1 %v4924_v27  ;;  %2527 = vmatmul.mubr.bf16.vlgmr.msra.gmra.mrb[128].mxu0 %v4833_v42 }
 0x24e   : > { %1813 = vmatprep.mubr.bf16.mxu1 %v6284_v0  ;;  %2533 = vmatprep.mubr.bf16.mxu0 %v6284_v0 }
 0x255   : > { %1814 = vmatmul.mubr.bf16.gmra.mrb[100].mxu1 %v4935_v48  ;;  %2534 = vmatmul.mubr.bf16.gmra.mrb[132].mxu0 %v4844_v55 }
 0x256   : > { %1823 = vmatprep.mubr.bf16.mxu1 %v6284_v0  ;;  %2543 = vmatprep.mubr.bf16.mxu0 %v6284_v0 }
 0x25d   : > { %1824 = vmatmul.mubr.bf16.gmra.mrb[104].mxu1 %v4946_v1  ;;  %2544 = vmatmul.mubr.bf16.gmra.mrb[136].mxu0 %v4855_v7 }
 0x25e   : > { %1833 = vmatprep.mubr.bf16.mxu1 %v6284_v0  ;;  %2553 = vmatprep.mubr.bf16.mxu0 %v6284_v0 }
 0x260   : > { %v5058_v37 = vpop.f32.mrb[0].mxu1 }
 0x261   : > { %v5060_v3 = vpop.f32.mrb[1].mxu1  ;;  %v6283_v15 = vrot.slane %v5058_v37, 7 }
 0x262   : > { %v944_v14 = vpop.f32.mrb[2].mxu1 }
 0x263   : > { %v1257_v26 = vrot.slane %v944_v14, 7  ;;  %v946_v34 = vpop.f32.mrb[3].mxu1 }
 0x265   : > { %v1316_v35 = vsel %vm1287_vm0, %v6283_v15, %v1257_v26  ;;  %1834 = vmatmul.mubr.bf16.gmra.mrb[108].mxu1 %v4957_v18  ;;  %2554 = vmatmul.mubr.bf16.gmra.mrb[140].mxu0 %v4866_v22 }
 0x266   : > { %v1379_v32 = vadd.f32 %v1316_v35, %v946_v34  ;;  %1843 = vmatprep.mubr.bf16.mxu1 %v6284_v0  ;;  %2563 = vmatprep.mubr.bf16.mxu0 %v6284_v0 }
 0x268   : > { %v950_v39 = vpop.f32.mrb[4].mxu1  ;;  %v3919_v51 = vpop.f32.mrb[64].mxu0 }
 0x269   : > { %v1258_v59 = vrot.slane %v950_v39, 7  ;;  %v952_v63 = vpop.f32.mrb[5].mxu1  ;;  %v1130_v14 = vpop.f32.mrb[65].mxu0  ;;  %v1410_v60 = vrot.slane %v3919_v51, 1 }
 0x26a   : > { %v954_v15 = vpop.f32.mrb[6].mxu1  ;;  %v3920_v24 = vpop.f32.mrb[66].mxu0  ;;  %v1408_v39 = vrot.slane %v1130_v14, 1 }
 0x26b   : > { %v1315_v34 = vsel %vm1287_vm0, %v1257_v26, %v1258_v59  ;;  %v1259_v35 = vrot.slane %v954_v15, 7  ;;  %v1411_v0 = vrot.slane %v3920_v24, 1  ;;  %v956_v11 = vpop.f32.mrb[7].mxu1  ;;  %v1133_v46 = vpop.f32.mrb[67].mxu0  ;;  %v6342_v26 = vmov 0  }
 0x26c   : > { %v1320_v25 = vsel %vm742_vm1, %v1315_v34, 0.0  ;;  %v1409_v52 = vrot.slane %v1133_v46, 1 }
 0x26d   : > { %v1380_v19 = vadd.f32 %v1320_v25, %v952_v63  ;;  %v1467_v45 = vsel %vm1439_vm2, %v1410_v60, %v1411_v0  ;;  %v1314_v51 = vsel %vm1287_vm0, %v1258_v59, %v1259_v35  ;;  %1844 = vmatmul.mubr.bf16.gmra.mrb[112].mxu1 %v4968_v40  ;;  %2564 = vmatmul.mubr.bf16.gmra.mrb[144].mxu0 %v4879_v41 }
 0x26e   : > { %v1381_v24 = vadd.f32 %v1314_v51, %v956_v11  ;;  %v1468_v15 = vsel %vm1439_vm2, %v1409_v52, %v1410_v60  ;;  %v5092_v46 = vsel %vm1439_vm2, %v1408_v39, %v1409_v52  ;;  %1853 = vmatprep.mubr.bf16.mxu1 %v6342_v26  ;;  %2573 = vmatprep.mubr.bf16.mxu0 %v6342_v26 }
 0x26f   : > { %v1471_v25 = vsel %vm745_vm3, %v1468_v15, 0.0  ;;  %v5098_v59 = vadd.f32 %v1467_v45, %v1380_v19 }
 0x270   : > { %v960_v63 = vpop.f32.mrb[8].mxu1  ;;  %v5100_v14 = vadd.f32 %v1471_v25, %v1379_v32 }
 0x271   : > { %v1260_v11 = vrot.slane %v960_v63, 7  ;;  %v962_v34 = vpop.f32.mrb[9].mxu1 }
 0x272   : > { %v964_v51 = vpop.f32.mrb[10].mxu1 }
 0x273   : > { %v1313_v60 = vsel %vm1287_vm0, %v1259_v35, %v1260_v11  ;;  %v1261_v52 = vrot.slane %v964_v51, 7  ;;  %v966_v39 = vpop.f32.mrb[11].mxu1 }
 0x274   : > { %v1322_v53 = vsel %vm742_vm1, %v1313_v60, 0.0 }
 0x275   : > { %v1382_v9 = vadd.f32 %v1322_v53, %v962_v34  ;;  %v1312_v15 = vsel %vm1287_vm0, %v1260_v11, %v1261_v52  ;;  %1854 = vmatmul.mubr.bf16.gmra.mrb[116].mxu1 %v4980_v6  ;;  %2574 = vmatmul.mubr.bf16.gmra.mrb[148].mxu0 %v4891_v57 }
 0x276   : > { %v1383_v19 = vadd.f32 %v1312_v15, %v966_v39  ;;  %1863 = vmatprep.mubr.bf16.mxu1 %v6342_v26  ;;  %2583 = vmatprep.mubr.bf16.mxu0 %v6342_v26 }
 0x278   : > { %v970_v45 = vpop.f32.mrb[12].mxu1  ;;  %v3923_v32 = vpop.f32.mrb[68].mxu0 }
 0x279   : > { %v1262_v35 = vrot.slane %v970_v45, 7  ;;  %v972_v25 = vpop.f32.mrb[13].mxu1  ;;  %v1146_v63 = vpop.f32.mrb[69].mxu0  ;;  %v1414_v34 = vrot.slane %v3923_v32, 1 }
 0x27a   : > { %v1412_v51 = vrot.slane %v1146_v63, 1  ;;  %v974_v60 = vpop.f32.mrb[14].mxu1  ;;  %v3924_v53 = vpop.f32.mrb[70].mxu0 }
 0x27b   : > { %v1311_v11 = vsel %vm1287_vm0, %v1261_v52, %v1262_v35  ;;  %v1263_v50 = vrot.slane %v974_v60, 7  ;;  %v1415_v2 = vrot.slane %v3924_v53, 1  ;;  %v976_v20 = vpop.f32.mrb[15].mxu1  ;;  %v1149_v39 = vpop.f32.mrb[71].mxu0 }
 0x27c   : > { %v1324_v15 = vsel %vm742_vm1, %v1311_v11, 0.0  ;;  %v1466_v38 = vsel %vm1439_vm2, %v1411_v0, %v1412_v51  ;;  %v1413_v45 = vrot.slane %v1149_v39, 1 }
 0x27d   : > { %v1384_v17 = vadd.f32 %v1324_v15, %v972_v25  ;;  %v1463_v63 = vsel %vm1439_vm2, %v1414_v34, %v1415_v2  ;;  %v1310_v32 = vsel %vm1287_vm0, %v1262_v35, %v1263_v50  ;;  %1864 = vmatmul.mubr.bf16.gmra.mrb[120].mxu1 %v4995_v31  ;;  %2584 = vmatmul.mubr.bf16.gmra.mrb[152].mxu0 %v4902_v4  ;;  %v1473_v52 = vsel %vm745_vm3, %v1466_v38, 0.0 }
 0x27e   : > { %v1385_v60 = vadd.f32 %v1310_v32, %v976_v20  ;;  %v1464_v53 = vsel %vm1439_vm2, %v1413_v45, %v1414_v34  ;;  %v1465_v0 = vsel %vm1439_vm2, %v1412_v51, %v1413_v45  ;;  %1873 = vmatprep.mubr.bf16.mxu1 %v6342_v26  ;;  %2593 = vmatprep.mubr.bf16.mxu0 %v6342_v26 }
 0x27f   : > { %v5132_v25 = vadd.f32 %v1473_v52, %v1381_v24  ;;  %v5134_v35 = vadd.f32 %v1465_v0, %v1382_v9  ;;  %v1475_v11 = vsel %vm745_vm3, %v1464_v53, 0.0  ;;  %v5138_v39 = vadd.f32 %v1463_v63, %v1384_v17 }
 0x280   : > { %v980_v20 = vpop.f32.mrb[16].mxu1  ;;  %v5140_v38 = vadd.f32 %v1475_v11, %v1383_v19 }
 0x281   : > { %v1264_v34 = vrot.slane %v980_v20, 7  ;;  %v982_v15 = vpop.f32.mrb[17].mxu1 }
 0x282   : > { %v984_v32 = vpop.f32.mrb[18].mxu1 }
 0x283   : > { %v1309_v51 = vsel %vm1287_vm0, %v1263_v50, %v1264_v34  ;;  %v1265_v45 = vrot.slane %v984_v32, 7  ;;  %v986_v30 = vpop.f32.mrb[19].mxu1 }
 0x284   : > { %v1326_v9 = vsel %vm742_vm1, %v1309_v51, 0.0 }
 0x285   : > { %v1386_v24 = vadd.f32 %v1326_v9, %v982_v15  ;;  %v1308_v52 = vsel %vm1287_vm0, %v1264_v34, %v1265_v45  ;;  %1874 = vmatmul.mubr.bf16.gmra.mrb[124].mxu1 %v5007_v21  ;;  %2594 = vmatmul.mubr.bf16.gmra.mrb[156].mxu0 %v4913_v16 }
 0x286   : > { %v1387_v17 = vadd.f32 %v1308_v52, %v986_v30  ;;  %4013 = vmatprep.mubr.bf16.mxu1 %v4833_v42  ;;  %2603 = vmatprep.mubr.bf16.mxu0 %v6342_v26 }
 0x288   : > { %v990_v19 = vpop.f32.mrb[20].mxu1  ;;  %v3927_v50 = vpop.f32.mrb[72].mxu0 }
 0x289   : > { %v1266_v63 = vrot.slane %v990_v19, 7  ;;  %v992_v53 = vpop.f32.mrb[21].mxu1  ;;  %v1162_v0 = vpop.f32.mrb[73].mxu0  ;;  %v1418_v32 = vrot.slane %v3927_v50, 1 }
 0x28a   : > { %v1416_v11 = vrot.slane %v1162_v0, 1  ;;  %v994_v20 = vpop.f32.mrb[22].mxu1  ;;  %v3928_v15 = vpop.f32.mrb[74].mxu0 }
 0x28b   : > { %v1307_v34 = vsel %vm1287_vm0, %v1265_v45, %v1266_v63  ;;  %v1267_v51 = vrot.slane %v994_v20, 7  ;;  %v1419_v9 = vrot.slane %v3928_v15, 1  ;;  %v996_v62 = vpop.f32.mrb[23].mxu1  ;;  %v1165_v30 = vpop.f32.mrb[75].mxu0 }
 0x28c   : > { %v1328_v42 = vsel %vm742_vm1, %v1307_v34, 0.0  ;;  %v1462_v52 = vsel %vm1439_vm2, %v1415_v2, %v1416_v11  ;;  %v1417_v19 = vrot.slane %v1165_v30, 1 }
 0x28d   : > { %v1388_v10 = vadd.f32 %v1328_v42, %v992_v53  ;;  %v1459_v0 = vsel %vm1439_vm2, %v1418_v32, %v1419_v9  ;;  %v1306_v50 = vsel %vm1287_vm0, %v1266_v63, %v1267_v51  ;;  %2604 = vmatmul.mubr.bf16.gmra.mrb[160].mxu0 %v4924_v27  ;;  %4014 = vmatmul.mubr.bf16.vlgmr.msra.gmra.mrb[128].mxu1 %v4844_v55  ;;  %v1477_v45 = vsel %vm745_vm3, %v1462_v52, 0.0 }
 0x28e   : > { %v1389_v20 = vadd.f32 %v1306_v50, %v996_v62  ;;  %v1460_v15 = vsel %vm1439_vm2, %v1417_v19, %v1418_v32  ;;  %v1461_v2 = vsel %vm1439_vm2, %v1416_v11, %v1417_v19  ;;  %4017 = vmatprep.mubr.bf16.mxu1 %v4855_v7  ;;  %2613 = vmatprep.mubr.bf16.mxu0 %v6342_v26 }
 0x28f   : > { %v5172_v53 = vadd.f32 %v1477_v45, %v1385_v60  ;;  %v5174_v63 = vadd.f32 %v1461_v2, %v1386_v24  ;;  %v1479_v55 = vsel %vm745_vm3, %v1460_v15, 0.0  ;;  %v5178_v34 = vadd.f32 %v1459_v0, %v1388_v10 }
 0x290   : > { %v1000_v62 = vpop.f32.mrb[24].mxu1  ;;  %v5180_v30 = vadd.f32 %v1479_v55, %v1387_v17 }
 0x291   : > { %v1268_v32 = vrot.slane %v1000_v62, 7  ;;  %v1002_v42 = vpop.f32.mrb[25].mxu1 }
 0x292   : > { %v1004_v52 = vpop.f32.mrb[26].mxu1 }
 0x293   : > { %v1305_v7 = vsel %vm1287_vm0, %v1267_v51, %v1268_v32  ;;  %v1269_v11 = vrot.slane %v1004_v52, 7  ;;  %v1006_v19 = vpop.f32.mrb[27].mxu1 }
 0x294   : > { %v1330_v60 = vsel %vm742_vm1, %v1305_v7, 0.0 }
 0x295   : > { %v1390_v24 = vadd.f32 %v1330_v60, %v1002_v42  ;;  %v1304_v50 = vsel %vm1287_vm0, %v1268_v32, %v1269_v11  ;;  %2614 = vmatmul.mubr.bf16.gmra.mrb[164].mxu0 %v4935_v48  ;;  %4018 = vmatmul.mubr.bf16.gmra.mrb[132].mxu1 %v4866_v22 }
 0x296   : > { %v1391_v10 = vadd.f32 %v1304_v50, %v1006_v19  ;;  %4021 = vmatprep.mubr.bf16.mxu1 %v4879_v41  ;;  %2623 = vmatprep.mubr.bf16.mxu0 %v6342_v26 }
 0x298   : > { %v1010_v17 = vpop.f32.mrb[28].mxu1  ;;  %v3931_v51 = vpop.f32.mrb[76].mxu0 }
 0x299   : > { %v1270_v0 = vrot.slane %v1010_v17, 7  ;;  %v1012_v45 = vpop.f32.mrb[29].mxu1  ;;  %v1178_v15 = vpop.f32.mrb[77].mxu0  ;;  %v1422_v42 = vrot.slane %v3931_v51, 1 }
 0x29a   : > { %v1420_v2 = vrot.slane %v1178_v15, 1  ;;  %v1014_v55 = vpop.f32.mrb[30].mxu1  ;;  %v3932_v62 = vpop.f32.mrb[78].mxu0 }
 0x29b   : > { %v1303_v32 = vsel %vm1287_vm0, %v1269_v11, %v1270_v0  ;;  %v1271_v52 = vrot.slane %v1014_v55, 7  ;;  %v1423_v7 = vrot.slane %v3932_v62, 1  ;;  %v1016_v22 = vpop.f32.mrb[31].mxu1  ;;  %v1181_v19 = vpop.f32.mrb[79].mxu0 }
 0x29c   : > { %v1332_v41 = vsel %vm742_vm1, %v1303_v32, 0.0  ;;  %v1458_v60 = vsel %vm1439_vm2, %v1419_v9, %v1420_v2  ;;  %v1421_v50 = vrot.slane %v1181_v19, 1 }
 0x29d   : > { %v1392_v17 = vadd.f32 %v1332_v41, %v1012_v45  ;;  %v1455_v15 = vsel %vm1439_vm2, %v1422_v42, %v1423_v7  ;;  %v1302_v51 = vsel %vm1287_vm0, %v1270_v0, %v1271_v52  ;;  %2624 = vmatmul.mubr.bf16.gmra.mrb[168].mxu0 %v4946_v1  ;;  %4022 = vmatmul.mubr.bf16.gmra.mrb[136].mxu1 %v4891_v57  ;;  %v1481_v11 = vsel %vm745_vm3, %v1458_v60, 0.0 }
 0x29e   : > { %v1393_v55 = vadd.f32 %v1302_v51, %v1016_v22  ;;  %v1456_v62 = vsel %vm1439_vm2, %v1421_v50, %v1422_v42  ;;  %v1457_v9 = vsel %vm1439_vm2, %v1420_v2, %v1421_v50  ;;  %4025 = vmatprep.mubr.bf16.mxu1 %v4902_v4  ;;  %2633 = vmatprep.mubr.bf16.mxu0 %v6342_v26 }
 0x29f   : > { %v5212_v45 = vadd.f32 %v1481_v11, %v1389_v20  ;;  %v5214_v0 = vadd.f32 %v1457_v9, %v1390_v24  ;;  %v1483_v57 = vsel %vm745_vm3, %v1456_v62, 0.0  ;;  %v5218_v32 = vadd.f32 %v1455_v15, %v1392_v17 }
 0x2a0   : > { %v1020_v22 = vpop.f32.mrb[32].mxu1  ;;  %v5220_v19 = vadd.f32 %v1483_v57, %v1391_v10 }
 0x2a1   : > { %v1272_v42 = vrot.slane %v1020_v22, 7  ;;  %v1022_v41 = vpop.f32.mrb[33].mxu1 }
 0x2a2   : > { %v1024_v60 = vpop.f32.mrb[34].mxu1 }
 0x2a3   : > { %v1301_v4 = vsel %vm1287_vm0, %v1271_v52, %v1272_v42  ;;  %v1273_v2 = vrot.slane %v1024_v60, 7  ;;  %v1026_v50 = vpop.f32.mrb[35].mxu1 }
 0x2a4   : > { %v1334_v20 = vsel %vm742_vm1, %v1301_v4, 0.0 }
 0x2a5   : > { %v1394_v24 = vadd.f32 %v1334_v20, %v1022_v41  ;;  %v1300_v51 = vsel %vm1287_vm0, %v1272_v42, %v1273_v2  ;;  %2634 = vmatmul.mubr.bf16.gmra.mrb[172].mxu0 %v4957_v18  ;;  %4026 = vmatmul.mubr.bf16.gmra.mrb[140].mxu1 %v4913_v16 }
 0x2a6   : > { %v1395_v10 = vadd.f32 %v1300_v51, %v1026_v50  ;;  %4029 = vmatprep.mubr.bf16.mxu1 %v4924_v27  ;;  %2643 = vmatprep.mubr.bf16.mxu0 %v6342_v26 }
 0x2a8   : > { %v1030_v17 = vpop.f32.mrb[36].mxu1  ;;  %v3935_v52 = vpop.f32.mrb[80].mxu0 }
 0x2a9   : > { %v1274_v15 = vrot.slane %v1030_v17, 7  ;;  %v1032_v11 = vpop.f32.mrb[37].mxu1  ;;  %v1194_v62 = vpop.f32.mrb[81].mxu0  ;;  %v1426_v41 = vrot.slane %v3935_v52, 1 }
 0x2aa   : > { %v1424_v9 = vrot.slane %v1194_v62, 1  ;;  %v1034_v57 = vpop.f32.mrb[38].mxu1  ;;  %v3936_v22 = vpop.f32.mrb[82].mxu0 }
 0x2ab   : > { %v1299_v42 = vsel %vm1287_vm0, %v1273_v2, %v1274_v15  ;;  %v1275_v60 = vrot.slane %v1034_v57, 7  ;;  %v1427_v4 = vrot.slane %v3936_v22, 1  ;;  %v1036_v16 = vpop.f32.mrb[39].mxu1  ;;  %v1197_v50 = vpop.f32.mrb[83].mxu0 }
 0x2ac   : > { %v1336_v27 = vsel %vm742_vm1, %v1299_v42, 0.0  ;;  %v1454_v20 = vsel %vm1439_vm2, %v1423_v7, %v1424_v9  ;;  %v1425_v51 = vrot.slane %v1197_v50, 1 }
 0x2ad   : > { %v1396_v17 = vadd.f32 %v1336_v27, %v1032_v11  ;;  %v1451_v62 = vsel %vm1439_vm2, %v1426_v41, %v1427_v4  ;;  %v1298_v52 = vsel %vm1287_vm0, %v1274_v15, %v1275_v60  ;;  %2644 = vmatmul.mubr.bf16.gmra.mrb[176].mxu0 %v4968_v40  ;;  %4030 = vmatmul.mubr.bf16.gmra.mrb[144].mxu1 %v4935_v48  ;;  %v1485_v2 = vsel %vm745_vm3, %v1454_v20, 0.0 }
 0x2ae   : > { %v1397_v57 = vadd.f32 %v1298_v52, %v1036_v16  ;;  %v1452_v22 = vsel %vm1439_vm2, %v1425_v51, %v1426_v41  ;;  %v1453_v7 = vsel %vm1439_vm2, %v1424_v9, %v1425_v51  ;;  %4033 = vmatprep.mubr.bf16.mxu1 %v4946_v1  ;;  %2653 = vmatprep.mubr.bf16.mxu0 %v6342_v26 }
 0x2af   : > { %v5252_v11 = vadd.f32 %v1485_v2, %v1393_v55  ;;  %v5254_v15 = vadd.f32 %v1453_v7, %v1394_v24  ;;  %v1487_v48 = vsel %vm745_vm3, %v1452_v22, 0.0  ;;  %v5258_v42 = vadd.f32 %v1451_v62, %v1396_v17 }
 0x2b0   : > { %v1040_v16 = vpop.f32.mrb[40].mxu1  ;;  %v5260_v50 = vadd.f32 %v1487_v48, %v1395_v10 }
 0x2b1   : > { %v1276_v41 = vrot.slane %v1040_v16, 7  ;;  %v1042_v27 = vpop.f32.mrb[41].mxu1 }
 0x2b2   : > { %v1044_v20 = vpop.f32.mrb[42].mxu1 }
 0x2b3   : > { %v1297_v1 = vsel %vm1287_vm0, %v1275_v60, %v1276_v41  ;;  %v1277_v9 = vrot.slane %v1044_v20, 7  ;;  %v1046_v51 = vpop.f32.mrb[43].mxu1 }
 0x2b4   : > { %v1338_v55 = vsel %vm742_vm1, %v1297_v1, 0.0 }
 0x2b5   : > { %v1398_v24 = vadd.f32 %v1338_v55, %v1042_v27  ;;  %v1296_v52 = vsel %vm1287_vm0, %v1276_v41, %v1277_v9  ;;  %2654 = vmatmul.mubr.bf16.gmra.mrb[180].mxu0 %v4980_v6  ;;  %4034 = vmatmul.mubr.bf16.gmra.mrb[148].mxu1 %v4957_v18  ;;  %v4299_v27 = vld [vmem:[#allocation8] sm:$0xff]  }
 0x2b6   : > { %v1399_v10 = vadd.f32 %v1296_v52, %v1046_v51  ;;  %4037 = vmatprep.mubr.bf16.mxu1 %v4968_v40  ;;  %2663 = vmatprep.mubr.bf16.mxu0 %v6342_v26 }
 0x2b7   : > { %4045 = vmatprep.subr.bf16.mxu1 %v4299_v27 }
 0x2b8   : > { %v1050_v17 = vpop.f32.mrb[44].mxu1  ;;  %v3939_v60 = vpop.f32.mrb[84].mxu0  ;;  %4046 = vmatpush3.bf16.msra.mxu1 %v4299_v27 }
 0x2b9   : > { %v1278_v62 = vrot.slane %v1050_v17, 7  ;;  %v1052_v2 = vpop.f32.mrb[45].mxu1  ;;  %v1210_v22 = vpop.f32.mrb[85].mxu0  ;;  %v1430_v41 = vrot.slane %v3939_v60, 1 }
 0x2ba   : > { %v1428_v7 = vrot.slane %v1210_v22, 1  ;;  %v1054_v48 = vpop.f32.mrb[46].mxu1  ;;  %v5272_v16 = vpop.f32.mrb[86].mxu0 }
 0x2bb   : > { %v1295_v20 = vsel %vm1287_vm0, %v1277_v9, %v1278_v62  ;;  %v1279_v18 = vrot.slane %v1054_v48, 7  ;;  %v1431_v1 = vrot.slane %v5272_v16, 1  ;;  %v1056_v40 = vpop.f32.mrb[47].mxu1  ;;  %v1213_v51 = vpop.f32.mrb[87].mxu0 }
 0x2bc   : > { %v1340_v55 = vsel %vm742_vm1, %v1295_v20, 0.0  ;;  %v1450_v52 = vsel %vm1439_vm2, %v1427_v4, %v1428_v7  ;;  %v1429_v17 = vrot.slane %v1213_v51, 1 }
 0x2bd   : > { %v1400_v22 = vadd.f32 %v1340_v55, %v1052_v2  ;;  %v1447_v60 = vsel %vm1439_vm2, %v1430_v41, %v1431_v1  ;;  %v1294_v9 = vsel %vm1287_vm0, %v1278_v62, %v1279_v18  ;;  %2664 = vmatmul.mubr.bf16.gmra.mrb[184].mxu0 %v4995_v31  ;;  %4038 = vmatmul.mubr.bf16.gmra.mrb[152].mxu1 %v4980_v6  ;;  %v1489_v48 = vsel %vm745_vm3, %v1450_v52, 0.0 }
 0x2be   : > { %v1401_v16 = vadd.f32 %v1294_v9, %v1056_v40  ;;  %v1448_v4 = vsel %vm1439_vm2, %v1429_v17, %v1430_v41  ;;  %v1449_v2 = vsel %vm1439_vm2, %v1428_v7, %v1429_v17  ;;  %4041 = vmatprep.mubr.bf16.mxu1 %v4995_v31  ;;  %2673 = vmatprep.mubr.bf16.mxu0 %v6342_v26  ;;  %v4300_v17 = vld [vmem:[#allocation8 + $0x8] sm:$0xff]  }
 0x2bf   : > { %v5295_v20 = vadd.f32 %v1489_v48, %v1397_v57  ;;  %v5297_v62 = vadd.f32 %v1449_v2, %v1398_v24  ;;  %v1491_v6 = vsel %vm745_vm3, %v1448_v4, 0.0  ;;  %v5301_v51 = vadd.f32 %v1447_v60, %v1400_v22  ;;  %4047 = vmatprep.subr.bf16.mxu1 %v4300_v17 }
 0x2c0   : > { %v1060_v40 = vpop.f32.mrb[48].mxu1  ;;  %v5303_v55 = vadd.f32 %v1491_v6, %v1399_v10  ;;  %4048 = vmatpush3.bf16.msra.mxu1 %v4300_v17 }
 0x2c1   : > { %v1280_v41 = vrot.slane %v1060_v40, 7  ;;  %v1062_v52 = vpop.f32.mrb[49].mxu1 }
 0x2c2   : > { %v1064_v7 = vpop.f32.mrb[50].mxu1 }
 0x2c3   : > { %v1293_v31 = vsel %vm1287_vm0, %v1279_v18, %v1280_v41  ;;  %v1281_v26 = vrot.slane %v1064_v7, 7  ;;  %v1066_v57 = vpop.f32.mrb[51].mxu1  ;;  %v4301_v7 = vld [vmem:[#allocation8 + $0x10] sm:$0xff]  }
 0x2c4   : > { %v1342_v24 = vsel %vm742_vm1, %v1293_v31, 0.0  ;;  %4049 = vmatprep.subr.bf16.mxu1 %v4301_v7 }
 0x2c5   : > { %v1402_v27 = vadd.f32 %v1342_v24, %v1062_v52  ;;  %v1292_v22 = vsel %vm1287_vm0, %v1280_v41, %v1281_v26  ;;  %2674 = vmatmul.mubr.bf16.gmra.mrb[188].mxu0 %v5007_v21  ;;  %4042 = vmatmul.mubr.bf16.gmra.mrb[156].mxu1 %v5007_v21 }
 0x2c6   : > { %v1403_v10 = vadd.f32 %v1292_v22, %v1066_v57  ;;  %4050 = vmatpush3.bf16.msra.mxu1 %v4301_v7 }
 0x2c8   : > { %v1070_v60 = vpop.f32.mrb[52].mxu1  ;;  %v3943_v9 = vpop.f32.mrb[88].mxu0 }
 0x2c9   : > { %v1282_v48 = vrot.slane %v1070_v60, 7  ;;  %v1072_v18 = vpop.f32.mrb[53].mxu1  ;;  %v1226_v4 = vpop.f32.mrb[89].mxu0  ;;  %v1434_v31 = vrot.slane %v3943_v9, 1 }
 0x2ca   : > { %v1432_v2 = vrot.slane %v1226_v4, 1  ;;  %v1074_v6 = vpop.f32.mrb[54].mxu1  ;;  %v3944_v40 = vpop.f32.mrb[90].mxu0 }
 0x2cb   : > { %v1291_v52 = vsel %vm1287_vm0, %v1281_v26, %v1282_v48  ;;  %v1283_v41 = vrot.slane %v1074_v6, 7  ;;  %v1435_v24 = vrot.slane %v3944_v40, 1  ;;  %v1076_v58 = vpop.f32.mrb[55].mxu1  ;;  %v1229_v5 = vpop.f32.mrb[91].mxu0 }
 0x2cc   : > { %v1344_v21 = vsel %vm742_vm1, %v1291_v52, 0.0  ;;  %v1446_v17 = vsel %vm1439_vm2, %v1431_v1, %v1432_v2  ;;  %v1433_v57 = vrot.slane %v1229_v5, 1 }
 0x2cd   : > { %v1404_v22 = vadd.f32 %v1344_v21, %v1072_v18  ;;  %v1443_v60 = vsel %vm1439_vm2, %v1434_v31, %v1435_v24  ;;  %v1290_v9 = vsel %vm1287_vm0, %v1282_v48, %v1283_v41  ;;  %v1493_v26 = vsel %vm745_vm3, %v1446_v17, 0.0 }
 0x2ce   : > { %v1405_v4 = vadd.f32 %v1290_v9, %v1076_v58  ;;  %v1444_v6 = vsel %vm1439_vm2, %v1433_v57, %v1434_v31  ;;  %v1445_v1 = vsel %vm1439_vm2, %v1432_v2, %v1433_v57  ;;  %v5329_v5 = vadd.f32 %v1493_v26, %v1401_v16  ;;  %v4302_v9 = vld [vmem:[#allocation8 + $0x18] sm:$0xff]  }
 0x2cf   : > { %v5331_v18 = vadd.f32 %v1445_v1, %v1402_v27  ;;  %v1495_v40 = vsel %vm745_vm3, %v1444_v6, 0.0  ;;  %v5335_v52 = vadd.f32 %v1443_v60, %v1404_v22  ;;  %4051 = vmatprep.subr.bf16.mxu1 %v4302_v9 }
 0x2d0   : > { %v1080_v48 = vpop.f32.mrb[56].mxu1  ;;  %v5337_v21 = vadd.f32 %v1495_v40, %v1403_v10  ;;  %4052 = vmatpush3.bf16.msra.mxu1 %v4302_v9 }
 0x2d1   : > { %v1284_v7 = vrot.slane %v1080_v48, 7  ;;  %v1082_v58 = vpop.f32.mrb[57].mxu1 }
 0x2d2   : > { %v1084_v17 = vpop.f32.mrb[58].mxu1 }
 0x2d3   : > { %v1289_v31 = vsel %vm1287_vm0, %v1283_v41, %v1284_v7  ;;  %v1285_v2 = vrot.slane %v1084_v17, 7  ;;  %v1086_v16 = vpop.f32.mrb[59].mxu1  ;;  %v4303_v41 = vld [vmem:[#allocation8 + $0x20] sm:$0xff]  }
 0x2d4   : > { %v1346_v27 = vsel %vm742_vm1, %v1289_v31, 0.0  ;;  %4053 = vmatprep.subr.bf16.mxu1 %v4303_v41 }
 0x2d5   : > { %v1406_v57 = vadd.f32 %v1346_v27, %v1082_v58  ;;  %v1288_v22 = vsel %vm1287_vm0, %v1284_v7, %v1285_v2  ;;  %v6343_v7 = vrot.slane %v5058_v37, 7  ;;  %4054 = vmatpush3.bf16.msra.mxu1 %v4303_v41 }
 0x2d6   : > { %v1407_v10 = vadd.f32 %v1288_v22, %v1086_v16 }
 0x2d8   : > { %v1090_v60 = vpop.f32.mrb[60].mxu1  ;;  %v3947_v26 = vpop.f32.mrb[92].mxu0 }
 0x2d9   : > { %v1091_v6 = vpop.f32.mrb[61].mxu1  ;;  %v1242_v1 = vpop.f32.mrb[93].mxu0  ;;  %v1438_v44 = vrot.slane %v3947_v26, 1 }
 0x2da   : > { %v1436_v40 = vrot.slane %v1242_v1, 1  ;;  %v1092_v48 = vpop.f32.mrb[62].mxu1  ;;  %v3948_v28 = vpop.f32.mrb[94].mxu0 }
 0x2db   : > { %v1286_v17 = vrot.slane %v1092_v48, 7  ;;  %v1094_v49 = vpop.f32.mrb[63].mxu1  ;;  %v1245_v23 = vpop.f32.mrb[95].mxu0 }
 0x2dc   : > { %v1442_v58 = vsel %vm1439_vm2, %v1435_v24, %v1436_v40  ;;  %v1437_v31 = vrot.slane %v1245_v23, 1 }
 0x2dd   : > { %v1317_v9 = vsel %vm1287_vm0, %v1286_v17, %v6343_v7  ;;  %v1497_v2 = vsel %vm745_vm3, %v1442_v58, 0.0 }
 0x2de   : > { %v1318_v28 = vsel %vm742_vm1, %v1317_v9, 0.0  ;;  %v1440_v49 = vsel %vm1439_vm2, %v1437_v31, %v1438_v44  ;;  %v1441_v24 = vsel %vm1439_vm2, %v1436_v40, %v1437_v31  ;;  %v5359_v23 = vadd.f32 %v1497_v2, %v1405_v4 }
 0x2df   : > { %v1378_v37 = vadd.f32 %v1318_v28, %v5060_v3  ;;  %v5362_v16 = vadd.f32 %v1441_v24, %v1406_v57  ;;  %v1499_v27 = vsel %vm745_vm3, %v1440_v49, 0.0  ;;  %v4304_v49 = vld [vmem:[#allocation8 + $0x28] sm:$0xff]  }
 0x2e0   : > { %v5366_v22 = vpop.f32.mrb[64].mxu1  ;;  %v3967_v60 = vpop.f32.mrb[96].mxu0  ;;  %v5368_v26 = vadd.f32 %v1499_v27, %v1407_v10  ;;  %4055 = vmatprep.subr.bf16.mxu1 %v4304_v49 }
 0x2e1   : > { %6344 = vst [vmem:[#allocation48_spill] sm:$0xff] %v5362_v16  ;;  %6345 = vst [vmem:[#allocation49_spill] sm:$0xff] %v5366_v22  ;;  %v5370_v6 = vpop.f32.mrb[65].mxu1  ;;  %v5372_v44 = vpop.f32.mrb[97].mxu0  ;;  %v1500_v1 = vadd.f32 %v5092_v46, %v1378_v37  ;;  %v6286_v3 = vrot.slane %v5366_v22, 7  ;;  %v2207_v57 = vrot.slane %v3967_v60, 1  ;;  %4056 = vmatpush3.bf16.msra.mxu1 %v4304_v49 }
 0x2e2   : > { %6346 = vst [vmem:[#allocation50_spill] sm:$0xff] %v5368_v26  ;;  %6347 = vst [vmem:[#allocation51_spill] sm:$0xff] %v5370_v6  ;;  %v1729_v4 = vpop.f32.mrb[66].mxu1  ;;  %v3968_v40 = vpop.f32.mrb[98].mxu0  ;;  %v6287_v31 = vrot.slane %v5372_v44, 1 }
 0x2e3   : > { %v2046_v48 = vrot.slane %v1729_v4, 7  ;;  %v2208_v41 = vrot.slane %v3968_v40, 1  ;;  %v1731_v17 = vpop.f32.mrb[67].mxu1  ;;  %v1921_v58 = vpop.f32.mrb[99].mxu0  ;;  %v4305_v4 = vld [vmem:[#allocation8 + $0x30] sm:$0xff]  }
 0x2e4   : > { %v2206_v7 = vrot.slane %v1921_v58, 1  ;;  %4057 = vmatprep.subr.bf16.mxu1 %v4305_v4 }
 0x2e5   : > { %v2107_v10 = vsel %vm1287_vm0, %v6286_v3, %v2046_v48  ;;  %v2265_v46 = vsel %vm1439_vm2, %v2207_v57, %v2208_v41  ;;  %4058 = vmatpush3.bf16.msra.mxu1 %v4305_v4 }
 0x2e6   : > { %v2174_v9 = vadd.f32 %v2107_v10, %v1731_v17  ;;  %v2266_v2 = vsel %vm1439_vm2, %v2206_v7, %v2207_v57  ;;  %v5389_v28 = vsel %vm1439_vm2, %v6287_v31, %v2206_v7 }
 0x2e7   : > { %6348 = vst [vmem:[#allocation52_spill] sm:$0xff] %v5389_v28  ;;  %v2270_v24 = vsel %vm745_vm3, %v2266_v2, 0.0 }
 0x2e8   : > { %v1735_v37 = vpop.f32.mrb[68].mxu1  ;;  %v3971_v27 = vpop.f32.mrb[100].mxu0  ;;  %v5393_v60 = vadd.f32 %v2270_v24, %v2174_v9 }
 0x2e9   : > { %v2047_v40 = vrot.slane %v1735_v37, 7  ;;  %v1737_v17 = vpop.f32.mrb[69].mxu1  ;;  %v1934_v58 = vpop.f32.mrb[101].mxu0  ;;  %v2211_v7 = vrot.slane %v3971_v27, 1 }
 0x2ea   : > { %v2209_v57 = vrot.slane %v1934_v58, 1  ;;  %v1739_v10 = vpop.f32.mrb[70].mxu1  ;;  %v3972_v3 = vpop.f32.mrb[102].mxu0 }
 0x2eb   : > { %v2106_v31 = vsel %vm1287_vm0, %v2046_v48, %v2047_v40  ;;  %v2048_v61 = vrot.slane %v1739_v10, 7  ;;  %v2212_v2 = vrot.slane %v3972_v3, 1  ;;  %v1741_v13 = vpop.f32.mrb[71].mxu1  ;;  %v1937_v56 = vpop.f32.mrb[103].mxu0 }
 0x2ec   : > { %v2111_v9 = vsel %vm742_vm1, %v2106_v31, 0.0  ;;  %v2264_v24 = vsel %vm1439_vm2, %v2208_v41, %v2209_v57  ;;  %v2210_v37 = vrot.slane %v1937_v56, 1 }
 0x2ed   : > { %v2143_v49 = vadd.f32 %v2111_v9, %v1500_v1  ;;  %v2105_v58 = vsel %vm1287_vm0, %v2047_v40, %v2048_v61  ;;  %v5405_v27 = vsel %vm1439_vm2, %v2211_v7, %v2212_v2  ;;  %v2272_v40 = vsel %vm745_vm3, %v2264_v24, 0.0 }
 0x2ee   : > { %v2144_v3 = vadd.f32 %v2105_v58, %v5100_v14  ;;  %v2263_v48 = vsel %vm1439_vm2, %v2209_v57, %v2210_v37  ;;  %v2262_v31 = vsel %vm1439_vm2, %v2210_v37, %v2211_v7 }
 0x2ef   : > { %v2175_v10 = vadd.f32 %v2143_v49, %v1737_v17  ;;  %v4306_v49 = vld [vmem:[#allocation8 + $0x38] sm:$0xff]  }
 0x2f0   : > { %v2176_v41 = vadd.f32 %v2144_v3, %v1741_v13  ;;  %v1745_v56 = vpop.f32.mrb[72].mxu1  ;;  %v3975_v1 = vpop.f32.mrb[104].mxu0  ;;  %4059 = vmatprep.subr.bf16.mxu1 %v4306_v49 }
 0x2f1   : > { %v5412_v9 = vadd.f32 %v2265_v46, %v2175_v10  ;;  %v2049_v8 = vrot.slane %v1745_v56, 7  ;;  %v1747_v36 = vpop.f32.mrb[73].mxu1  ;;  %v1950_v4 = vpop.f32.mrb[105].mxu0  ;;  %v2215_v33 = vrot.slane %v3975_v1, 1  ;;  %4060 = vmatpush3.bf16.msra.mxu1 %v4306_v49 }
 0x2f2   : > { %v5416_v47 = vadd.f32 %v2272_v40, %v2176_v41  ;;  %v2213_v14 = vrot.slane %v1950_v4, 1  ;;  %v1749_v58 = vpop.f32.mrb[74].mxu1  ;;  %v3976_v57 = vpop.f32.mrb[106].mxu0 }
 0x2f3   : > { %v2104_v17 = vsel %vm1287_vm0, %v2048_v61, %v2049_v8  ;;  %v2050_v13 = vrot.slane %v1749_v58, 7  ;;  %v2216_v7 = vrot.slane %v3976_v57, 1  ;;  %v1751_v37 = vpop.f32.mrb[75].mxu1  ;;  %v1953_v46 = vpop.f32.mrb[107].mxu0 }
 0x2f4   : > { %v2113_v24 = vsel %vm742_vm1, %v2104_v17, 0.0  ;;  %v2214_v3 = vrot.slane %v1953_v46, 1  ;;  %v2260_v10 = vsel %vm1439_vm2, %v2212_v2, %v2213_v14  ;;  %v2274_v17 = vsel %vm745_vm3, %v2262_v31, 0.0 }
 0x2f5   : > { %v2145_v41 = vadd.f32 %v2113_v24, %v5098_v59  ;;  %v2103_v56 = vsel %vm1287_vm0, %v2049_v8, %v2050_v13  ;;  %v5429_v61 = vsel %vm1439_vm2, %v2215_v33, %v2216_v7 }
 0x2f6   : > { %v2146_v1 = vadd.f32 %v2103_v56, %v5132_v25  ;;  %v5434_v40 = vsel %vm1439_vm2, %v2213_v14, %v2214_v3  ;;  %v5438_v4 = vsel %vm1439_vm2, %v2214_v3, %v2215_v33 }
 0x2f7   : > { %v2177_v59 = vadd.f32 %v2145_v41, %v1747_v36 }
 0x2f8   : > { %v2178_v2 = vadd.f32 %v2146_v1, %v1751_v37  ;;  %v1755_v58 = vpop.f32.mrb[76].mxu1  ;;  %v3979_v8 = vpop.f32.mrb[108].mxu0 }
 0x2f9   : > { %v5440_v57 = vadd.f32 %v2263_v48, %v2177_v59  ;;  %v2051_v46 = vrot.slane %v1755_v58, 7  ;;  %v1757_v25 = vpop.f32.mrb[77].mxu1  ;;  %v1966_v24 = vpop.f32.mrb[109].mxu0  ;;  %v2219_v33 = vrot.slane %v3979_v8, 1 }
 0x2fa   : > { %v5444_v56 = vadd.f32 %v2274_v17, %v2178_v2  ;;  %v2217_v14 = vrot.slane %v1966_v24, 1  ;;  %v1759_v43 = vpop.f32.mrb[78].mxu1  ;;  %v3980_v12 = vpop.f32.mrb[110].mxu0  ;;  %v2276_v24 = vsel %vm745_vm3, %v2260_v10, 0.0 }
 0x2fb   : > { %v2102_v36 = vsel %vm1287_vm0, %v2050_v13, %v2051_v46  ;;  %v2052_v37 = vrot.slane %v1759_v43, 7  ;;  %v2220_v49 = vrot.slane %v3980_v12, 1  ;;  %v1761_v3 = vpop.f32.mrb[79].mxu1  ;;  %v1969_v48 = vpop.f32.mrb[111].mxu0 }
 0x2fc   : > { %v2115_v41 = vsel %vm742_vm1, %v2102_v36, 0.0  ;;  %v2218_v31 = vrot.slane %v1969_v48, 1  ;;  %v5452_v1 = vsel %vm1439_vm2, %v2216_v7, %v2217_v14 }
 0x2fd   : > { %v2147_v59 = vadd.f32 %v2115_v41, %v5134_v35  ;;  %v2101_v2 = vsel %vm1287_vm0, %v2051_v46, %v2052_v37  ;;  %v5459_v13 = vsel %vm1439_vm2, %v2219_v33, %v2220_v49 }
 0x2fe   : > { %v2148_v43 = vadd.f32 %v2101_v2, %v5140_v38  ;;  %v5464_v12 = vsel %vm1439_vm2, %v2217_v14, %v2218_v31  ;;  %v5468_v58 = vsel %vm1439_vm2, %v2218_v31, %v2219_v33 }
 0x2ff   : > { %v2179_v7 = vadd.f32 %v2147_v59, %v1757_v25 }
 0x300   : > { %v2180_v8 = vadd.f32 %v2148_v43, %v1761_v3  ;;  %v1765_v35 = vpop.f32.mrb[80].mxu1  ;;  %v3983_v17 = vpop.f32.mrb[112].mxu0 }
 0x301   : > { %v5471_v46 = vadd.f32 %v5405_v27, %v2179_v7  ;;  %v2053_v36 = vrot.slane %v1765_v35, 7  ;;  %v1767_v38 = vpop.f32.mrb[81].mxu1  ;;  %v1982_v48 = vpop.f32.mrb[113].mxu0  ;;  %v2223_v33 = vrot.slane %v3983_v17, 1 }
 0x302   : > { %v5475_v41 = vadd.f32 %v2276_v24, %v2180_v8  ;;  %v2221_v14 = vrot.slane %v1982_v48, 1  ;;  %v1769_v2 = vpop.f32.mrb[82].mxu1  ;;  %v3984_v28 = vpop.f32.mrb[114].mxu0 }
 0x303   : > { %v2100_v25 = vsel %vm1287_vm0, %v2052_v37, %v2053_v36  ;;  %v2054_v3 = vrot.slane %v1769_v2, 7  ;;  %v2224_v31 = vrot.slane %v3984_v28, 1  ;;  %v1771_v59 = vpop.f32.mrb[83].mxu1  ;;  %v1985_v27 = vpop.f32.mrb[115].mxu0 }
 0x304   : > { %v2117_v43 = vsel %vm742_vm1, %v2100_v25, 0.0  ;;  %v2222_v10 = vrot.slane %v1985_v27, 1  ;;  %v5483_v7 = vsel %vm1439_vm2, %v2220_v49, %v2221_v14  ;;  %v2278_v25 = vsel %vm745_vm3, %v5438_v4, 0.0 }
 0x305   : > { %v2149_v8 = vadd.f32 %v2117_v43, %v5138_v39  ;;  %v2099_v35 = vsel %vm1287_vm0, %v2053_v36, %v2054_v3  ;;  %v5490_v37 = vsel %vm1439_vm2, %v2223_v33, %v2224_v31 }
 0x306   : > { %v2150_v28 = vadd.f32 %v2099_v35, %v5172_v53  ;;  %v5495_v17 = vsel %vm1439_vm2, %v2221_v14, %v2222_v10  ;;  %v5499_v24 = vsel %vm1439_vm2, %v2222_v10, %v2223_v33 }
 0x307   : > { %v2181_v49 = vadd.f32 %v2149_v8, %v1767_v38 }
 0x308   : > { %v2182_v48 = vadd.f32 %v2150_v28, %v1771_v59  ;;  %v1775_v39 = vpop.f32.mrb[84].mxu1  ;;  %v3987_v2 = vpop.f32.mrb[116].mxu0 }
 0x309   : > { %v5502_v36 = vadd.f32 %v5434_v40, %v2181_v49  ;;  %v2055_v53 = vrot.slane %v1775_v39, 7  ;;  %v1777_v27 = vpop.f32.mrb[85].mxu1  ;;  %v1998_v43 = vpop.f32.mrb[117].mxu0  ;;  %v2227_v10 = vrot.slane %v3987_v2, 1 }
 0x30a   : > { %v5507_v14 = vadd.f32 %v2278_v25, %v2182_v48  ;;  %v2225_v35 = vrot.slane %v1998_v43, 1  ;;  %v1779_v6 = vpop.f32.mrb[86].mxu1  ;;  %v3988_v33 = vpop.f32.mrb[118].mxu0 }
 0x30b   : > { %v2098_v38 = vsel %vm1287_vm0, %v2054_v3, %v2055_v53  ;;  %v2056_v59 = vrot.slane %v1779_v6, 7  ;;  %v2228_v8 = vrot.slane %v3988_v33, 1  ;;  %v1781_v40 = vpop.f32.mrb[87].mxu1  ;;  %v2001_v28 = vpop.f32.mrb[119].mxu0 }
 0x30c   : > { %v2119_v49 = vsel %vm742_vm1, %v2098_v38, 0.0  ;;  %v2226_v4 = vrot.slane %v2001_v28, 1  ;;  %v5515_v39 = vsel %vm1439_vm2, %v2224_v31, %v2225_v35  ;;  %v2280_v28 = vsel %vm745_vm3, %v5452_v1, 0.0 }
 0x30d   : > { %v2151_v48 = vadd.f32 %v2119_v49, %v5174_v63  ;;  %v2097_v2 = vsel %vm1287_vm0, %v2055_v53, %v2056_v59  ;;  %v5522_v3 = vsel %vm1439_vm2, %v2227_v10, %v2228_v8 }
 0x30e   : > { %v2152_v6 = vadd.f32 %v2097_v2, %v5180_v30  ;;  %v5527_v25 = vsel %vm1439_vm2, %v2225_v35, %v2226_v4  ;;  %v5531_v43 = vsel %vm1439_vm2, %v2226_v4, %v2227_v10 }
 0x30f   : > { %v2183_v31 = vadd.f32 %v2151_v48, %v1777_v27 }
 0x310   : > { %v2184_v33 = vadd.f32 %v2152_v6, %v1781_v40  ;;  %v1785_v63 = vpop.f32.mrb[88].mxu1  ;;  %v3991_v38 = vpop.f32.mrb[120].mxu0 }
 0x311   : > { %v5534_v53 = vadd.f32 %v5429_v61, %v2183_v31  ;;  %v2057_v30 = vrot.slane %v1785_v63, 7  ;;  %v1787_v49 = vpop.f32.mrb[89].mxu1  ;;  %v2014_v2 = vpop.f32.mrb[121].mxu0  ;;  %v2231_v4 = vrot.slane %v3991_v38, 1 }
 0x312   : > { %v5539_v35 = vadd.f32 %v2280_v28, %v2184_v33  ;;  %v2229_v26 = vrot.slane %v2014_v2, 1  ;;  %v1789_v22 = vpop.f32.mrb[90].mxu1  ;;  %v3992_v10 = vpop.f32.mrb[122].mxu0 }
 0x313   : > { %v2096_v27 = vsel %vm1287_vm0, %v2056_v59, %v2057_v30  ;;  %v2058_v40 = vrot.slane %v1789_v22, 7  ;;  %v2232_v48 = vrot.slane %v3992_v10, 1  ;;  %v1791_v61 = vpop.f32.mrb[91].mxu1  ;;  %v2017_v6 = vpop.f32.mrb[123].mxu0 }
 0x314   : > { %6349 = vst [vmem:[#allocation53_spill] sm:$0xff] %v5539_v35  ;;  %v2121_v31 = vsel %vm742_vm1, %v2096_v27, 0.0  ;;  %v2230_v1 = vrot.slane %v2017_v6, 1  ;;  %v5547_v63 = vsel %vm1439_vm2, %v2228_v8, %v2229_v26  ;;  %v2282_v6 = vsel %vm745_vm3, %v5468_v58, 0.0 }
 0x315   : > { %v2153_v33 = vadd.f32 %v2121_v31, %v5178_v34  ;;  %v2095_v38 = vsel %vm1287_vm0, %v2057_v30, %v2058_v40  ;;  %v5554_v59 = vsel %vm1439_vm2, %v2231_v4, %v2232_v48 }
 0x316   : > { %v2154_v22 = vadd.f32 %v2095_v38, %v5212_v45  ;;  %v5559_v28 = vsel %vm1439_vm2, %v2229_v26, %v2230_v1  ;;  %v5563_v2 = vsel %vm1439_vm2, %v2230_v1, %v2231_v4 }
 0x317   : > { %v2185_v8 = vadd.f32 %v2153_v33, %v1787_v49 }
 0x318   : > { %v2186_v10 = vadd.f32 %v2154_v22, %v1791_v61  ;;  %v1795_v34 = vpop.f32.mrb[92].mxu1  ;;  %v3995_v27 = vpop.f32.mrb[124].mxu0 }
 0x319   : > { %v5566_v30 = vadd.f32 %v5464_v12, %v2185_v8  ;;  %v2059_v45 = vrot.slane %v1795_v34, 7  ;;  %v1797_v31 = vpop.f32.mrb[93].mxu1  ;;  %v2030_v38 = vpop.f32.mrb[125].mxu0  ;;  %v2235_v1 = vrot.slane %v3995_v27, 1 }
 0x31a   : > { %v5571_v26 = vadd.f32 %v2282_v6, %v2186_v10  ;;  %v2233_v16 = vrot.slane %v2030_v38, 1  ;;  %v1799_v35 = vpop.f32.mrb[94].mxu1  ;;  %v3996_v4 = vpop.f32.mrb[126].mxu0 }
 0x31b   : > { %v2094_v49 = vsel %vm1287_vm0, %v2058_v40, %v2059_v45  ;;  %v2060_v61 = vrot.slane %v1799_v35, 7  ;;  %v2236_v33 = vrot.slane %v3996_v4, 1  ;;  %v1801_v12 = vpop.f32.mrb[95].mxu1  ;;  %v2033_v22 = vpop.f32.mrb[127].mxu0 }
 0x31c   : > { %v2123_v8 = vsel %vm742_vm1, %v2094_v49, 0.0  ;;  %v2234_v58 = vrot.slane %v2033_v22, 1  ;;  %v5579_v34 = vsel %vm1439_vm2, %v2232_v48, %v2233_v16  ;;  %v6351_v48 = vrot.slane %v5372_v44, 1 }
 0x31d   : > { %v2155_v10 = vadd.f32 %v2123_v8, %v5214_v0  ;;  %v2093_v27 = vsel %vm1287_vm0, %v2059_v45, %v2060_v61  ;;  %v5586_v40 = vsel %vm1439_vm2, %v2235_v1, %v2236_v33 }
 0x31e   : > { %6350 = vst [vmem:[#allocation54_spill] sm:$0xff] %v5586_v40  ;;  %v2156_v35 = vadd.f32 %v2093_v27, %v5220_v19  ;;  %v5591_v6 = vsel %vm1439_vm2, %v2233_v16, %v2234_v58  ;;  %v5595_v38 = vsel %vm1439_vm2, %v2234_v58, %v2235_v1  ;;  %v5601_v0 = vsel %vm1439_vm2, %v2236_v33, %v6351_v48 }
 0x31f   : > { %v2187_v45 = vadd.f32 %v2155_v10, %v1797_v31  ;;  %v2284_v16 = vsel %vm745_vm3, %v5483_v7, 0.0 }
 0x320   : > { %v2188_v4 = vadd.f32 %v2156_v35, %v1801_v12  ;;  %v1805_v49 = vpop.f32.mrb[96].mxu1  ;;  %v2528_v22 = vpop.f32.mrb[128].mxu0 }
 0x321   : > { %v5604_v19 = vadd.f32 %v5459_v13, %v2187_v45  ;;  %v2061_v8 = vrot.slane %v1805_v49, 7  ;;  %v1807_v1 = vpop.f32.mrb[97].mxu1  ;;  %v2529_v58 = vpop.f32.mrb[129].mxu0  ;;  %v2286_v49 = vsel %vm745_vm3, %v5499_v24, 0.0 }
 0x322   : > { %v5609_v27 = vadd.f32 %v2284_v16, %v2188_v4  ;;  %v1809_v44 = vpop.f32.mrb[98].mxu1  ;;  %v2530_v40 = vpop.f32.mrb[130].mxu0 }
 0x323   : > { %v2092_v31 = vsel %vm1287_vm0, %v2060_v61, %v2061_v8  ;;  %v2062_v33 = vrot.slane %v1809_v44, 7  ;;  %v1811_v12 = vpop.f32.mrb[99].mxu1  ;;  %v2532_v10 = vpop.f32.mrb[131].mxu0  ;;  %v2844_v58 = vrot.slane %v2530_v40, 7 }
 0x324   : > { %v2125_v13 = vsel %vm742_vm1, %v2092_v31, 0.0 }
 0x325   : > { %v2157_v35 = vadd.f32 %v2125_v13, %v5218_v32  ;;  %v2091_v7 = vsel %vm1287_vm0, %v2061_v8, %v2062_v33 }
 0x326   : > { %v2158_v48 = vadd.f32 %v2091_v7, %v5252_v11 }
 0x327   : > { %v2189_v45 = vadd.f32 %v2157_v35, %v1807_v1 }
 0x328   : > { %v2190_v4 = vadd.f32 %v2158_v48, %v1811_v12  ;;  %v1815_v61 = vpop.f32.mrb[100].mxu1  ;;  %v2535_v22 = vpop.f32.mrb[132].mxu0 }
 0x329   : > { %v5623_v16 = vadd.f32 %v5495_v17, %v2189_v45  ;;  %v2063_v44 = vrot.slane %v1815_v61, 7  ;;  %v2845_v31 = vrot.slane %v2535_v22, 7  ;;  %v1817_v32 = vpop.f32.mrb[101].mxu1  ;;  %v5625_v10 = vpop.f32.mrb[133].mxu0 }
 0x32a   : > { %v5627_v8 = vadd.f32 %v2286_v49, %v2190_v4  ;;  %v1819_v11 = vpop.f32.mrb[102].mxu1  ;;  %v2539_v1 = vpop.f32.mrb[134].mxu0 }
 0x32b   : > { %v5631_v12 = vsel %vm1287_vm0, %v2844_v58, %v2845_v31  ;;  %v2090_v24 = vsel %vm1287_vm0, %v2062_v33, %v2063_v44  ;;  %v2064_v13 = vrot.slane %v1819_v11, 7  ;;  %v2846_v17 = vrot.slane %v2539_v1, 7  ;;  %v1821_v35 = vpop.f32.mrb[103].mxu1  ;;  %v2541_v40 = vpop.f32.mrb[135].mxu0 }
 0x32c   : > { %6352 = vst [vmem:[#allocation55_spill] sm:$0xff] %v5627_v8  ;;  %v2127_v7 = vsel %vm742_vm1, %v2090_v24, 0.0 }
 0x32d   : > { %v2159_v48 = vadd.f32 %v2127_v7, %v5254_v15  ;;  %v2089_v45 = vsel %vm1287_vm0, %v2063_v44, %v2064_v13  ;;  %v2903_v4 = vsel %vm1287_vm0, %v2845_v31, %v2846_v17  ;;  %v2288_v15 = vsel %vm745_vm3, %v5515_v39, 0.0 }
 0x32e   : > { %v2160_v49 = vadd.f32 %v2089_v45, %v5260_v50  ;;  %v2936_v61 = vadd.f32 %v2903_v4, %v5393_v60 }
 0x32f   : > { %v2191_v33 = vadd.f32 %v2159_v48, %v1817_v32 }
 0x330   : > { %v2192_v22 = vadd.f32 %v2160_v49, %v1821_v35  ;;  %v5644_v58 = vadd.f32 %v2936_v61, %v2541_v40  ;;  %v1825_v11 = vpop.f32.mrb[104].mxu1  ;;  %v2545_v1 = vpop.f32.mrb[136].mxu0 }
 0x331   : > { %v5647_v24 = vadd.f32 %v5490_v37, %v2191_v33  ;;  %v2065_v44 = vrot.slane %v1825_v11, 7  ;;  %v2847_v7 = vrot.slane %v2545_v1, 7  ;;  %v1827_v31 = vpop.f32.mrb[105].mxu1  ;;  %v2547_v8 = vpop.f32.mrb[137].mxu0 }
 0x332   : > { %v5652_v50 = vadd.f32 %v2288_v15, %v2192_v22  ;;  %v1829_v60 = vpop.f32.mrb[106].mxu1  ;;  %v2549_v32 = vpop.f32.mrb[138].mxu0 }
 0x333   : > { %v2088_v35 = vsel %vm1287_vm0, %v2064_v13, %v2065_v44  ;;  %v2902_v40 = vsel %vm1287_vm0, %v2846_v17, %v2847_v7  ;;  %v2066_v37 = vrot.slane %v1829_v60, 7  ;;  %v2848_v48 = vrot.slane %v2549_v32, 7  ;;  %v1831_v45 = vpop.f32.mrb[107].mxu1  ;;  %v2551_v4 = vpop.f32.mrb[139].mxu0 }
 0x334   : > { %v2129_v39 = vsel %vm742_vm1, %v2088_v35, 0.0  ;;  %v2907_v49 = vsel %vm742_vm1, %v2902_v40, 0.0 }
 0x335   : > { %v2161_v61 = vadd.f32 %v2129_v39, %v5258_v42  ;;  %v2937_v33 = vadd.f32 %v2907_v49, %v5412_v9  ;;  %v2087_v13 = vsel %vm1287_vm0, %v2065_v44, %v2066_v37  ;;  %v2901_v17 = vsel %vm1287_vm0, %v2847_v7, %v2848_v48 }
 0x336   : > { %v2162_v22 = vadd.f32 %v2087_v13, %v5295_v20  ;;  %v2938_v11 = vadd.f32 %v2901_v17, %v5416_v47  ;;  %v2290_v44 = vsel %vm745_vm3, %v5531_v43, 0.0 }
 0x337   : > { %v2193_v1 = vadd.f32 %v2161_v61, %v1827_v31  ;;  %v5670_v15 = vadd.f32 %v2937_v33, %v2547_v8 }
 0x338   : > { %v2194_v60 = vadd.f32 %v2162_v22, %v1831_v45  ;;  %v5672_v32 = vadd.f32 %v2938_v11, %v2551_v4  ;;  %v1835_v35 = vpop.f32.mrb[108].mxu1  ;;  %v2555_v42 = vpop.f32.mrb[140].mxu0 }
 0x339   : > { %v5675_v9 = vadd.f32 %v5527_v25, %v2193_v1  ;;  %v2067_v7 = vrot.slane %v1835_v35, 7  ;;  %v2849_v40 = vrot.slane %v2555_v42, 7  ;;  %v1837_v20 = vpop.f32.mrb[109].mxu1  ;;  %v2557_v39 = vpop.f32.mrb[141].mxu0 }
 0x33a   : > { %v5680_v47 = vadd.f32 %v2290_v44, %v2194_v60  ;;  %v1839_v8 = vpop.f32.mrb[110].mxu1  ;;  %v2559_v31 = vpop.f32.mrb[142].mxu0 }
 0x33b   : > { %v2086_v45 = vsel %vm1287_vm0, %v2066_v37, %v2067_v7  ;;  %v2900_v4 = vsel %vm1287_vm0, %v2848_v48, %v2849_v40  ;;  %v2068_v25 = vrot.slane %v1839_v8, 7  ;;  %v2850_v49 = vrot.slane %v2559_v31, 7  ;;  %v1841_v61 = vpop.f32.mrb[111].mxu1  ;;  %v2561_v33 = vpop.f32.mrb[143].mxu0 }
 0x33c   : > { %v2131_v43 = vsel %vm742_vm1, %v2086_v45, 0.0  ;;  %v2909_v13 = vsel %vm742_vm1, %v2900_v4, 0.0 }
 0x33d   : > { %v2163_v17 = vadd.f32 %v2131_v43, %v5297_v62  ;;  %v2939_v22 = vadd.f32 %v2909_v13, %v5440_v57  ;;  %v2085_v37 = vsel %vm1287_vm0, %v2067_v7, %v2068_v25  ;;  %v2899_v48 = vsel %vm1287_vm0, %v2849_v40, %v2850_v49 }
 0x33e   : > { %v2164_v11 = vadd.f32 %v2085_v37, %v5303_v55  ;;  %v2940_v1 = vadd.f32 %v2899_v48, %v5444_v56  ;;  %v2292_v7 = vsel %vm745_vm3, %v5547_v63, 0.0 }
 0x33f   : > { %v2195_v60 = vadd.f32 %v2163_v17, %v1837_v20  ;;  %v5698_v35 = vadd.f32 %v2939_v22, %v2557_v39 }
 0x340   : > { %v2196_v42 = vadd.f32 %v2164_v11, %v1841_v61  ;;  %v5700_v44 = vadd.f32 %v2940_v1, %v2561_v33  ;;  %v1845_v8 = vpop.f32.mrb[112].mxu1  ;;  %v2565_v62 = vpop.f32.mrb[144].mxu0 }
 0x341   : > { %v5703_v57 = vadd.f32 %v5522_v3, %v2195_v60  ;;  %v2069_v40 = vrot.slane %v1845_v8, 7  ;;  %v2851_v31 = vrot.slane %v2565_v62, 7  ;;  %v1847_v55 = vpop.f32.mrb[113].mxu1  ;;  %v2567_v45 = vpop.f32.mrb[145].mxu0 }
 0x342   : > { %v5708_v56 = vadd.f32 %v2292_v7, %v2196_v42  ;;  %v1849_v20 = vpop.f32.mrb[114].mxu1  ;;  %v2569_v39 = vpop.f32.mrb[146].mxu0  ;;  %v2294_v7 = vsel %vm745_vm3, %v5563_v2, 0.0 }
 0x343   : > { %v2084_v4 = vsel %vm1287_vm0, %v2068_v25, %v2069_v40  ;;  %v2898_v61 = vsel %vm1287_vm0, %v2850_v49, %v2851_v31  ;;  %v2070_v3 = vrot.slane %v1849_v20, 7  ;;  %v2852_v33 = vrot.slane %v2569_v39, 7  ;;  %v1851_v43 = vpop.f32.mrb[115].mxu1  ;;  %v2571_v13 = vpop.f32.mrb[147].mxu0 }
 0x344   : > { %v2133_v63 = vsel %vm742_vm1, %v2084_v4, 0.0  ;;  %v2911_v17 = vsel %vm742_vm1, %v2898_v61, 0.0 }
 0x345   : > { %v2165_v22 = vadd.f32 %v2133_v63, %v5301_v51  ;;  %v2941_v37 = vadd.f32 %v2911_v17, %v5471_v46  ;;  %v2083_v25 = vsel %vm1287_vm0, %v2069_v40, %v2070_v3  ;;  %v2897_v49 = vsel %vm1287_vm0, %v2851_v31, %v2852_v33 }
 0x346   : > { %v2166_v48 = vadd.f32 %v2083_v25, %v5329_v5  ;;  %v2942_v11 = vadd.f32 %v2897_v49, %v5475_v41 }
 0x347   : > { %v2197_v1 = vadd.f32 %v2165_v22, %v1847_v55  ;;  %v5726_v60 = vadd.f32 %v2941_v37, %v2567_v45 }
 0x348   : > { %v2198_v42 = vadd.f32 %v2166_v48, %v1851_v43  ;;  %v5728_v8 = vadd.f32 %v2942_v11, %v2571_v13  ;;  %v1855_v62 = vpop.f32.mrb[116].mxu1  ;;  %v2575_v51 = vpop.f32.mrb[148].mxu0 }
 0x349   : > { %v5731_v46 = vadd.f32 %v5559_v28, %v2197_v1  ;;  %v2071_v40 = vrot.slane %v1855_v62, 7  ;;  %v2853_v31 = vrot.slane %v2575_v51, 7  ;;  %v1857_v5 = vpop.f32.mrb[117].mxu1  ;;  %v2577_v20 = vpop.f32.mrb[149].mxu0  ;;  %v2296_v62 = vsel %vm745_vm3, %v5579_v34, 0.0 }
 0x34a   : > { %v5736_v41 = vadd.f32 %v2294_v7, %v2198_v42  ;;  %v1859_v55 = vpop.f32.mrb[118].mxu1  ;;  %v2579_v45 = vpop.f32.mrb[150].mxu0 }
 0x34b   : > { %v2082_v39 = vsel %vm1287_vm0, %v2070_v3, %v2071_v40  ;;  %v2896_v4 = vsel %vm1287_vm0, %v2852_v33, %v2853_v31  ;;  %v2072_v28 = vrot.slane %v1859_v55, 7  ;;  %v2854_v61 = vrot.slane %v2579_v45, 7  ;;  %v1861_v43 = vpop.f32.mrb[119].mxu1  ;;  %v2581_v13 = vpop.f32.mrb[151].mxu0 }
 0x34c   : > { %v2135_v2 = vsel %vm742_vm1, %v2082_v39, 0.0  ;;  %v2913_v63 = vsel %vm742_vm1, %v2896_v4, 0.0 }
 0x34d   : > { %v2167_v17 = vadd.f32 %v2135_v2, %v5331_v18  ;;  %v2943_v22 = vadd.f32 %v2913_v63, %v5502_v36  ;;  %v2081_v3 = vsel %vm1287_vm0, %v2071_v40, %v2072_v28  ;;  %v2895_v33 = vsel %vm1287_vm0, %v2853_v31, %v2854_v61 }
 0x34e   : > { %v2168_v37 = vadd.f32 %v2081_v3, %v5337_v21  ;;  %v2944_v25 = vadd.f32 %v2895_v33, %v5507_v14 }
 0x34f   : > { %v2199_v49 = vadd.f32 %v2167_v17, %v1857_v5  ;;  %v5754_v48 = vadd.f32 %v2943_v22, %v2577_v20  ;;  %v6353_v17 = vld [vmem:[#allocation53_spill] sm:$0xff] }
 0x350   : > { %v2200_v11 = vadd.f32 %v2168_v37, %v1861_v43  ;;  %v5756_v1 = vadd.f32 %v2944_v25, %v2581_v13  ;;  %v1865_v42 = vpop.f32.mrb[120].mxu1  ;;  %v2585_v18 = vpop.f32.mrb[152].mxu0 }
 0x351   : > { %v5759_v36 = vadd.f32 %v5554_v59, %v2199_v49  ;;  %v2073_v51 = vrot.slane %v1865_v42, 7  ;;  %v2855_v7 = vrot.slane %v2585_v18, 7  ;;  %v1867_v21 = vpop.f32.mrb[121].mxu1  ;;  %v2587_v40 = vpop.f32.mrb[153].mxu0 }
 0x352   : > { %v5764_v14 = vadd.f32 %v2296_v62, %v2200_v11  ;;  %v1869_v31 = vpop.f32.mrb[122].mxu1  ;;  %v2589_v5 = vpop.f32.mrb[154].mxu0  ;;  %v2298_v11 = vsel %vm745_vm3, %v5595_v38, 0.0 }
 0x353   : > { %v2080_v20 = vsel %vm1287_vm0, %v2072_v28, %v2073_v51  ;;  %v2894_v55 = vsel %vm1287_vm0, %v2854_v61, %v2855_v7  ;;  %v2074_v59 = vrot.slane %v1869_v31, 7  ;;  %v2856_v45 = vrot.slane %v2589_v5, 7  ;;  %v1871_v39 = vpop.f32.mrb[123].mxu1  ;;  %v2591_v4 = vpop.f32.mrb[155].mxu0 }
 0x354   : > { %v2137_v34 = vsel %vm742_vm1, %v2080_v20, 0.0  ;;  %v2915_v43 = vsel %vm742_vm1, %v2894_v55, 0.0 }
 0x355   : > { %v2169_v13 = vadd.f32 %v2137_v34, %v5335_v52  ;;  %v2945_v2 = vadd.f32 %v2915_v43, %v5534_v53  ;;  %v2079_v28 = vsel %vm1287_vm0, %v2073_v51, %v2074_v59  ;;  %v2893_v61 = vsel %vm1287_vm0, %v2855_v7, %v2856_v45 }
 0x356   : > { %v2170_v63 = vadd.f32 %v2079_v28, %v5359_v23  ;;  %v2946_v22 = vadd.f32 %v2893_v61, %v6353_v17  ;;  %v6357_v61 = vld [vmem:[#allocation50_spill] sm:$0xff] }
 0x357   : > { %v2201_v3 = vadd.f32 %v2169_v13, %v1867_v21  ;;  %v5782_v33 = vadd.f32 %v2945_v2, %v2587_v40  ;;  %v6355_v13 = vld [vmem:[#allocation49_spill] sm:$0xff] }
 0x358   : > { %v2202_v37 = vadd.f32 %v2170_v63, %v1871_v39  ;;  %v5784_v25 = vadd.f32 %v2946_v22, %v2591_v4  ;;  %v1875_v49 = vpop.f32.mrb[124].mxu1  ;;  %v2595_v52 = vpop.f32.mrb[156].mxu0  ;;  %v6354_v4 = vld [vmem:[#allocation48_spill] sm:$0xff]  ;;  %v6356_v2 = vrot.slane %v6355_v13, 7 }
 0x359   : > { %v5787_v53 = vadd.f32 %v5591_v6, %v2201_v3  ;;  %v2075_v42 = vrot.slane %v1875_v49, 7  ;;  %v2857_v18 = vrot.slane %v2595_v52, 7  ;;  %v1877_v23 = vpop.f32.mrb[125].mxu1  ;;  %v2597_v62 = vpop.f32.mrb[157].mxu0  ;;  %v5822_v52 = vld [vmem:[%s6274_s4] ss:$0 sm:$0xff] }
 0x35a   : > { %v5792_v51 = vadd.f32 %v2298_v11, %v2202_v37  ;;  %v1879_v7 = vpop.f32.mrb[126].mxu1  ;;  %v2599_v21 = vpop.f32.mrb[158].mxu0 }
 0x35b   : > { %v2078_v40 = vsel %vm1287_vm0, %v2074_v59, %v2075_v42  ;;  %v2892_v31 = vsel %vm1287_vm0, %v2856_v45, %v2857_v18  ;;  %v2076_v6 = vrot.slane %v1879_v7, 7  ;;  %v2858_v5 = vrot.slane %v2599_v21, 7  ;;  %v1881_v20 = vpop.f32.mrb[127].mxu1  ;;  %v2601_v55 = vpop.f32.mrb[159].mxu0 }
 0x35c   : > { %v2139_v38 = vsel %vm742_vm1, %v2078_v40, 0.0  ;;  %v2917_v39 = vsel %vm742_vm1, %v2892_v31, 0.0 }
 0x35d   : > { %v2171_v34 = vadd.f32 %v2139_v38, %v6354_v4  ;;  %v2947_v43 = vadd.f32 %v2917_v39, %v5566_v30  ;;  %v2108_v59 = vsel %vm1287_vm0, %v2076_v6, %v6356_v2  ;;  %v2077_v45 = vsel %vm1287_vm0, %v2075_v42, %v2076_v6  ;;  %v6358_v30 = vld [vmem:[#allocation51_spill] sm:$0xff] }
 0x35e   : > { %v2109_v28 = vsel %vm742_vm1, %v2108_v59, 0.0  ;;  %v2172_v63 = vadd.f32 %v2077_v45, %v6357_v61  ;;  %v2891_v17 = vsel %vm1287_vm0, %v2857_v18, %v2858_v5  ;;  %v2300_v42 = vsel %vm745_vm3, %v5601_v0, 0.0  ;;  %v6359_v18 = vld [vmem:[#allocation54_spill] sm:$0xff] }
 0x35f   : > { %v2203_v22 = vadd.f32 %v2171_v34, %v1877_v23  ;;  %v5815_v3 = vadd.f32 %v2947_v43, %v2597_v62  ;;  %v2173_v37 = vadd.f32 %v2109_v28, %v6358_v30  ;;  %v2948_v49 = vadd.f32 %v2891_v17, %v5571_v26  ;;  %v6360_v62 = vld [vmem:[#allocation52_spill] sm:$0xff] }
 0x360   : > { %v2204_v11 = vadd.f32 %v2172_v63, %v1881_v20  ;;  %v2605_v7 = vpop.f32.mrb[160].mxu0  ;;  %v4015_v21 = vpop.f32.mrb[128].mxu1  ;;  %v2905_v20 = vsel %vm742_vm1, %v5631_v12, 0.0 }
 0x361   : > { %v2331_v23 = vadd.f32 %v6359_v18, %v2203_v22  ;;  %v2301_v40 = vadd.f32 %v6360_v62, %v2173_v37  ;;  %v5829_v31 = vadd.f32 %v2948_v49, %v2601_v55  ;;  %v2859_v6 = vrot.slane %v2605_v7, 7  ;;  %v2607_v26 = vpop.f32.mrb[161].mxu0  ;;  %v5831_v38 = vpop.f32.mrb[129].mxu1 }
 0x362   : > { %v2332_v39 = vadd.f32 %v2300_v42, %v2204_v11  ;;  %v2609_v4 = vpop.f32.mrb[162].mxu0  ;;  %v4016_v34 = vpop.f32.mrb[130].mxu1  ;;  %v3000_v28 = vrot.slane %v4015_v21, 1 }
 0x363   : > { %v3159_v0 = vadd.f32 %v5822_v52, %v2331_v23  ;;  %v2890_v43 = vsel %vm1287_vm0, %v2858_v5, %v2859_v6  ;;  %v2860_v13 = vrot.slane %v2609_v4, 7  ;;  %v2935_v2 = vadd.f32 %v2905_v20, %v2301_v40  ;;  %v2611_v55 = vpop.f32.mrb[163].mxu0  ;;  %v2721_v59 = vpop.f32.mrb[131].mxu1 }
 0x364   : > { %v3160_v45 = vadd.f32 %v5822_v52, %v2332_v39  ;;  %v2919_v61 = vsel %vm742_vm1, %v2890_v43, 0.0  ;;  %v3001_v63 = vrot.slane %v4016_v34, 1 }
 0x365   : > { %v3191_v12 = vmax.f32 %v3159_v0, 0.0  ;;  %v2949_v17 = vadd.f32 %v2919_v61, %v5604_v19  ;;  %v2967_v22 = vadd.f32 %v2935_v2, %v5625_v10  ;;  %v2889_v30 = vsel %vm1287_vm0, %v2859_v6, %v2860_v13 }
 0x366   : > { %v3192_v5 = vmax.f32 %v3160_v45, 0.0  ;;  %v3058_v37 = vsel %vm1439_vm2, %v3000_v28, %v3001_v63  ;;  %v2950_v49 = vadd.f32 %v2889_v30, %v5609_v27 }
 0x367   : > { %v5849_v11 = vadd.f32 %v2949_v17, %v2607_v26  ;;  %v3090_v42 = vadd.f32 %v3058_v37, %v2967_v22  ;;  %v6361_v22 = vld [vmem:[#allocation55_spill] sm:$0xff] }
 0x368   : > { %v5851_v7 = vadd.f32 %v2950_v49, %v2611_v55  ;;  %v2615_v21 = vpop.f32.mrb[164].mxu0  ;;  %v4019_v18 = vpop.f32.mrb[132].mxu1  ;;  %v5853_v23 = vpack.c.bf16 %v3192_v5, %v3191_v12 }
 0x369   : > { %v2861_v19 = vrot.slane %v2615_v21, 7  ;;  %v2617_v10 = vpop.f32.mrb[165].mxu0  ;;  %v2733_v62 = vpop.f32.mrb[133].mxu1  ;;  %v3004_v39 = vrot.slane %v4019_v18, 1  ;;  %v3129_v59 = vadd.f32 %v5822_v52, %v3090_v42 }
 0x36a   : > { %v3002_v40 = vrot.slane %v2733_v62, 1  ;;  %v2619_v6 = vpop.f32.mrb[166].mxu0  ;;  %v4020_v20 = vpop.f32.mrb[134].mxu1 }
 0x36b   : > { %v2888_v4 = vsel %vm1287_vm0, %v2860_v13, %v2861_v19  ;;  %v2862_v27 = vrot.slane %v2619_v6, 7  ;;  %v3005_v26 = vrot.slane %v4020_v20, 1  ;;  %v2621_v34 = vpop.f32.mrb[167].mxu0  ;;  %v2736_v0 = vpop.f32.mrb[135].mxu1  ;;  %v3161_v20 = vmax.f32 %v3129_v59, 0.0 }
 0x36c   : > { %v2921_v43 = vsel %vm742_vm1, %v2888_v4, 0.0  ;;  %v3057_v2 = vsel %vm1439_vm2, %v3001_v63, %v3002_v40  ;;  %v3003_v55 = vrot.slane %v2736_v0, 1 }
 0x36d   : > { %v2951_v45 = vadd.f32 %v2921_v43, %v5623_v16  ;;  %v3061_v28 = vsel %vm745_vm3, %v3057_v2, 0.0  ;;  %v3054_v13 = vsel %vm1439_vm2, %v3004_v39, %v3005_v26  ;;  %v2887_v61 = vsel %vm1287_vm0, %v2861_v19, %v2862_v27 }
 0x36e   : > { %v3091_v12 = vadd.f32 %v3061_v28, %v5644_v58  ;;  %v3094_v17 = vadd.f32 %v3054_v13, %v5698_v35  ;;  %v2952_v63 = vadd.f32 %v2887_v61, %v6361_v22  ;;  %v3055_v30 = vsel %vm1439_vm2, %v3003_v55, %v3004_v39 }
 0x36f   : > { %v5874_v5 = vadd.f32 %v2951_v45, %v2617_v10  ;;  %v3056_v16 = vsel %vm1439_vm2, %v3002_v40, %v3003_v55  ;;  %v3063_v37 = vsel %vm745_vm3, %v3055_v30, 0.0 }
 0x370   : > { %v5880_v49 = vadd.f32 %v2952_v63, %v2621_v34  ;;  %v3092_v42 = vadd.f32 %v3056_v16, %v5670_v15  ;;  %v3093_v58 = vadd.f32 %v3063_v37, %v5672_v32  ;;  %v2625_v35 = vpop.f32.mrb[168].mxu0  ;;  %v4023_v21 = vpop.f32.mrb[136].mxu1  ;;  %v3130_v18 = vadd.f32 %v5822_v52, %v3091_v12 }
 0x371   : > { %v2863_v19 = vrot.slane %v2625_v35, 7  ;;  %v3008_v62 = vrot.slane %v4023_v21, 1  ;;  %v2627_v10 = vpop.f32.mrb[169].mxu0  ;;  %v2749_v6 = vpop.f32.mrb[137].mxu1  ;;  %v3133_v15 = vadd.f32 %v5822_v52, %v3094_v17 }
 0x372   : > { %v3131_v40 = vadd.f32 %v5822_v52, %v3092_v42  ;;  %v3132_v39 = vadd.f32 %v5822_v52, %v3093_v58  ;;  %v3006_v4 = vrot.slane %v2749_v6, 1  ;;  %v2629_v34 = vpop.f32.mrb[170].mxu0  ;;  %v4024_v0 = vpop.f32.mrb[138].mxu1  ;;  %v3162_v28 = vmax.f32 %v3130_v18, 0.0 }
 0x373   : > { %v2886_v32 = vsel %vm1287_vm0, %v2862_v27, %v2863_v19  ;;  %v2864_v43 = vrot.slane %v2629_v34, 7  ;;  %v3009_v2 = vrot.slane %v4024_v0, 1  ;;  %v2631_v55 = vpop.f32.mrb[171].mxu0  ;;  %v2752_v45 = vpop.f32.mrb[139].mxu1 }
 0x374   : > { %v3163_v13 = vmax.f32 %v3131_v40, 0.0  ;;  %v3164_v61 = vmax.f32 %v3132_v39, 0.0  ;;  %v2923_v59 = vsel %vm742_vm1, %v2886_v32, 0.0  ;;  %v3053_v12 = vsel %vm1439_vm2, %v3005_v26, %v3006_v4 }
 0x375   : > { %v2953_v22 = vadd.f32 %v2923_v59, %v5647_v24  ;;  %v3065_v17 = vsel %vm745_vm3, %v3053_v12, 0.0  ;;  %v3050_v27 = vsel %vm1439_vm2, %v3008_v62, %v3009_v2  ;;  %v2885_v63 = vsel %vm1287_vm0, %v2863_v19, %v2864_v43 }
 0x376   : > { %v3194_v30 = vpack.c.bf16 %v3164_v61, %v3163_v13  ;;  %v3095_v16 = vadd.f32 %v3065_v17, %v5700_v44  ;;  %v3098_v37 = vadd.f32 %v3050_v27, %v5754_v48  ;;  %v2954_v42 = vadd.f32 %v2885_v63, %v5652_v50 }
 0x377   : > { %v2999_v26 = vrot.slane %v5831_v38, 1  ;;  %v5905_v58 = vadd.f32 %v2953_v22, %v2627_v10  ;;  %v3007_v24 = vrot.slane %v2752_v45, 1  ;;  %v3193_v35 = vpack.c.bf16 %v3162_v28, %v3161_v20 }
 0x378   : > { %v5907_v21 = vadd.f32 %v2954_v42, %v2631_v55  ;;  %v2635_v18 = vpop.f32.mrb[172].mxu0  ;;  %v4027_v6 = vpop.f32.mrb[140].mxu1  ;;  %v3134_v40 = vadd.f32 %v5822_v52, %v3095_v16  ;;  %v3165_v19 = vmax.f32 %v3133_v15, 0.0  ;;  %v5911_v39 = vadd.f32 %v5822_v52, %v3098_v37 }
 0x379   : > { %v3051_v44 = vsel %vm1439_vm2, %v3007_v24, %v3008_v62  ;;  %v3052_v50 = vsel %vm1439_vm2, %v3006_v4, %v3007_v24  ;;  %4061 = vmatprep.mubr.bf16.mxu1 %v3193_v35  ;;  %v2865_v48 = vrot.slane %v2635_v18, 7  ;;  %v3012_v10 = vrot.slane %v4027_v6, 1  ;;  %v2637_v20 = vpop.f32.mrb[173].mxu0  ;;  %v2765_v34 = vpop.f32.mrb[141].mxu1 }
 0x37a   : > { %v3067_v0 = vsel %vm745_vm3, %v3051_v44, 0.0  ;;  %v3096_v32 = vadd.f32 %v3052_v50, %v5726_v60  ;;  %4062 = vmatmul.mubr.bf16.vlgmr.msra.gmra.mrb[160].mxu1 %v3194_v30  ;;  %v3010_v15 = vrot.slane %v2765_v34, 1  ;;  %v2639_v55 = vpop.f32.mrb[174].mxu0  ;;  %v4028_v45 = vpop.f32.mrb[142].mxu1  ;;  %v3166_v28 = vmax.f32 %v3134_v40, 0.0 }
 0x37b   : > { %v3097_v62 = vadd.f32 %v3067_v0, %v5728_v8  ;;  %v2884_v4 = vsel %vm1287_vm0, %v2864_v43, %v2865_v48  ;;  %v2866_v13 = vrot.slane %v2639_v55, 7  ;;  %v3013_v61 = vrot.slane %v4028_v45, 1  ;;  %v2641_v59 = vpop.f32.mrb[175].mxu0  ;;  %v2768_v12 = vpop.f32.mrb[143].mxu1 }
 0x37c   : > { %v2925_v22 = vsel %vm742_vm1, %v2884_v4, 0.0  ;;  %v3049_v60 = vsel %vm1439_vm2, %v3009_v2, %v3010_v15  ;;  %v3011_v17 = vrot.slane %v2768_v12, 1  ;;  %v3195_v27 = vpack.c.bf16 %v3166_v28, %v3165_v19 }
 0x37d   : > { %v2955_v63 = vadd.f32 %v2925_v22, %v5675_v9  ;;  %v3069_v8 = vsel %vm745_vm3, %v3049_v60, 0.0  ;;  %v3046_v43 = vsel %vm1439_vm2, %v3012_v10, %v3013_v61  ;;  %v2883_v30 = vsel %vm1287_vm0, %v2865_v48, %v2866_v13 }
 0x37e   : > { %v3099_v16 = vadd.f32 %v3069_v8, %v5756_v1  ;;  %v3102_v37 = vadd.f32 %v3046_v43, %v5815_v3  ;;  %v2956_v42 = vadd.f32 %v2883_v30, %v5680_v47  ;;  %v3047_v2 = vsel %vm1439_vm2, %v3011_v17, %v3012_v10  ;;  %4065 = vmatprep.mubr.bf16.mxu1 %v3195_v27 }
 0x37f   : > { %v5939_v9 = vadd.f32 %v2955_v63, %v2637_v20  ;;  %v3048_v24 = vsel %vm1439_vm2, %v3010_v15, %v3011_v17  ;;  %v3071_v35 = vsel %vm745_vm3, %v3047_v2, 0.0  ;;  %v3135_v18 = vadd.f32 %v5822_v52, %v3096_v32 }
 0x380   : > { %v5946_v6 = vadd.f32 %v2956_v42, %v2641_v59  ;;  %v3100_v1 = vadd.f32 %v3048_v24, %v5782_v33  ;;  %v3101_v47 = vadd.f32 %v3071_v35, %v5784_v25  ;;  %v2645_v3 = vpop.f32.mrb[176].mxu0  ;;  %v4031_v40 = vpop.f32.mrb[144].mxu1  ;;  %v3136_v19 = vadd.f32 %v5822_v52, %v3097_v62 }
 0x381   : > { %v2867_v44 = vrot.slane %v2645_v3, 7  ;;  %v3016_v50 = vrot.slane %v4031_v40, 1  ;;  %v3167_v48 = vmax.f32 %v3135_v18, 0.0  ;;  %v2647_v10 = vpop.f32.mrb[177].mxu0  ;;  %v2781_v20 = vpop.f32.mrb[145].mxu1  ;;  %v3138_v34 = vadd.f32 %v5822_v52, %v3099_v16 }
 0x382   : > { %v3168_v0 = vmax.f32 %v3136_v19, 0.0  ;;  %v3014_v15 = vrot.slane %v2781_v20, 1  ;;  %v2649_v32 = vpop.f32.mrb[178].mxu0  ;;  %v4032_v55 = vpop.f32.mrb[146].mxu1  ;;  %v3169_v45 = vmax.f32 %v5911_v39, 0.0  ;;  %v3139_v33 = vadd.f32 %v5822_v52, %v3100_v1 }
 0x383   : > { %v2882_v25 = vsel %vm1287_vm0, %v2866_v13, %v2867_v44  ;;  %v2868_v28 = vrot.slane %v2649_v32, 7  ;;  %v3017_v62 = vrot.slane %v4032_v55, 1  ;;  %v2651_v4 = vpop.f32.mrb[179].mxu0  ;;  %v2784_v59 = vpop.f32.mrb[147].mxu1  ;;  %v3170_v12 = vmax.f32 %v3138_v34, 0.0 }
 0x384   : > { %v3196_v22 = vpack.c.bf16 %v3168_v0, %v3167_v48  ;;  %v2927_v60 = vsel %vm742_vm1, %v2882_v25, 0.0  ;;  %v3045_v17 = vsel %vm1439_vm2, %v3013_v61, %v3014_v15  ;;  %v3015_v27 = vrot.slane %v2784_v59, 1 }
 0x385   : > { %v2957_v39 = vadd.f32 %v2927_v60, %v5703_v57  ;;  %v3073_v63 = vsel %vm745_vm3, %v3045_v17, 0.0  ;;  %v3042_v13 = vsel %vm1439_vm2, %v3016_v50, %v3017_v62  ;;  %v2881_v8 = vsel %vm1287_vm0, %v2867_v44, %v2868_v28 }
 0x386   : > { %4066 = vmatmul.mubr.bf16.gmra.mrb[164].mxu1 %v3196_v22  ;;  %v3103_v43 = vadd.f32 %v3073_v63, %v5829_v31  ;;  %v5969_v30 = vadd.f32 %v3042_v13, %v5874_v5  ;;  %v2958_v61 = vadd.f32 %v2881_v8, %v5708_v56  ;;  %v3043_v57 = vsel %vm1439_vm2, %v3015_v27, %v3016_v50 }
 0x387   : > { %v5974_v16 = vadd.f32 %v2957_v39, %v2647_v10  ;;  %v3044_v42 = vsel %vm1439_vm2, %v3014_v15, %v3015_v27  ;;  %v3075_v2 = vsel %vm745_vm3, %v3043_v57, 0.0  ;;  %v3197_v24 = vpack.c.bf16 %v3170_v12, %v3169_v45 }
 0x388   : > { %v5980_v35 = vadd.f32 %v2958_v61, %v2651_v4  ;;  %v3104_v31 = vadd.f32 %v3044_v42, %v5849_v11  ;;  %v3105_v5 = vadd.f32 %v3075_v2, %v5851_v7  ;;  %v2655_v18 = vpop.f32.mrb[180].mxu0  ;;  %v4035_v56 = vpop.f32.mrb[148].mxu1  ;;  %v3140_v1 = vadd.f32 %v5822_v52, %v3101_v47 }
 0x389   : > { %4069 = vmatprep.mubr.bf16.mxu1 %v3197_v24  ;;  %v2869_v3 = vrot.slane %v2655_v18, 7  ;;  %v3020_v40 = vrot.slane %v4035_v56, 1  ;;  %v3171_v19 = vmax.f32 %v3139_v33, 0.0  ;;  %v2657_v44 = vpop.f32.mrb[181].mxu0  ;;  %v2797_v50 = vpop.f32.mrb[149].mxu1  ;;  %v3141_v48 = vadd.f32 %v5822_v52, %v3102_v37 }
 0x38a   : > { %v3172_v10 = vmax.f32 %v3140_v1, 0.0  ;;  %v3018_v20 = vrot.slane %v2797_v50, 1  ;;  %v2659_v34 = vpop.f32.mrb[182].mxu0  ;;  %v4036_v0 = vpop.f32.mrb[150].mxu1  ;;  %v3142_v11 = vadd.f32 %v5822_v52, %v3103_v43  ;;  %v3143_v7 = vadd.f32 %v5822_v52, %v3104_v31 }
 0x38b   : > { %v2880_v15 = vsel %vm1287_vm0, %v2868_v28, %v2869_v3  ;;  %v2870_v47 = vrot.slane %v2659_v34, 7  ;;  %v3021_v32 = vrot.slane %v4036_v0, 1  ;;  %v2661_v55 = vpop.f32.mrb[183].mxu0  ;;  %v2800_v45 = vpop.f32.mrb[151].mxu1  ;;  %v3173_v33 = vmax.f32 %v3141_v48, 0.0 }
 0x38c   : > { %v3198_v25 = vpack.c.bf16 %v3172_v10, %v3171_v19  ;;  %v2929_v37 = vsel %vm742_vm1, %v2880_v15, 0.0  ;;  %v3041_v4 = vsel %vm1439_vm2, %v3017_v62, %v3018_v20  ;;  %v3019_v59 = vrot.slane %v2800_v45, 1 }
 0x38d   : > { %v2959_v12 = vadd.f32 %v2929_v37, %v5731_v46  ;;  %v3077_v22 = vsel %vm745_vm3, %v3041_v4, 0.0  ;;  %v3038_v28 = vsel %vm1439_vm2, %v3020_v40, %v3021_v32  ;;  %v2879_v60 = vsel %vm1287_vm0, %v2869_v3, %v2870_v47 }
 0x38e   : > { %4070 = vmatmul.mubr.bf16.gmra.mrb[168].mxu1 %v3198_v25  ;;  %v3107_v17 = vadd.f32 %v3077_v22, %v5880_v49  ;;  %v6003_v27 = vadd.f32 %v3038_v28, %v5939_v9  ;;  %v2960_v62 = vadd.f32 %v2879_v60, %v5736_v41  ;;  %v3039_v46 = vsel %vm1439_vm2, %v3019_v59, %v3020_v40 }
 0x38f   : > { %v2991_v39 = vadd.f32 %v2959_v12, %v2657_v44  ;;  %v3040_v63 = vsel %vm1439_vm2, %v3018_v20, %v3019_v59  ;;  %v3079_v13 = vsel %vm745_vm3, %v3039_v46, 0.0  ;;  %v3174_v8 = vmax.f32 %v3142_v11, 0.0 }
 0x390   : > { %v6012_v43 = vadd.f32 %v2960_v62, %v2661_v55  ;;  %v3108_v49 = vadd.f32 %v3040_v63, %v5905_v58  ;;  %v3109_v9 = vadd.f32 %v3079_v13, %v5907_v21  ;;  %v2665_v61 = vpop.f32.mrb[184].mxu0  ;;  %v4039_v57 = vpop.f32.mrb[152].mxu1  ;;  %v3144_v41 = vadd.f32 %v5822_v52, %v3105_v5 }
 0x391   : > { %v3199_v42 = vpack.c.bf16 %v3174_v8, %v3173_v33  ;;  %v2871_v2 = vrot.slane %v2665_v61, 7  ;;  %v3024_v24 = vrot.slane %v4039_v57, 1  ;;  %v3175_v31 = vmax.f32 %v3143_v7, 0.0  ;;  %v2667_v18 = vpop.f32.mrb[185].mxu0  ;;  %v2813_v56 = vpop.f32.mrb[153].mxu1 }
 0x392   : > { %v3176_v1 = vmax.f32 %v3144_v41, 0.0  ;;  %v3022_v3 = vrot.slane %v2813_v56, 1  ;;  %v2669_v40 = vpop.f32.mrb[186].mxu0  ;;  %v4040_v19 = vpop.f32.mrb[154].mxu1  ;;  %v3145_v44 = vadd.f32 %v5822_v52, %v5969_v30  ;;  %v3146_v58 = vadd.f32 %v5822_v52, %v3107_v17 }
 0x393   : > { %4073 = vmatprep.mubr.bf16.mxu1 %v3199_v42  ;;  %v2878_v21 = vsel %vm1287_vm0, %v2870_v47, %v2871_v2  ;;  %v2872_v5 = vrot.slane %v2669_v40, 7  ;;  %v3025_v50 = vrot.slane %v4040_v19, 1  ;;  %v2671_v48 = vpop.f32.mrb[187].mxu0  ;;  %v2816_v10 = vpop.f32.mrb[155].mxu1  ;;  %v3147_v20 = vadd.f32 %v5822_v52, %v3108_v49 }
 0x394   : > { %v3200_v34 = vpack.c.bf16 %v3176_v1, %v3175_v31  ;;  %v2931_v0 = vsel %vm742_vm1, %v2878_v21, 0.0  ;;  %v3037_v11 = vsel %vm1439_vm2, %v3021_v32, %v3022_v3  ;;  %v3023_v30 = vrot.slane %v2816_v10, 1 }
 0x395   : > { %v2961_v7 = vadd.f32 %v2931_v0, %v5759_v36  ;;  %v3081_v15 = vsel %vm745_vm3, %v3037_v11, 0.0  ;;  %v3034_v47 = vsel %vm1439_vm2, %v3024_v24, %v3025_v50  ;;  %v2877_v55 = vsel %vm1287_vm0, %v2871_v2, %v2872_v5 }
 0x396   : > { %4074 = vmatmul.mubr.bf16.gmra.mrb[172].mxu1 %v3200_v34  ;;  %v3111_v45 = vadd.f32 %v3081_v15, %v5946_v6  ;;  %v3114_v33 = vadd.f32 %v3034_v47, %v2991_v39  ;;  %v2962_v25 = vadd.f32 %v2877_v55, %v5764_v14  ;;  %v3035_v32 = vsel %vm1439_vm2, %v3023_v30, %v3024_v24 }
 0x397   : > { %v2993_v37 = vadd.f32 %v2961_v7, %v2667_v18  ;;  %v3036_v36 = vsel %vm1439_vm2, %v3022_v3, %v3023_v30  ;;  %v3083_v4 = vsel %vm745_vm3, %v3035_v32, 0.0  ;;  %v3177_v59 = vmax.f32 %v3145_v44, 0.0 }
 0x398   : > { %v2994_v12 = vadd.f32 %v2962_v25, %v2671_v48  ;;  %v3112_v22 = vadd.f32 %v3036_v36, %v5974_v16  ;;  %v3113_v28 = vadd.f32 %v3083_v4, %v5980_v35  ;;  %v3178_v6 = vmax.f32 %v3146_v58, 0.0  ;;  %v2675_v60 = vpop.f32.mrb[188].mxu0  ;;  %v4043_v17 = vpop.f32.mrb[156].mxu1 }
 0x399   : > { %v2873_v14 = vrot.slane %v2675_v60, 7  ;;  %v3028_v62 = vrot.slane %v4043_v17, 1  ;;  %v3148_v46 = vadd.f32 %v5822_v52, %v3109_v9  ;;  %v3179_v39 = vmax.f32 %v3147_v20, 0.0  ;;  %v2677_v63 = vpop.f32.mrb[189].mxu0  ;;  %v2829_v13 = vpop.f32.mrb[157].mxu1 }
 0x39a   : > { %v3201_v8 = vpack.c.bf16 %v3178_v6, %v3177_v59  ;;  %v3026_v49 = vrot.slane %v2829_v13, 1  ;;  %v2679_v61 = vpop.f32.mrb[190].mxu0  ;;  %v4044_v57 = vpop.f32.mrb[158].mxu1  ;;  %v3149_v41 = vadd.f32 %v5822_v52, %v6003_v27  ;;  %v3150_v16 = vadd.f32 %v5822_v52, %v3111_v45  ;;  %v6362_v13 = vld [vmem:[#allocation44_spill] sm:$0xff] }
 0x39b   : > { %v3180_v35 = vmax.f32 %v3148_v46, 0.0  ;;  %v2876_v42 = vsel %vm1287_vm0, %v2872_v5, %v2873_v14  ;;  %v2874_v2 = vrot.slane %v2679_v61, 7  ;;  %v3029_v24 = vrot.slane %v4044_v57, 1  ;;  %v2681_v31 = vpop.f32.mrb[191].mxu0  ;;  %v2832_v9 = vpop.f32.mrb[159].mxu1 }
 0x39c   : > { %4077 = vmatprep.mubr.bf16.mxu1 %v3201_v8  ;;  %v2933_v18 = vsel %vm742_vm1, %v2876_v42, 0.0  ;;  %v3033_v56 = vsel %vm1439_vm2, %v3025_v50, %v3026_v49  ;;  %v3027_v1 = vrot.slane %v2832_v9, 1  ;;  %v3181_v3 = vmax.f32 %v3149_v41, 0.0  ;;  %v6363_v8 = vld [vmem:[#allocation17_spill] sm:$0xff]  ;;  %v6364_v41 = vld [vmem:[#allocation15_spill] sm:$0xff] }
 0x39d   : > { %v3202_v27 = vpack.c.bf16 %v3180_v35, %v3179_v39  ;;  %v2963_v40 = vadd.f32 %v2933_v18, %v5787_v53  ;;  %v3085_v19 = vsel %vm745_vm3, %v3033_v56, 0.0  ;;  %v3030_v44 = vsel %vm1439_vm2, %v3028_v62, %v3029_v24  ;;  %v6366_v18 = vld [vmem:[#allocation16_spill] sm:$0xff] }
 0x39e   : > { %v3115_v58 = vadd.f32 %v3085_v19, %v6012_v43  ;;  %v2875_v21 = vsel %vm1287_vm0, %v2873_v14, %v2874_v2  ;;  %v3059_v5 = vsel %vm1439_vm2, %v3029_v24, %v2999_v26  ;;  %v3031_v50 = vsel %vm1439_vm2, %v3027_v1, %v3028_v62  ;;  %v6087_v14 = vld [vmem:[%s6276_s6] ss:$0 sm:$0xff]  ;;  %v6365_v2 = vld [vmem:[#allocation18_spill] sm:$0xff] }
 0x39f   : > { %4078 = vmatmul.mubr.bf16.gmra.mrb[176].mxu1 %v3202_v27  ;;  %v2995_v53 = vadd.f32 %v2963_v40, %v2677_v63  ;;  %v2964_v48 = vadd.f32 %v2875_v21, %v5792_v51  ;;  %v3089_v10 = vsel %vm745_vm3, %v3059_v5, 0.0  ;;  %v3032_v43 = vsel %vm1439_vm2, %v3026_v49, %v3027_v1 }
 0x3a0   : > { %v3087_v20 = vsel %vm745_vm3, %v3031_v50, 0.0  ;;  %v3116_v38 = vadd.f32 %v3032_v43, %v2993_v37  ;;  %v3182_v34 = vmax.f32 %v3150_v16, 0.0  ;;  %v3151_v26 = vadd.f32 %v5822_v52, %v3112_v22  ;;  %v6367_v43 = vld [vmem:[#allocation21_spill] sm:$0xff] }
 0x3a1   : > { %v3118_v0 = vadd.f32 %v3030_v44, %v2995_v53  ;;  %v2996_v11 = vadd.f32 %v2964_v48, %v2681_v31  ;;  %v3117_v30 = vadd.f32 %v3087_v20, %v2994_v12  ;;  %v3152_v7 = vadd.f32 %v5822_v52, %v3113_v28 }
 0x3a2   : > { %v3203_v15 = vpack.c.bf16 %v3182_v34, %v3181_v3  ;;  %v3183_v51 = vmax.f32 %v3151_v26, 0.0  ;;  %v3153_v47 = vadd.f32 %v5822_v52, %v3114_v33  ;;  %v3154_v55 = vadd.f32 %v5822_v52, %v3115_v58 }
 0x3a3   : > { %v3119_v29 = vadd.f32 %v3089_v10, %v2996_v11  ;;  %v3184_v45 = vmax.f32 %v3152_v7, 0.0  ;;  %v3155_v54 = vadd.f32 %v5822_v52, %v3116_v38  ;;  %v3156_v25 = vadd.f32 %v5822_v52, %v3117_v30 }
 0x3a4   : > { %4081 = vmatprep.mubr.bf16.mxu1 %v3203_v15  ;;  %v3185_v32 = vmax.f32 %v3153_v47, 0.0  ;;  %v3186_v37 = vmax.f32 %v3154_v55, 0.0  ;;  %v3157_v36 = vadd.f32 %v5822_v52, %v3118_v0  ;;  %v543_v49 = vadd.f32 %v6363_v8, %v6362_v13  ;;  %v6368_v0 = vld [vmem:[#allocation19_spill] sm:$0xff]  ;;  %v6369_v15 = vld [vmem:[#allocation22_spill] sm:$0xff] }
 0x3a5   : > { %v3158_v4 = vadd.f32 %v5822_v52, %v3119_v29  ;;  %v3204_v59 = vpack.c.bf16 %v3184_v45, %v3183_v51  ;;  %v3187_v12 = vmax.f32 %v3155_v54, 0.0  ;;  %v3188_v22 = vmax.f32 %v3156_v25, 0.0  ;;  %v6370_v29 = vld [vmem:[#allocation20_spill] sm:$0xff] }
 0x3a6   : > { %v3205_v28 = vpack.c.bf16 %v3186_v37, %v3185_v32  ;;  %v3189_v33 = vmax.f32 %v3157_v36, 0.0  ;;  %v533_v16 = vadd.f32 %v6364_v41, %v6362_v13  ;;  %v547_v24 = vadd.f32 %v6365_v2, %v6362_v13 }
 0x3a7   : > { %v3190_v6 = vmax.f32 %v3158_v4, 0.0  ;;  %4082 = vmatmul.mubr.bf16.gmra.mrb[180].mxu1 %v3204_v59  ;;  %v3206_v60 = vpack.c.bf16 %v3188_v22, %v3187_v12  ;;  %v537_v56 = vadd.f32 %v6366_v18, %v6362_v13  ;;  %v563_v20 = vadd.f32 %v6367_v43, %v6362_v13 }
 0x3a8   : > { %4085 = vmatprep.mubr.bf16.mxu1 %v3205_v28  ;;  %v553_v11 = vadd.f32 %v6368_v0, %v6362_v13  ;;  %v567_v51 = vadd.f32 %v6369_v15, %v6362_v13  ;;  %v557_v45 = vadd.f32 %v6370_v29, %v6362_v13 }
 0x3a9   : > { %v3207_v17 = vpack.c.bf16 %v3190_v6, %v3189_v33 }
 0x3af   : > { %4086 = vmatmul.mubr.bf16.gmra.mrb[184].mxu1 %v3206_v60 }
 0x3b0   : > { %4089 = vmatprep.mubr.bf16.mxu1 %v3207_v17  ;;  %v6371_v17 = vld [vmem:[#allocation25_spill] sm:$0xff] }
 0x3b7   : > { %4090 = vmatmul.mubr.bf16.gmra.mrb[188].mxu1 %v5853_v23 }
 0x44d   : > { %v4063_v52 = vpop.f32.mrb[160].mxu1 }
 0x44e   : > { %v3323_v62 = vadd.f32 %v4063_v52, %v6087_v14  ;;  %v3314_v46 = vpop.f32.mrb[161].mxu1  ;;  %v583_v52 = vadd.f32 %v6371_v17, %v6362_v13 }
 0x44f   : > { %v3315_v39 = vadd.f32 %v6087_v14, %v3314_v46  ;;  %v4064_v63 = vpop.f32.mrb[162].mxu1 }
 0x450   : > { %v3443_v61 = vmax.f32 %v3323_v62, 0.0  ;;  %v3326_v57 = vadd.f32 %v4064_v63, %v6087_v14  ;;  %v3317_v23 = vpop.f32.mrb[163].mxu1  ;;  %v6372_v63 = vld [vmem:[#allocation23_spill] sm:$0xff] }
 0x451   : > { %v3441_v35 = vmax.f32 %v3315_v39, 0.0  ;;  %v3318_v42 = vadd.f32 %v6087_v14, %v3317_v23  ;;  %v573_v8 = vadd.f32 %v6372_v63, %v6362_v13 }
 0x452   : > { %v3475_v31 = vadd.f32 %v3443_v61, %v543_v49  ;;  %v3444_v9 = vmax.f32 %v3326_v57, 0.0  ;;  %v6373_v57 = vld [vmem:[#allocation26_spill] sm:$0xff] }
 0x453   : > { %v3473_v1 = vadd.f32 %v3441_v35, %v533_v16  ;;  %v3442_v3 = vmax.f32 %v3318_v42, 0.0  ;;  %v587_v23 = vadd.f32 %v6373_v57, %v6362_v13  ;;  %v6374_v35 = vld [vmem:[#allocation24_spill] sm:$0xff] }
 0x454   : > { %v3507_v27 = vmax.f32 %v3475_v31, 0.0  ;;  %v3476_v40 = vadd.f32 %v3444_v9, %v547_v24  ;;  %v577_v42 = vadd.f32 %v6374_v35, %v6362_v13 }
 0x455   : > { %v3505_v19 = vmax.f32 %v3473_v1, 0.0  ;;  %v3474_v44 = vadd.f32 %v3442_v3, %v537_v56 }
 0x456   : > { %3539 = vst [vmem:[%s6103_s23 + $0x10] sm:$0xff] %v3507_v27  ;;  %v3508_v58 = vmax.f32 %v3476_v40, 0.0 }
 0x457   : > { %3537 = vst [vmem:[%s6103_s23] sm:$0xff] %v3505_v19  ;;  %v3506_v21 = vmax.f32 %v3474_v44, 0.0 }
 0x458   : > { %3540 = vst [vmem:[%s6103_s23 + $0x18] sm:$0xff] %v3508_v58 }
 0x459   : > { %3538 = vst [vmem:[%s6103_s23 + $0x8] sm:$0xff] %v3506_v21  ;;  %v4067_v5 = vpop.f32.mrb[164].mxu1  ;;  %v6375_v21 = vld [vmem:[#allocation29_spill] sm:$0xff] }
 0x45a   : > { %v3339_v50 = vadd.f32 %v4067_v5, %v6087_v14  ;;  %v3330_v53 = vpop.f32.mrb[165].mxu1  ;;  %v603_v5 = vadd.f32 %v6375_v21, %v6362_v13 }
 0x45b   : > { %v3331_v48 = vadd.f32 %v6087_v14, %v3330_v53  ;;  %v4068_v10 = vpop.f32.mrb[166].mxu1 }
 0x45c   : > { %v3447_v38 = vmax.f32 %v3339_v50, 0.0  ;;  %v3342_v34 = vadd.f32 %v4068_v10, %v6087_v14  ;;  %v3333_v26 = vpop.f32.mrb[167].mxu1  ;;  %v6376_v10 = vld [vmem:[#allocation27_spill] sm:$0xff] }
 0x45d   : > { %v3445_v30 = vmax.f32 %v3331_v48, 0.0  ;;  %v3334_v7 = vadd.f32 %v6087_v14, %v3333_v26  ;;  %v593_v43 = vadd.f32 %v6376_v10, %v6362_v13 }
 0x45e   : > { %v3479_v47 = vadd.f32 %v3447_v38, %v563_v20  ;;  %v3448_v55 = vmax.f32 %v3342_v34, 0.0  ;;  %v6377_v34 = vld [vmem:[#allocation30_spill] sm:$0xff] }
 0x45f   : > { %v3477_v54 = vadd.f32 %v3445_v30, %v553_v11  ;;  %v3446_v25 = vmax.f32 %v3334_v7, 0.0  ;;  %v607_v26 = vadd.f32 %v6377_v34, %v6362_v13  ;;  %v6378_v30 = vld [vmem:[#allocation28_spill] sm:$0xff] }
 0x460   : > { %v3511_v32 = vmax.f32 %v3479_v47, 0.0  ;;  %v3480_v37 = vadd.f32 %v3448_v55, %v567_v51  ;;  %v597_v7 = vadd.f32 %v6378_v30, %v6362_v13 }
 0x461   : > { %v3509_v36 = vmax.f32 %v3477_v54, 0.0  ;;  %v3478_v4 = vadd.f32 %v3446_v25, %v557_v45  ;;  %v4071_v59 = vpop.f32.mrb[168].mxu1 }
 0x462   : > { %3543 = vst [vmem:[%s6103_s23 + $0x30] sm:$0xff] %v3511_v32  ;;  %v3512_v12 = vmax.f32 %v3480_v37, 0.0  ;;  %v3355_v22 = vadd.f32 %v4071_v59, %v6087_v14  ;;  %v3346_v28 = vpop.f32.mrb[169].mxu1 }
 0x463   : > { %3541 = vst [vmem:[%s6103_s23 + $0x20] sm:$0xff] %v3509_v36  ;;  %v3510_v33 = vmax.f32 %v3478_v4, 0.0  ;;  %v3347_v6 = vadd.f32 %v6087_v14, %v3346_v28  ;;  %v4072_v60 = vpop.f32.mrb[170].mxu1 }
 0x464   : > { %3544 = vst [vmem:[%s6103_s23 + $0x38] sm:$0xff] %v3512_v12  ;;  %v3451_v62 = vmax.f32 %v3355_v22, 0.0  ;;  %v3358_v46 = vadd.f32 %v4072_v60, %v6087_v14  ;;  %v3349_v39 = vpop.f32.mrb[171].mxu1  ;;  %v6379_v12 = vld [vmem:[#allocation33_spill] sm:$0xff]  ;;  %v6380_v60 = vld [vmem:[#allocation31_spill] sm:$0xff] }
 0x465   : > { %3542 = vst [vmem:[%s6103_s23 + $0x28] sm:$0xff] %v3510_v33  ;;  %v3449_v49 = vmax.f32 %v3347_v6, 0.0  ;;  %v3350_v61 = vadd.f32 %v6087_v14, %v3349_v39  ;;  %v623_v22 = vadd.f32 %v6379_v12, %v6362_v13  ;;  %v613_v17 = vadd.f32 %v6380_v60, %v6362_v13 }
 0x466   : > { %v3483_v41 = vadd.f32 %v3451_v62, %v583_v52  ;;  %v3452_v16 = vmax.f32 %v3358_v46, 0.0  ;;  %v6381_v46 = vld [vmem:[#allocation34_spill] sm:$0xff] }
 0x467   : > { %v3481_v2 = vadd.f32 %v3449_v49, %v573_v8  ;;  %v3450_v24 = vmax.f32 %v3350_v61, 0.0  ;;  %v627_v39 = vadd.f32 %v6381_v46, %v6362_v13  ;;  %v6382_v49 = vld [vmem:[#allocation32_spill] sm:$0xff] }
 0x468   : > { %v3515_v31 = vmax.f32 %v3483_v41, 0.0  ;;  %v3484_v9 = vadd.f32 %v3452_v16, %v587_v23  ;;  %v617_v61 = vadd.f32 %v6382_v49, %v6362_v13 }
 0x469   : > { %v3513_v18 = vmax.f32 %v3481_v2, 0.0  ;;  %v3482_v56 = vadd.f32 %v3450_v24, %v577_v42  ;;  %v4075_v1 = vpop.f32.mrb[172].mxu1 }
 0x46a   : > { %3547 = vst [vmem:[%s6103_s23 + $0x50] sm:$0xff] %v3515_v31  ;;  %v3516_v3 = vmax.f32 %v3484_v9, 0.0  ;;  %v3371_v27 = vadd.f32 %v4075_v1, %v6087_v14  ;;  %v3362_v40 = vpop.f32.mrb[173].mxu1 }
 0x46b   : > { %3545 = vst [vmem:[%s6103_s23 + $0x40] sm:$0xff] %v3513_v18  ;;  %v3514_v19 = vmax.f32 %v3482_v56, 0.0  ;;  %v3363_v44 = vadd.f32 %v6087_v14, %v3362_v40  ;;  %v4076_v58 = vpop.f32.mrb[174].mxu1 }
 0x46c   : > { %3548 = vst [vmem:[%s6103_s23 + $0x58] sm:$0xff] %v3516_v3  ;;  %v3455_v50 = vmax.f32 %v3371_v27, 0.0  ;;  %v3374_v53 = vadd.f32 %v4076_v58, %v6087_v14  ;;  %v3365_v48 = vpop.f32.mrb[175].mxu1  ;;  %v6383_v3 = vld [vmem:[#allocation37_spill] sm:$0xff]  ;;  %v6384_v58 = vld [vmem:[#allocation35_spill] sm:$0xff] }
 0x46d   : > { %3546 = vst [vmem:[%s6103_s23 + $0x48] sm:$0xff] %v3514_v19  ;;  %v3453_v20 = vmax.f32 %v3363_v44, 0.0  ;;  %v3366_v38 = vadd.f32 %v6087_v14, %v3365_v48  ;;  %v643_v27 = vadd.f32 %v6383_v3, %v6362_v13  ;;  %v633_v21 = vadd.f32 %v6384_v58, %v6362_v13 }
 0x46e   : > { %v3487_v0 = vadd.f32 %v3455_v50, %v603_v5  ;;  %v3456_v11 = vmax.f32 %v3374_v53, 0.0  ;;  %v6385_v53 = vld [vmem:[#allocation38_spill] sm:$0xff] }
 0x46f   : > { %v3485_v15 = vadd.f32 %v3453_v20, %v593_v43  ;;  %v3454_v51 = vmax.f32 %v3366_v38, 0.0  ;;  %v647_v48 = vadd.f32 %v6385_v53, %v6362_v13  ;;  %v6386_v20 = vld [vmem:[#allocation36_spill] sm:$0xff] }
 0x470   : > { %v3519_v47 = vmax.f32 %v3487_v0, 0.0  ;;  %v3488_v55 = vadd.f32 %v3456_v11, %v607_v26  ;;  %v637_v38 = vadd.f32 %v6386_v20, %v6362_v13 }
 0x471   : > { %v3517_v29 = vmax.f32 %v3485_v15, 0.0  ;;  %v3486_v45 = vadd.f32 %v3454_v51, %v597_v7 }
 0x472   : > { %3551 = vst [vmem:[%s6103_s23 + $0x70] sm:$0xff] %v3519_v47  ;;  %v3520_v54 = vmax.f32 %v3488_v55, 0.0  ;;  %v4079_v25 = vpop.f32.mrb[176].mxu1 }
 0x473   : > { %3549 = vst [vmem:[%s6103_s23 + $0x60] sm:$0xff] %v3517_v29  ;;  %v3518_v32 = vmax.f32 %v3486_v45, 0.0  ;;  %v3387_v37 = vadd.f32 %v4079_v25, %v6087_v14  ;;  %v3378_v36 = vpop.f32.mrb[177].mxu1  ;;  %v6387_v25 = vld [vmem:[#allocation41_spill] sm:$0xff] }
 0x474   : > { %3552 = vst [vmem:[%s6103_s23 + $0x78] sm:$0xff] %v3520_v54  ;;  %v3379_v4 = vadd.f32 %v6087_v14, %v3378_v36  ;;  %v4080_v59 = vpop.f32.mrb[178].mxu1 }
 0x475   : > { %3550 = vst [vmem:[%s6103_s23 + $0x68] sm:$0xff] %v3518_v32  ;;  %v3459_v28 = vmax.f32 %v3387_v37, 0.0  ;;  %v3390_v33 = vadd.f32 %v4080_v59, %v6087_v14  ;;  %v3381_v6 = vpop.f32.mrb[179].mxu1  ;;  %v663_v32 = vadd.f32 %v6387_v25, %v6362_v13  ;;  %v6388_v59 = vld [vmem:[#allocation39_spill] sm:$0xff] }
 0x476   : > { %v3457_v52 = vmax.f32 %v3379_v4, 0.0  ;;  %v3382_v62 = vadd.f32 %v6087_v14, %v3381_v6  ;;  %v653_v12 = vadd.f32 %v6388_v59, %v6362_v13 }
 0x477   : > { %v3491_v63 = vadd.f32 %v3459_v28, %v623_v22  ;;  %v3460_v8 = vmax.f32 %v3390_v33, 0.0  ;;  %v6389_v33 = vld [vmem:[#allocation42_spill] sm:$0xff] }
 0x478   : > { %v3489_v57 = vadd.f32 %v3457_v52, %v613_v17  ;;  %v3458_v23 = vmax.f32 %v3382_v62, 0.0  ;;  %v667_v6 = vadd.f32 %v6389_v33, %v6362_v13  ;;  %v6390_v52 = vld [vmem:[#allocation40_spill] sm:$0xff] }
 0x479   : > { %v3523_v41 = vmax.f32 %v3491_v63, 0.0  ;;  %v3492_v16 = vadd.f32 %v3460_v8, %v627_v39  ;;  %v657_v62 = vadd.f32 %v6390_v52, %v6362_v13 }
 0x47a   : > { %v3521_v35 = vmax.f32 %v3489_v57, 0.0  ;;  %v3490_v42 = vadd.f32 %v3458_v23, %v617_v61  ;;  %v4083_v2 = vpop.f32.mrb[180].mxu1 }
 0x47b   : > { %3555 = vst [vmem:[%s6103_s23 + $0x90] sm:$0xff] %v3523_v41  ;;  %v3524_v24 = vmax.f32 %v3492_v16, 0.0  ;;  %v3403_v31 = vadd.f32 %v4083_v2, %v6087_v14  ;;  %v3394_v9 = vpop.f32.mrb[181].mxu1 }
 0x47c   : > { %3553 = vst [vmem:[%s6103_s23 + $0x80] sm:$0xff] %v3521_v35  ;;  %v3522_v18 = vmax.f32 %v3490_v42, 0.0  ;;  %v3395_v56 = vadd.f32 %v6087_v14, %v3394_v9  ;;  %v4084_v1 = vpop.f32.mrb[182].mxu1 }
 0x47d   : > { %3556 = vst [vmem:[%s6103_s23 + $0x98] sm:$0xff] %v3524_v24  ;;  %v3463_v40 = vmax.f32 %v3403_v31, 0.0  ;;  %v3406_v19 = vadd.f32 %v4084_v1, %v6087_v14  ;;  %v3397_v44 = vpop.f32.mrb[183].mxu1  ;;  %v6391_v24 = vld [vmem:[#allocation46_spill] sm:$0xff]  ;;  %v6392_v1 = vld [vmem:[#allocation43_spill] sm:$0xff] }
 0x47e   : > { %3554 = vst [vmem:[%s6103_s23 + $0x88] sm:$0xff] %v3522_v18  ;;  %v3461_v5 = vmax.f32 %v3395_v56, 0.0  ;;  %v3398_v50 = vadd.f32 %v6087_v14, %v3397_v44  ;;  %v683_v31 = vadd.f32 %v6391_v24, %v6362_v13  ;;  %v673_v3 = vadd.f32 %v6392_v1, %v6362_v13  ;;  %v6394_v13 = vld [vmem:[#allocation45_spill] sm:$0xff] }
 0x47f   : > { %v3495_v10 = vadd.f32 %v3463_v40, %v643_v27  ;;  %v3464_v43 = vmax.f32 %v3406_v19, 0.0 }
 0x480   : > { %v3493_v34 = vadd.f32 %v3461_v5, %v633_v21  ;;  %v3462_v26 = vmax.f32 %v3398_v50, 0.0  ;;  %v6393_v50 = vld [vmem:[#allocation47_spill] sm:$0xff] }
 0x481   : > { %v3527_v0 = vmax.f32 %v3495_v10, 0.0  ;;  %v3496_v11 = vadd.f32 %v3464_v43, %v647_v48 }
 0x482   : > { %v3525_v30 = vmax.f32 %v3493_v34, 0.0  ;;  %v3494_v7 = vadd.f32 %v3462_v26, %v637_v38  ;;  %v4087_v15 = vpop.f32.mrb[184].mxu1 }
 0x483   : > { %3559 = vst [vmem:[%s6103_s23 + $0xb0] sm:$0xff] %v3527_v0  ;;  %v3528_v51 = vmax.f32 %v3496_v11, 0.0  ;;  %v3419_v47 = vadd.f32 %v4087_v15, %v6087_v14  ;;  %v3410_v55 = vpop.f32.mrb[185].mxu1 }
 0x484   : > { %3557 = vst [vmem:[%s6103_s23 + $0xa0] sm:$0xff] %v3525_v30  ;;  %v3526_v29 = vmax.f32 %v3494_v7, 0.0  ;;  %v3411_v45 = vadd.f32 %v6087_v14, %v3410_v55  ;;  %v4088_v54 = vpop.f32.mrb[186].mxu1 }
 0x485   : > { %3560 = vst [vmem:[%s6103_s23 + $0xb8] sm:$0xff] %v3528_v51  ;;  %v3467_v37 = vmax.f32 %v3419_v47, 0.0  ;;  %v3422_v36 = vadd.f32 %v4088_v54, %v6087_v14  ;;  %v3413_v4 = vpop.f32.mrb[187].mxu1 }
 0x486   : > { %3558 = vst [vmem:[%s6103_s23 + $0xa8] sm:$0xff] %v3526_v29  ;;  %v3465_v22 = vmax.f32 %v3411_v45, 0.0  ;;  %v3414_v28 = vadd.f32 %v6087_v14, %v3413_v4 }
 0x487   : > { %v3499_v60 = vadd.f32 %v3467_v37, %v663_v32  ;;  %v3468_v17 = vmax.f32 %v3422_v36, 0.0 }
 0x488   : > { %v3497_v46 = vadd.f32 %v3465_v22, %v653_v12  ;;  %v3466_v39 = vmax.f32 %v3414_v28, 0.0 }
 0x489   : > { %v3531_v63 = vmax.f32 %v3499_v60, 0.0  ;;  %v3500_v8 = vadd.f32 %v3468_v17, %v667_v6 }
 0x48a   : > { %v3529_v49 = vmax.f32 %v3497_v46, 0.0  ;;  %v3498_v61 = vadd.f32 %v3466_v39, %v657_v62  ;;  %v4091_v57 = vpop.f32.mrb[188].mxu1 }
 0x48b   : > { %3563 = vst [vmem:[%s6103_s23 + $0xd0] sm:$0xff] %v3531_v63  ;;  %v3532_v23 = vmax.f32 %v3500_v8, 0.0  ;;  %v3435_v41 = vadd.f32 %v4091_v57, %v6087_v14  ;;  %v3426_v16 = vpop.f32.mrb[189].mxu1 }
 0x48c   : > { %3561 = vst [vmem:[%s6103_s23 + $0xc0] sm:$0xff] %v3529_v49  ;;  %v3530_v35 = vmax.f32 %v3498_v61, 0.0  ;;  %v3427_v42 = vadd.f32 %v6087_v14, %v3426_v16  ;;  %v4092_v2 = vpop.f32.mrb[190].mxu1 }
 0x48d   : > { %3564 = vst [vmem:[%s6103_s23 + $0xd8] sm:$0xff] %v3532_v23  ;;  %v3471_v9 = vmax.f32 %v3435_v41, 0.0  ;;  %v3438_v18 = vadd.f32 %v4092_v2, %v6087_v14  ;;  %v3429_v56 = vpop.f32.mrb[191].mxu1 }
 0x48e   : > { %3562 = vst [vmem:[%s6103_s23 + $0xc8] sm:$0xff] %v3530_v35  ;;  %v3469_v27 = vmax.f32 %v3427_v42, 0.0  ;;  %v3430_v40 = vadd.f32 %v6087_v14, %v3429_v56 }
 0x48f   : > { %v3503_v19 = vadd.f32 %v3471_v9, %v683_v31  ;;  %v3472_v44 = vmax.f32 %v3438_v18, 0.0 }
 0x490   : > { %v3501_v58 = vadd.f32 %v3469_v27, %v673_v3  ;;  %v3470_v21 = vmax.f32 %v3430_v40, 0.0 }
 0x491   : > { %v3535_v5 = vmax.f32 %v3503_v19, 0.0  ;;  %v3504_v53 = vadd.f32 %v3472_v44, %v6393_v50 }
 0x492   : > { %v3533_v48 = vmax.f32 %v3501_v58, 0.0  ;;  %v3502_v10 = vadd.f32 %v3470_v21, %v6394_v13 }
 0x493   : > { %3567 = vst [vmem:[%s6103_s23 + $0xf0] sm:$0xff] %v3535_v5  ;;  %v3536_v43 = vmax.f32 %v3504_v53, 0.0 }
 0x494   : > { %3565 = vst [vmem:[%s6103_s23 + $0xe0] sm:$0xff] %v3533_v48  ;;  %v3534_v14 = vmax.f32 %v3502_v10, 0.0 }
 0x495   : > { %3568 = vst [vmem:[%s6103_s23 + $0xf8] sm:$0xff] %v3536_v43 }
 0x496   : > { %3566 = vst [vmem:[%s6103_s23 + $0xe8] sm:$0xff] %v3534_v14 }
 0x497   : > { %4434 = shalt.err (!%p4431_p4)
}
 0x498   : > { %s4435_s11 = scalar_lea.hbm %s6221_s19, 4096  ;;  %s4439_s12 = scalar_lea.hbm %s6277_s7, 8192 }
 0x499   : > { %p4436_p9 = scmp.ne.s32.totalorder %s6221_s19, %s4435_s11  ;;  %p4440_p8 = scmp.lt.u32.totalorder %s6221_s19, %s6277_s7 }
 0x49a   : > { %p4441_p13 = scmp.lt.u32.totalorder %s4439_s12, %s4435_s11  ;;  %p4443_p10 = scmp.lt.u32.totalorder %s4435_s11, %s6221_s19 }
 0x49b   : > { %p4437_p0 = pnand %p4436_p9, %p4696_p5 }
 0x49c   : > { %p4442_p6 = por %p4441_p13, %p4440_p8 }
 0x49d   : > { %p4438_p11 = pneg %p4437_p0 }
 0x49e   : > { %p4444_p3 = por %p4443_p10, %p4442_p6 }
 0x4a0   : > { %p4445_p7 = pnand %p4444_p3, %p4438_p11 }
 0x4a2   : > { %4448 = shalt.err (!%p4445_p7)
}
 0x4a3   : > { %s4509_s10 = smov 128   ;;  %s4510_s16 = smov 8  }
 0x4a4   : > { %4107 = dma.vmem_to_hbm [thread:$0]  (%p4696_p5), %s6223_s15, 4096, %s6221_s19, %s3570_s28, %s4509_s10, %s4509_s10, %s4510_s16  }
 0x4a5 PF: > { %s3598_s22 = sand.u32 1, %s4483_s24   ;;  %p6395_p12 = scmp.ne.s32.totalorder %s6293_s8, 0 }
 0x4a6   : > { %p6396_p1 = scmp.ge.s32.totalorder %s4495_s27, 2  ;;  %s3599_s1 = scalar_lea.sflag [#allocation4], %s3598_s22 }
 0x4a8   : > { %p4124_p2 = pnand %p6396_p1, %p6395_p12 }
 0x4aa   : > { %4478 = dma.done.wait (!%p4124_p2), %s3599_s1, 4096  }
 0x4ab   : > { %4480 = vsyncadd (!%p4124_p2), %s3599_s1, 4294963200  ;;  %p22_p4 = scmp.ge.s32.totalorder %s4682_s13, 4   ;;  %s6397_s24 = smov %s4487_s25 }
 0x4ac   : > { %s6398_s25 = smov %s4491_s26  ;;  %s6399_s26 = smov %s4692_s17 }
 0x4ad   : > { %s6400_s27 = smov %s4682_s13  ;;  %24 = sbr.rel (!%p22_p4) target bundleno = 9 (0x9), region = 107 }
 0x4b4   :  { %3604 = vsyncpa [#allocation3], 1 }
 0x4b5   :  { %3606 = vsyncpa [#allocation3 + $0x1], 1 }
 0x4b6   :  { %3607 = vsyncpa [#allocation6], 1 }
 0x4b7   :  { %3608 = vsyncpa [#allocation9], 1 }
 0x4b8   :  { %3609 = vsyncpa [#allocation4], 1 }
 0x4b9   :  { %3611 = vsyncpa [#allocation4 + $0x1], 1 }

</bundles_post_ra>
